<compile_context>
chip_gen: v6e
topology: v6e:2x2x1
jax: 0.10.0
libtpu: 0.0.40
codegen_flags: <defaults>
</compile_context>

<pallas_src>
import jax
import jax.numpy as jnp
from jax import lax
from jax.experimental import pallas as pl
from jax.experimental.pallas import tpu as pltpu

INPUT = 257            # spectrogram bins
FP = 384               # INPUT zero-padded up to a multiple of 128
H0 = 100               # real LSTM hidden size
HP = 128               # padded LSTM hidden size (lane aligned)
E = 128                # linear1 output / attention embed dim
NUM_HEADS = 8
HEAD_DIM = E // NUM_HEADS


def _vmem_budget():
    """Per-kernel VMEM budget: ~75% of physical (96 MiB on the 128 MiB v5e/v6e
    parts, 48 MiB on the 64 MiB v7x part); conservative 48 MiB fallback."""
    phys = 64 * 1024 * 1024
    try:
        cap = getattr(pltpu.get_tpu_info(), "vmem_capacity_bytes", None)
        if cap:
            phys = int(cap)
    except Exception:
        pass
    return min((phys * 3) // 4, 96 * 1024 * 1024)


# -----------------------------------------------------------------------------
# Kernel 1: fused bidirectional LSTM.
#
# Gate-column layout (direction-major, 8 blocks of HP lanes):
#     [ i_f | f_f | o_f | g_f | i_b | f_b | o_b | g_b ]
# The input projection for every timestep is one MXU matmul into a VMEM
# scratch; both directions advance in a single fori_loop (forward consumes
# x[t], backward consumes x[T-1-t]); the recurrence uses the two
# block-diagonal (HP, 4*HP) recurrent matrices (one per direction).
# Output is written time-major (T, bb, 2*HP) -> sublane-dense per-step stores.
# -----------------------------------------------------------------------------
def _bilstm_kernel(x_ref, wih_ref, whhf_ref, whhb_ref, b_ref, out_ref, xp_ref):
    bb, T, _ = x_ref.shape
    G = 8 * HP

    # Input projection for all timesteps in one matmul: (bb*T, FP) @ (FP, 8H).
    x2d = x_ref[...].reshape(bb * T, FP)
    xp = lax.dot_general(x2d, wih_ref[...], (((1,), (0,)), ((), ())),
                         preferred_element_type=jnp.float32) + b_ref[...]
    xp_ref[...] = xp.reshape(bb, T, G)
    # TODO(synk): for bb % 8 == 0 a time-major xp layout (T, bb, 8*HP) (fed by a
    # time-major input block) would make the per-step xp loads fully dense too.
    # TODO(synk): optional bf16 matmul operands (f32 state/nonlinearities) would
    # cut MXU passes ~3x and halve xp; needs validation on real accuracy.

    def step(t, carry):
        h_f, h_b, c_f, c_b = carry
        rt = T - 1 - t
        # Contiguous 512-lane blocks; no cross-lane select needed.
        gx_f = xp_ref[:, pl.ds(t, 1), 0:4 * HP][:, 0, :]          # (bb, 4HP)
        gx_b = xp_ref[:, pl.ds(rt, 1), 4 * HP:8 * HP][:, 0, :]    # (bb, 4HP)
        g_f = gx_f + jnp.dot(h_f, whhf_ref[...],
                             preferred_element_type=jnp.float32)
        g_b = gx_b + jnp.dot(h_b, whhb_ref[...],
                             preferred_element_type=jnp.float32)

        # Within-direction gate order [i, f, o, g]: one wide sigmoid + one tanh
        # per direction.
        s_f = jax.nn.sigmoid(g_f[:, 0:3 * HP])
        s_b = jax.nn.sigmoid(g_b[:, 0:3 * HP])
        t_f = jnp.tanh(g_f[:, 3 * HP:4 * HP])
        t_b = jnp.tanh(g_b[:, 3 * HP:4 * HP])

        c_f = s_f[:, HP:2 * HP] * c_f + s_f[:, 0:HP] * t_f
        c_b = s_b[:, HP:2 * HP] * c_b + s_b[:, 0:HP] * t_b
        h_f = s_f[:, 2 * HP:3 * HP] * jnp.tanh(c_f)
        h_b = s_b[:, 2 * HP:3 * HP] * jnp.tanh(c_b)

        # Time-major, sublane-dense stores (fwd half -> time t, bwd -> T-1-t).
        out_ref[pl.ds(t, 1), :, 0:HP] = h_f[None]
        out_ref[pl.ds(rt, 1), :, HP:2 * HP] = h_b[None]
        return h_f, h_b, c_f, c_b

    z = jnp.zeros((bb, HP), jnp.float32)
    lax.fori_loop(0, T, step, (z, z, z, z))


def _pick_batch_tile(B, T, budget):
    """Largest batch tile (<=128) dividing B that fits the VMEM budget and keeps
    the time-major output block (bb, 2HP) tile-friendly (bb%8==0 or bb==B).
    Bigger bb amortises the per-step whh weight push (M-amortization); note for
    v7x one could trade some bb for a grid of >=2 steps to use both cores."""
    w_bytes = (FP * 8 * HP + 2 * HP * 4 * HP + 8 * HP) * 4

    def fits(bb):
        per = bb * T * 4
        need = (2 * per * FP            # input block, double-buffered
                + 2 * per * 2 * HP      # time-major output block, double-buffered
                + 2 * per * 8 * HP      # xp scratch + matmul-result transient
                + 2 * w_bytes + (4 << 20))
        return need <= budget

    aligned = [d for d in range(1, B + 1)
               if B % d == 0 and d <= 128 and (d % 8 == 0 or d == B)]
    for bb in sorted(aligned, reverse=True):
        if fits(bb):
            return bb
    for bb in sorted((d for d in range(1, B + 1) if B % d == 0), reverse=True):
        if fits(bb):
            return bb
    return 1


def bilstm(x, p):
    B, T, F = x.shape
    if F < FP:                      # explicit zero pad -> clean K=384 contraction
        x = jnp.pad(x, ((0, 0), (0, 0), (0, FP - F)))
    budget = _vmem_budget()
    bb = _pick_batch_tile(B, T, budget)
    return pl.pallas_call(
        _bilstm_kernel,
        out_shape=jax.ShapeDtypeStruct((T, B, 2 * HP), jnp.float32),
        grid=(B // bb,),
        in_specs=[
            pl.BlockSpec((bb, T, FP), lambda i: (i, 0, 0)),
            pl.BlockSpec((FP, 8 * HP), lambda i: (0, 0)),
            pl.BlockSpec((HP, 4 * HP), lambda i: (0, 0)),
            pl.BlockSpec((HP, 4 * HP), lambda i: (0, 0)),
            pl.BlockSpec((1, 8 * HP), lambda i: (0, 0)),
        ],
        out_specs=pl.BlockSpec((T, bb, 2 * HP), lambda i: (0, i, 0)),
        scratch_shapes=[pltpu.VMEM((bb, T, 8 * HP), jnp.float32)],
        compiler_params=pltpu.CompilerParams(
            dimension_semantics=("parallel",),
            vmem_limit_bytes=budget),
    )(x, p["wih"], p["whhf"], p["whhb"], p["b"])


# -----------------------------------------------------------------------------
# Kernel 2: linear1 + ReLU -> fused qkv -> 8-head self-attention -> LayerNorm
#           -> frame score -> time average; several batch rows per grid step.
# -----------------------------------------------------------------------------
def _head_kernel(x_ref, w1_ref, b1_ref, wqkv_ref, bqkv_ref, wo_ref, bo_ref,
                 ga_ref, be_ref, ws_ref, bs_ref, frame_ref, avg_ref):
    T, bb2, _ = x_ref.shape
    for r in range(bb2):                                      # static unroll
        x = x_ref[:, pl.ds(r, 1), :][:, 0, :]                 # (T, 2*HP)

        # linear1 + ReLU (dropout p=0.3 == identity at inference).
        lin = jnp.dot(x, w1_ref[...],
                      preferred_element_type=jnp.float32) + b1_ref[...]
        lin = jnp.maximum(lin, 0.0)

        # Fused q/k/v projection: one (T,128)@(128,384) matmul; the
        # 1/sqrt(head_dim) query scale is folded into wq/bq.
        qkv = jnp.dot(lin, wqkv_ref[...],
                      preferred_element_type=jnp.float32) + bqkv_ref[...]
        q = qkv[:, 0:E]
        k = qkv[:, E:2 * E]
        v = qkv[:, 2 * E:3 * E]

        # One head at a time (single (T,T) score tile live); contexts are
        # lane-concatenated and pushed through ONE K=128 output projection.
        # TODO(synk): flash-style KV tiling for long T (>~2.5k) on v7x's 64 MiB.
        ctx_parts = []
        for h in range(NUM_HEADS):
            sl = slice(h * HEAD_DIM, (h + 1) * HEAD_DIM)
            s = lax.dot_general(q[:, sl], k[:, sl], (((1,), (1,)), ((), ())),
                                preferred_element_type=jnp.float32)   # (T, T)
            s = s - jnp.max(s, axis=-1, keepdims=True)
            ex = jnp.exp(s)
            pr = ex / jnp.sum(ex, axis=-1, keepdims=True)
            ctx_parts.append(jnp.dot(pr, v[:, sl],
                                     preferred_element_type=jnp.float32))
        ctx = jnp.concatenate(ctx_parts, axis=-1)                     # (T, E)
        attn = jnp.dot(ctx, wo_ref[...],
                       preferred_element_type=jnp.float32) + bo_ref[...]

        # LayerNorm(128), eps = 1e-5 (PyTorch default).
        mean = jnp.mean(attn, axis=-1, keepdims=True)
        var = jnp.mean(jnp.square(attn - mean), axis=-1, keepdims=True)
        y = (attn - mean) * lax.rsqrt(var + 1e-5) * ga_ref[...] + be_ref[...]

        # Lane-dense frame scores: (1, T) = ws (1,E) contracted against y (T,E).
        row = lax.dot_general(ws_ref[...], y, (((1,), (1,)), ((), ())),
                              preferred_element_type=jnp.float32) + bs_ref[...]
        frame_ref[pl.ds(r, 1), :, :] = row[:, None, :]                # (1,1,T)
        avg_ref[pl.ds(r, 1), :, :] = jnp.mean(row, axis=-1,
                                              keepdims=True)[:, None, :]


def _pick_head_rows(B, T, budget):
    """Rows per grid step: prefer a small aligned tile (>= min(B,8) rows) to
    amortise per-step overhead while keeping one (T,T) score tile live."""
    w_bytes = (2 * HP * E + E + E * 3 * E + 3 * E + E * E + E + 4 * E + 1) * 4
    fixed = T * T * 4 + T * (2 * HP + E + 3 * E + 2 * E) * 4 + 2 * w_bytes + (2 << 20)

    def fits(d):
        return 2 * d * T * 2 * HP * 4 + 2 * d * (T + 1) * 4 + fixed <= budget

    aligned = sorted(d for d in range(1, B + 1)
                     if B % d == 0 and (d % 8 == 0 or d == B))
    for d in aligned:
        if d >= min(B, 8) and fits(d):
            return d
    for d in reversed(aligned):
        if fits(d):
            return d
    for d in sorted((d for d in range(1, B + 1) if B % d == 0), reverse=True):
        if fits(d):
            return d
    return 1


def head(lstm_out, p):
    T, B, _ = lstm_out.shape
    budget = _vmem_budget()
    bb2 = _pick_head_rows(B, T, budget)
    wnames = ("w1", "b1", "wqkv", "bqkv", "wo", "bo",
              "gamma", "beta", "ws", "bs")
    weight_specs = [pl.BlockSpec(p[n].shape, lambda b: (0, 0)) for n in wnames]
    return pl.pallas_call(
        _head_kernel,
        out_shape=(jax.ShapeDtypeStruct((B, 1, T), jnp.float32),
                   jax.ShapeDtypeStruct((B, 1, 1), jnp.float32)),
        grid=(B // bb2,),
        in_specs=[pl.BlockSpec((T, bb2, 2 * HP), lambda b: (0, b, 0))]
        + weight_specs,
        out_specs=(pl.BlockSpec((bb2, 1, T), lambda b: (b, 0, 0)),
                   pl.BlockSpec((bb2, 1, 1), lambda b: (b, 0, 0))),
        compiler_params=pltpu.CompilerParams(
            dimension_semantics=("parallel",),
            vmem_limit_bytes=budget),
    )(lstm_out, *[p[n] for n in wnames])


# -----------------------------------------------------------------------------
# Full forward pass.
# -----------------------------------------------------------------------------
@jax.jit
def hasanet_forward(x, params):
    lstm_out = bilstm(x, params)            # (T, B, 256) time-major [fwd | bwd]
    frame, avg = head(lstm_out, params)     # (B, 1, T), (B, 1, 1)
    return frame, avg[:, :, 0]              # n_o=False branch (no sigmoid)


# -----------------------------------------------------------------------------
# Parameters: PyTorch-layout random init + one-time host-side repack/padding.
# -----------------------------------------------------------------------------
def init_raw_params(key):
    ks = jax.random.split(key, 16)

    def u(k, shape, bound):
        return jax.random.uniform(k, shape, jnp.float32, -bound, bound)

    kl = 1.0 / (H0 ** 0.5)
    k1 = 1.0 / ((2 * H0) ** 0.5)
    kE = 1.0 / (E ** 0.5)
    return {
        # BiLSTM, PyTorch layout: (4H, in) / (4H, H), gate order (i, f, g, o).
        "wih_f": u(ks[0], (4 * H0, INPUT), kl), "whh_f": u(ks[1], (4 * H0, H0), kl),
        "bih_f": u(ks[2], (4 * H0,), kl), "bhh_f": u(ks[3], (4 * H0,), kl),
        "wih_b": u(ks[4], (4 * H0, INPUT), kl), "whh_b": u(ks[5], (4 * H0, H0), kl),
        "bih_b": u(ks[6], (4 * H0,), kl), "bhh_b": u(ks[7], (4 * H0,), kl),
        # linear1: 200 -> 128
        "w1": u(ks[8], (E, 2 * H0), k1), "b1": u(ks[9], (E,), k1),
        # MultiheadAttention(128, 8)
        "in_proj_w": u(ks[10], (3 * E, E), kE), "in_proj_b": u(ks[11], (3 * E,), kE),
        "out_w": u(ks[12], (E, E), kE), "out_b": u(ks[13], (E,), kE),
        # LayerNorm(128)
        "gamma": jnp.ones((E,), jnp.float32), "beta": jnp.zeros((E,), jnp.float32),
        # frame score: 128 -> 1
        "ws": u(ks[14], (1, E), kE), "bs": u(ks[15], (1,), kE),
    }


def prepare_params(raw):
    """One-time repack: pad H 100->128, INPUT 257->384, direction-major gate
    columns ([i f o g] per direction), per-direction recurrent matrices,
    everything in `x @ W` form, qkv fused, query scale folded into wq/bq."""
    wih = jnp.zeros((FP, 8 * HP), jnp.float32)
    b = jnp.zeros((1, 8 * HP), jnp.float32)
    whh = {"f": jnp.zeros((HP, 4 * HP), jnp.float32),
           "b": jnp.zeros((HP, 4 * HP), jnp.float32)}
    slot_to_gate = (0, 1, 3, 2)              # our [i, f, o, g] <- PyTorch [i, f, g, o]
    for d, sfx in enumerate(("f", "b")):     # 0 = forward, 1 = backward
        wih_d = raw["wih_" + sfx]
        whh_d = raw["whh_" + sfx]
        bias_d = raw["bih_" + sfx] + raw["bhh_" + sfx]
        for slot, g in enumerate(slot_to_gate):
            cs = (4 * d + slot) * HP
            wih = wih.at[:INPUT, cs:cs + H0].set(wih_d[g * H0:(g + 1) * H0, :].T)
            b = b.at[0, cs:cs + H0].set(bias_d[g * H0:(g + 1) * H0])
            whh[sfx] = whh[sfx].at[0:H0, slot * HP:slot * HP + H0].set(
                whh_d[g * H0:(g + 1) * H0, :].T)

    # linear1 remapped to the padded LSTM output layout [fwd(128) | bwd(128)].
    w1 = jnp.zeros((2 * HP, E), jnp.float32)
    w1 = w1.at[0:H0, :].set(raw["w1"][:, 0:H0].T)
    w1 = w1.at[HP:HP + H0, :].set(raw["w1"][:, H0:2 * H0].T)
    b1 = raw["b1"].reshape(1, E)

    # MHA: q/k/v fused into one (E, 3E) weight; query scale folded into wq/bq.
    scale = 1.0 / (HEAD_DIM ** 0.5)
    wq = raw["in_proj_w"][0:E].T * scale
    wk = raw["in_proj_w"][E:2 * E].T
    wv = raw["in_proj_w"][2 * E:3 * E].T
    bq = raw["in_proj_b"][0:E] * scale
    bk = raw["in_proj_b"][E:2 * E]
    bv = raw["in_proj_b"][2 * E:3 * E]
    wqkv = jnp.concatenate([wq, wk, wv], axis=1)              # (E, 3E)
    bqkv = jnp.concatenate([bq, bk, bv]).reshape(1, 3 * E)
    wo = raw["out_w"].T
    bo = raw["out_b"].reshape(1, E)

    return dict(
        wih=wih, whhf=whh["f"], whhb=whh["b"], b=b, w1=w1, b1=b1,
        wqkv=wqkv, bqkv=bqkv, wo=wo, bo=bo,
        gamma=raw["gamma"].reshape(1, E), beta=raw["beta"].reshape(1, E),
        ws=raw["ws"].reshape(1, E), bs=raw["bs"].reshape(1, 1),
    )


# -----------------------------------------------------------------------------
# Pure-JAX reference (used only for a loose in-script sanity check).
# -----------------------------------------------------------------------------
def reference_forward(x, raw):
    PH = lax.Precision.HIGHEST
    B, T, _ = x.shape

    def lstm_dir(wih, whh, bih, bhh, reverse):
        bias = bih + bhh

        def step(carry, xt):
            h, c = carry
            gates = (jnp.dot(xt, wih.T, precision=PH)
                     + jnp.dot(h, whh.T, precision=PH) + bias)
            i = jax.nn.sigmoid(gates[:, 0:H0])
            f = jax.nn.sigmoid(gates[:, H0:2 * H0])
            g = jnp.tanh(gates[:, 2 * H0:3 * H0])
            o = jax.nn.sigmoid(gates[:, 3 * H0:4 * H0])
            c = f * c + i * g
            h = o * jnp.tanh(c)
            return (h, c), h

        xs = jnp.swapaxes(x, 0, 1)
        if reverse:
            xs = xs[::-1]
        _, hs = lax.scan(step, (jnp.zeros((B, H0), jnp.float32),
                                jnp.zeros((B, H0), jnp.float32)), xs)
        if reverse:
            hs = hs[::-1]
        return jnp.swapaxes(hs, 0, 1)

    out = jnp.concatenate([
        lstm_dir(raw["wih_f"], raw["whh_f"], raw["bih_f"], raw["bhh_f"], False),
        lstm_dir(raw["wih_b"], raw["whh_b"], raw["bih_b"], raw["bhh_b"], True),
    ], axis=-1)
    lin = jax.nn.relu(jnp.dot(out, raw["w1"].T, precision=PH) + raw["b1"])

    scale = 1.0 / (HEAD_DIM ** 0.5)
    q = jnp.dot(lin, raw["in_proj_w"][0:E].T, precision=PH) + raw["in_proj_b"][0:E]
    k = jnp.dot(lin, raw["in_proj_w"][E:2 * E].T, precision=PH) + raw["in_proj_b"][E:2 * E]
    v = jnp.dot(lin, raw["in_proj_w"][2 * E:].T, precision=PH) + raw["in_proj_b"][2 * E:]
    qh = q.reshape(B, T, NUM_HEADS, HEAD_DIM)
    kh = k.reshape(B, T, NUM_HEADS, HEAD_DIM)
    vh = v.reshape(B, T, NUM_HEADS, HEAD_DIM)
    s = jnp.einsum("bthd,bshd->bhts", qh, kh, precision=PH) * scale
    pr = jax.nn.softmax(s, axis=-1)
    ctx = jnp.einsum("bhts,bshd->bthd", pr, vh, precision=PH).reshape(B, T, E)
    attn = jnp.dot(ctx, raw["out_w"].T, precision=PH) + raw["out_b"]

    mean = attn.mean(-1, keepdims=True)
    var = ((attn - mean) ** 2).mean(-1, keepdims=True)
    y = (attn - mean) / jnp.sqrt(var + 1e-5) * raw["gamma"] + raw["beta"]
    score = jnp.dot(y, raw["ws"].T, precision=PH) + raw["bs"]       # (B, T, 1)
    fram = jnp.swapaxes(score, 1, 2)                                # (B, 1, T)
    return fram, jnp.mean(fram, axis=-1)                            # (B,1,T), (B,1)


if __name__ == "__main__":
    key = jax.random.PRNGKey(0)
    k_param, k_x = jax.random.split(key)
    raw = init_raw_params(k_param)
    params = prepare_params(raw)

    B, T = 2, 8
    x = jax.random.normal(k_x, (B, T, INPUT), dtype=jnp.float32)

    hasqi_fram, hasqi_avg = hasanet_forward(x, params)
    jax.block_until_ready((hasqi_fram, hasqi_avg))

    assert hasqi_fram.shape == (B, 1, T)
    assert hasqi_avg.shape == (B, 1)

    # Loose cross-check against a pure-JAX reference: this guards the fused /
    # padded weight-layout logic (layout bugs produce O(1) errors), not ULPs.
    ref_fram, ref_avg = reference_forward(x, raw)
    err = max(float(jnp.max(jnp.abs(hasqi_fram - ref_fram))),
              float(jnp.max(jnp.abs(hasqi_avg - ref_avg))))
    assert err < 5e-2, f"mismatch vs reference: {err}"

    print("KERNEL_OK")
</pallas_src>

<mosaic_0001>
module attributes {stable_mosaic.version = 11 : i64} {
  func.func @_head_kernel(%arg0: i32, %arg1: memref<8x2x256xf32, #tpu.memory_space<vmem>>, %arg2: memref<256x128xf32, #tpu.memory_space<vmem>>, %arg3: memref<1x128xf32, #tpu.memory_space<vmem>>, %arg4: memref<128x384xf32, #tpu.memory_space<vmem>>, %arg5: memref<1x384xf32, #tpu.memory_space<vmem>>, %arg6: memref<128x128xf32, #tpu.memory_space<vmem>>, %arg7: memref<1x128xf32, #tpu.memory_space<vmem>>, %arg8: memref<1x128xf32, #tpu.memory_space<vmem>>, %arg9: memref<1x128xf32, #tpu.memory_space<vmem>>, %arg10: memref<1x128xf32, #tpu.memory_space<vmem>>, %arg11: memref<1x1xf32, #tpu.memory_space<vmem>>, %arg12: memref<2x1x8xf32, #tpu.memory_space<vmem>>, %arg13: memref<2x1x1xf32, #tpu.memory_space<vmem>>) attributes {dimension_semantics = [#tpu.dimension_semantics<parallel>], iteration_bounds = array<i64: 1>, scalar_prefetch = 0 : i64, scratch_operands = 0 : i64, tpu.core_type = #tpu.core_type<tc>, window_params = [{transform_indices = @transform_0, window_bounds = array<i64: 8, 2, 256>}, {pipeline_mode = #tpu.pipeline_mode<synchronous>, transform_indices = @transform_1, window_bounds = array<i64: 256, 128>}, {pipeline_mode = #tpu.pipeline_mode<synchronous>, transform_indices = @transform_2, window_bounds = array<i64: 1, 128>}, {pipeline_mode = #tpu.pipeline_mode<synchronous>, transform_indices = @transform_3, window_bounds = array<i64: 128, 384>}, {pipeline_mode = #tpu.pipeline_mode<synchronous>, transform_indices = @transform_4, window_bounds = array<i64: 1, 384>}, {pipeline_mode = #tpu.pipeline_mode<synchronous>, transform_indices = @transform_5, window_bounds = array<i64: 128, 128>}, {pipeline_mode = #tpu.pipeline_mode<synchronous>, transform_indices = @transform_6, window_bounds = array<i64: 1, 128>}, {pipeline_mode = #tpu.pipeline_mode<synchronous>, transform_indices = @transform_7, window_bounds = array<i64: 1, 128>}, {pipeline_mode = #tpu.pipeline_mode<synchronous>, transform_indices = @transform_8, window_bounds = array<i64: 1, 128>}, {pipeline_mode = #tpu.pipeline_mode<synchronous>, transform_indices = @transform_9, window_bounds = array<i64: 1, 128>}, {pipeline_mode = #tpu.pipeline_mode<synchronous>, transform_indices = @transform_10, window_bounds = array<i64: 1, 1>}, {transform_indices = @transform_11, window_bounds = array<i64: 2, 1, 8>}, {transform_indices = @transform_12, window_bounds = array<i64: 2, 1, 1>}]} {
    %c0 = arith.constant 0 : index
    %c0_0 = arith.constant 0 : index
    %c0_1 = arith.constant 0 : index
    %0 = vector.load %arg1[%c0, %c0_0, %c0_1] : memref<8x2x256xf32, #tpu.memory_space<vmem>>, vector<8x1x256xf32>
    %1 = vector.shape_cast %0 : vector<8x1x256xf32> to vector<8x256xf32>
    %c0_2 = arith.constant 0 : index
    %c0_3 = arith.constant 0 : index
    %2 = vector.load %arg2[%c0_2, %c0_3] : memref<256x128xf32, #tpu.memory_space<vmem>>, vector<256x128xf32>
    %cst = arith.constant dense<0.000000e+00> : vector<8x128xf32>
    %3 = tpu.matmul %1, %2, %cst {dimension_numbers = #tpu.dot_dimension_numbers<[1], [0], [0], [1], [0, 0, 1, 1], [], []>} : vector<8x256xf32>, vector<256x128xf32>, vector<8x128xf32> -> vector<8x128xf32>
    %c0_4 = arith.constant 0 : index
    %c0_5 = arith.constant 0 : index
    %4 = vector.load %arg3[%c0_4, %c0_5] : memref<1x128xf32, #tpu.memory_space<vmem>>, vector<1x128xf32>
    %5 = vector.broadcast %4 : vector<1x128xf32> to vector<8x128xf32>
    %6 = arith.addf %3, %5 : vector<8x128xf32>
    %cst_6 = arith.constant 0.000000e+00 : f32
    %7 = vector.broadcast %cst_6 : f32 to vector<8x128xf32>
    %8 = arith.maximumf %6, %7 : vector<8x128xf32>
    %c0_7 = arith.constant 0 : index
    %c0_8 = arith.constant 0 : index
    %9 = vector.load %arg4[%c0_7, %c0_8] : memref<128x384xf32, #tpu.memory_space<vmem>>, vector<128x384xf32>
    %cst_9 = arith.constant dense<0.000000e+00> : vector<8x384xf32>
    %10 = tpu.matmul %8, %9, %cst_9 {dimension_numbers = #tpu.dot_dimension_numbers<[1], [0], [0], [1], [0, 0, 1, 1], [], []>} : vector<8x128xf32>, vector<128x384xf32>, vector<8x384xf32> -> vector<8x384xf32>
    %c0_10 = arith.constant 0 : index
    %c0_11 = arith.constant 0 : index
    %11 = vector.load %arg5[%c0_10, %c0_11] : memref<1x384xf32, #tpu.memory_space<vmem>>, vector<1x384xf32>
    %12 = vector.broadcast %11 : vector<1x384xf32> to vector<8x384xf32>
    %13 = arith.addf %10, %12 : vector<8x384xf32>
    %14 = vector.extract_strided_slice %13 {offsets = [0, 0], sizes = [8, 128], strides = [1, 1]} : vector<8x384xf32> to vector<8x128xf32>
    %15 = vector.extract_strided_slice %13 {offsets = [0, 128], sizes = [8, 128], strides = [1, 1]} : vector<8x384xf32> to vector<8x128xf32>
    %16 = vector.extract_strided_slice %13 {offsets = [0, 256], sizes = [8, 128], strides = [1, 1]} : vector<8x384xf32> to vector<8x128xf32>
    %17 = vector.extract_strided_slice %14 {offsets = [0, 0], sizes = [8, 16], strides = [1, 1]} : vector<8x128xf32> to vector<8x16xf32>
    %18 = vector.extract_strided_slice %15 {offsets = [0, 0], sizes = [8, 16], strides = [1, 1]} : vector<8x128xf32> to vector<8x16xf32>
    %cst_12 = arith.constant dense<0.000000e+00> : vector<8x8xf32>
    %19 = tpu.matmul %17, %18, %cst_12 {dimension_numbers = #tpu.dot_dimension_numbers<[1], [1], [0], [0], [0, 0, 1, 0], [], []>} : vector<8x16xf32>, vector<8x16xf32>, vector<8x8xf32> -> vector<8x8xf32>
    %cst_13 = arith.constant dense<0xFF800000> : vector<8xf32>
    %20 = vector.multi_reduction <maximumf>, %19, %cst_13 [1] : vector<8x8xf32> to vector<8xf32>
    %21 = vector.shape_cast %20 : vector<8xf32> to vector<8x1xf32>
    %22 = vector.broadcast %21 : vector<8x1xf32> to vector<8x8xf32>
    %23 = arith.subf %19, %22 : vector<8x8xf32>
    %24 = math.exp %23 : vector<8x8xf32>
    %cst_14 = arith.constant dense<0.000000e+00> : vector<8xf32>
    %25 = vector.multi_reduction <add>, %24, %cst_14 [1] : vector<8x8xf32> to vector<8xf32>
    %26 = vector.shape_cast %25 : vector<8xf32> to vector<8x1xf32>
    %27 = vector.broadcast %26 : vector<8x1xf32> to vector<8x8xf32>
    %28 = arith.divf %24, %27 : vector<8x8xf32>
    %29 = vector.extract_strided_slice %16 {offsets = [0, 0], sizes = [8, 16], strides = [1, 1]} : vector<8x128xf32> to vector<8x16xf32>
    %cst_15 = arith.constant dense<0.000000e+00> : vector<8x16xf32>
    %30 = tpu.matmul %28, %29, %cst_15 {dimension_numbers = #tpu.dot_dimension_numbers<[1], [0], [0], [1], [0, 0, 1, 1], [], []>} : vector<8x8xf32>, vector<8x16xf32>, vector<8x16xf32> -> vector<8x16xf32>
    %31 = vector.extract_strided_slice %14 {offsets = [0, 16], sizes = [8, 16], strides = [1, 1]} : vector<8x128xf32> to vector<8x16xf32>
    %32 = vector.extract_strided_slice %15 {offsets = [0, 16], sizes = [8, 16], strides = [1, 1]} : vector<8x128xf32> to vector<8x16xf32>
    %cst_16 = arith.constant dense<0.000000e+00> : vector<8x8xf32>
    %33 = tpu.matmul %31, %32, %cst_16 {dimension_numbers = #tpu.dot_dimension_numbers<[1], [1], [0], [0], [0, 0, 1, 0], [], []>} : vector<8x16xf32>, vector<8x16xf32>, vector<8x8xf32> -> vector<8x8xf32>
    %cst_17 = arith.constant dense<0xFF800000> : vector<8xf32>
    %34 = vector.multi_reduction <maximumf>, %33, %cst_17 [1] : vector<8x8xf32> to vector<8xf32>
    %35 = vector.shape_cast %34 : vector<8xf32> to vector<8x1xf32>
    %36 = vector.broadcast %35 : vector<8x1xf32> to vector<8x8xf32>
    %37 = arith.subf %33, %36 : vector<8x8xf32>
    %38 = math.exp %37 : vector<8x8xf32>
    %cst_18 = arith.constant dense<0.000000e+00> : vector<8xf32>
    %39 = vector.multi_reduction <add>, %38, %cst_18 [1] : vector<8x8xf32> to vector<8xf32>
    %40 = vector.shape_cast %39 : vector<8xf32> to vector<8x1xf32>
    %41 = vector.broadcast %40 : vector<8x1xf32> to vector<8x8xf32>
    %42 = arith.divf %38, %41 : vector<8x8xf32>
    %43 = vector.extract_strided_slice %16 {offsets = [0, 16], sizes = [8, 16], strides = [1, 1]} : vector<8x128xf32> to vector<8x16xf32>
    %cst_19 = arith.constant dense<0.000000e+00> : vector<8x16xf32>
    %44 = tpu.matmul %42, %43, %cst_19 {dimension_numbers = #tpu.dot_dimension_numbers<[1], [0], [0], [1], [0, 0, 1, 1], [], []>} : vector<8x8xf32>, vector<8x16xf32>, vector<8x16xf32> -> vector<8x16xf32>
    %45 = vector.extract_strided_slice %14 {offsets = [0, 32], sizes = [8, 16], strides = [1, 1]} : vector<8x128xf32> to vector<8x16xf32>
    %46 = vector.extract_strided_slice %15 {offsets = [0, 32], sizes = [8, 16], strides = [1, 1]} : vector<8x128xf32> to vector<8x16xf32>
    %cst_20 = arith.constant dense<0.000000e+00> : vector<8x8xf32>
    %47 = tpu.matmul %45, %46, %cst_20 {dimension_numbers = #tpu.dot_dimension_numbers<[1], [1], [0], [0], [0, 0, 1, 0], [], []>} : vector<8x16xf32>, vector<8x16xf32>, vector<8x8xf32> -> vector<8x8xf32>
    %cst_21 = arith.constant dense<0xFF800000> : vector<8xf32>
    %48 = vector.multi_reduction <maximumf>, %47, %cst_21 [1] : vector<8x8xf32> to vector<8xf32>
    %49 = vector.shape_cast %48 : vector<8xf32> to vector<8x1xf32>
    %50 = vector.broadcast %49 : vector<8x1xf32> to vector<8x8xf32>
    %51 = arith.subf %47, %50 : vector<8x8xf32>
    %52 = math.exp %51 : vector<8x8xf32>
    %cst_22 = arith.constant dense<0.000000e+00> : vector<8xf32>
    %53 = vector.multi_reduction <add>, %52, %cst_22 [1] : vector<8x8xf32> to vector<8xf32>
    %54 = vector.shape_cast %53 : vector<8xf32> to vector<8x1xf32>
    %55 = vector.broadcast %54 : vector<8x1xf32> to vector<8x8xf32>
    %56 = arith.divf %52, %55 : vector<8x8xf32>
    %57 = vector.extract_strided_slice %16 {offsets = [0, 32], sizes = [8, 16], strides = [1, 1]} : vector<8x128xf32> to vector<8x16xf32>
    %cst_23 = arith.constant dense<0.000000e+00> : vector<8x16xf32>
    %58 = tpu.matmul %56, %57, %cst_23 {dimension_numbers = #tpu.dot_dimension_numbers<[1], [0], [0], [1], [0, 0, 1, 1], [], []>} : vector<8x8xf32>, vector<8x16xf32>, vector<8x16xf32> -> vector<8x16xf32>
    %59 = vector.extract_strided_slice %14 {offsets = [0, 48], sizes = [8, 16], strides = [1, 1]} : vector<8x128xf32> to vector<8x16xf32>
    %60 = vector.extract_strided_slice %15 {offsets = [0, 48], sizes = [8, 16], strides = [1, 1]} : vector<8x128xf32> to vector<8x16xf32>
    %cst_24 = arith.constant dense<0.000000e+00> : vector<8x8xf32>
    %61 = tpu.matmul %59, %60, %cst_24 {dimension_numbers = #tpu.dot_dimension_numbers<[1], [1], [0], [0], [0, 0, 1, 0], [], []>} : vector<8x16xf32>, vector<8x16xf32>, vector<8x8xf32> -> vector<8x8xf32>
    %cst_25 = arith.constant dense<0xFF800000> : vector<8xf32>
    %62 = vector.multi_reduction <maximumf>, %61, %cst_25 [1] : vector<8x8xf32> to vector<8xf32>
    %63 = vector.shape_cast %62 : vector<8xf32> to vector<8x1xf32>
    %64 = vector.broadcast %63 : vector<8x1xf32> to vector<8x8xf32>
    %65 = arith.subf %61, %64 : vector<8x8xf32>
    %66 = math.exp %65 : vector<8x8xf32>
    %cst_26 = arith.constant dense<0.000000e+00> : vector<8xf32>
    %67 = vector.multi_reduction <add>, %66, %cst_26 [1] : vector<8x8xf32> to vector<8xf32>
    %68 = vector.shape_cast %67 : vector<8xf32> to vector<8x1xf32>
    %69 = vector.broadcast %68 : vector<8x1xf32> to vector<8x8xf32>
    %70 = arith.divf %66, %69 : vector<8x8xf32>
    %71 = vector.extract_strided_slice %16 {offsets = [0, 48], sizes = [8, 16], strides = [1, 1]} : vector<8x128xf32> to vector<8x16xf32>
    %cst_27 = arith.constant dense<0.000000e+00> : vector<8x16xf32>
    %72 = tpu.matmul %70, %71, %cst_27 {dimension_numbers = #tpu.dot_dimension_numbers<[1], [0], [0], [1], [0, 0, 1, 1], [], []>} : vector<8x8xf32>, vector<8x16xf32>, vector<8x16xf32> -> vector<8x16xf32>
    %73 = vector.extract_strided_slice %14 {offsets = [0, 64], sizes = [8, 16], strides = [1, 1]} : vector<8x128xf32> to vector<8x16xf32>
    %74 = vector.extract_strided_slice %15 {offsets = [0, 64], sizes = [8, 16], strides = [1, 1]} : vector<8x128xf32> to vector<8x16xf32>
    %cst_28 = arith.constant dense<0.000000e+00> : vector<8x8xf32>
    %75 = tpu.matmul %73, %74, %cst_28 {dimension_numbers = #tpu.dot_dimension_numbers<[1], [1], [0], [0], [0, 0, 1, 0], [], []>} : vector<8x16xf32>, vector<8x16xf32>, vector<8x8xf32> -> vector<8x8xf32>
    %cst_29 = arith.constant dense<0xFF800000> : vector<8xf32>
    %76 = vector.multi_reduction <maximumf>, %75, %cst_29 [1] : vector<8x8xf32> to vector<8xf32>
    %77 = vector.shape_cast %76 : vector<8xf32> to vector<8x1xf32>
    %78 = vector.broadcast %77 : vector<8x1xf32> to vector<8x8xf32>
    %79 = arith.subf %75, %78 : vector<8x8xf32>
    %80 = math.exp %79 : vector<8x8xf32>
    %cst_30 = arith.constant dense<0.000000e+00> : vector<8xf32>
    %81 = vector.multi_reduction <add>, %80, %cst_30 [1] : vector<8x8xf32> to vector<8xf32>
    %82 = vector.shape_cast %81 : vector<8xf32> to vector<8x1xf32>
    %83 = vector.broadcast %82 : vector<8x1xf32> to vector<8x8xf32>
    %84 = arith.divf %80, %83 : vector<8x8xf32>
    %85 = vector.extract_strided_slice %16 {offsets = [0, 64], sizes = [8, 16], strides = [1, 1]} : vector<8x128xf32> to vector<8x16xf32>
    %cst_31 = arith.constant dense<0.000000e+00> : vector<8x16xf32>
    %86 = tpu.matmul %84, %85, %cst_31 {dimension_numbers = #tpu.dot_dimension_numbers<[1], [0], [0], [1], [0, 0, 1, 1], [], []>} : vector<8x8xf32>, vector<8x16xf32>, vector<8x16xf32> -> vector<8x16xf32>
    %87 = vector.extract_strided_slice %14 {offsets = [0, 80], sizes = [8, 16], strides = [1, 1]} : vector<8x128xf32> to vector<8x16xf32>
    %88 = vector.extract_strided_slice %15 {offsets = [0, 80], sizes = [8, 16], strides = [1, 1]} : vector<8x128xf32> to vector<8x16xf32>
    %cst_32 = arith.constant dense<0.000000e+00> : vector<8x8xf32>
    %89 = tpu.matmul %87, %88, %cst_32 {dimension_numbers = #tpu.dot_dimension_numbers<[1], [1], [0], [0], [0, 0, 1, 0], [], []>} : vector<8x16xf32>, vector<8x16xf32>, vector<8x8xf32> -> vector<8x8xf32>
    %cst_33 = arith.constant dense<0xFF800000> : vector<8xf32>
    %90 = vector.multi_reduction <maximumf>, %89, %cst_33 [1] : vector<8x8xf32> to vector<8xf32>
    %91 = vector.shape_cast %90 : vector<8xf32> to vector<8x1xf32>
    %92 = vector.broadcast %91 : vector<8x1xf32> to vector<8x8xf32>
    %93 = arith.subf %89, %92 : vector<8x8xf32>
    %94 = math.exp %93 : vector<8x8xf32>
    %cst_34 = arith.constant dense<0.000000e+00> : vector<8xf32>
    %95 = vector.multi_reduction <add>, %94, %cst_34 [1] : vector<8x8xf32> to vector<8xf32>
    %96 = vector.shape_cast %95 : vector<8xf32> to vector<8x1xf32>
    %97 = vector.broadcast %96 : vector<8x1xf32> to vector<8x8xf32>
    %98 = arith.divf %94, %97 : vector<8x8xf32>
    %99 = vector.extract_strided_slice %16 {offsets = [0, 80], sizes = [8, 16], strides = [1, 1]} : vector<8x128xf32> to vector<8x16xf32>
    %cst_35 = arith.constant dense<0.000000e+00> : vector<8x16xf32>
    %100 = tpu.matmul %98, %99, %cst_35 {dimension_numbers = #tpu.dot_dimension_numbers<[1], [0], [0], [1], [0, 0, 1, 1], [], []>} : vector<8x8xf32>, vector<8x16xf32>, vector<8x16xf32> -> vector<8x16xf32>
    %101 = vector.extract_strided_slice %14 {offsets = [0, 96], sizes = [8, 16], strides = [1, 1]} : vector<8x128xf32> to vector<8x16xf32>
    %102 = vector.extract_strided_slice %15 {offsets = [0, 96], sizes = [8, 16], strides = [1, 1]} : vector<8x128xf32> to vector<8x16xf32>
    %cst_36 = arith.constant dense<0.000000e+00> : vector<8x8xf32>
    %103 = tpu.matmul %101, %102, %cst_36 {dimension_numbers = #tpu.dot_dimension_numbers<[1], [1], [0], [0], [0, 0, 1, 0], [], []>} : vector<8x16xf32>, vector<8x16xf32>, vector<8x8xf32> -> vector<8x8xf32>
    %cst_37 = arith.constant dense<0xFF800000> : vector<8xf32>
    %104 = vector.multi_reduction <maximumf>, %103, %cst_37 [1] : vector<8x8xf32> to vector<8xf32>
    %105 = vector.shape_cast %104 : vector<8xf32> to vector<8x1xf32>
    %106 = vector.broadcast %105 : vector<8x1xf32> to vector<8x8xf32>
    %107 = arith.subf %103, %106 : vector<8x8xf32>
    %108 = math.exp %107 : vector<8x8xf32>
    %cst_38 = arith.constant dense<0.000000e+00> : vector<8xf32>
    %109 = vector.multi_reduction <add>, %108, %cst_38 [1] : vector<8x8xf32> to vector<8xf32>
    %110 = vector.shape_cast %109 : vector<8xf32> to vector<8x1xf32>
    %111 = vector.broadcast %110 : vector<8x1xf32> to vector<8x8xf32>
    %112 = arith.divf %108, %111 : vector<8x8xf32>
    %113 = vector.extract_strided_slice %16 {offsets = [0, 96], sizes = [8, 16], strides = [1, 1]} : vector<8x128xf32> to vector<8x16xf32>
    %cst_39 = arith.constant dense<0.000000e+00> : vector<8x16xf32>
    %114 = tpu.matmul %112, %113, %cst_39 {dimension_numbers = #tpu.dot_dimension_numbers<[1], [0], [0], [1], [0, 0, 1, 1], [], []>} : vector<8x8xf32>, vector<8x16xf32>, vector<8x16xf32> -> vector<8x16xf32>
    %115 = vector.extract_strided_slice %14 {offsets = [0, 112], sizes = [8, 16], strides = [1, 1]} : vector<8x128xf32> to vector<8x16xf32>
    %116 = vector.extract_strided_slice %15 {offsets = [0, 112], sizes = [8, 16], strides = [1, 1]} : vector<8x128xf32> to vector<8x16xf32>
    %cst_40 = arith.constant dense<0.000000e+00> : vector<8x8xf32>
    %117 = tpu.matmul %115, %116, %cst_40 {dimension_numbers = #tpu.dot_dimension_numbers<[1], [1], [0], [0], [0, 0, 1, 0], [], []>} : vector<8x16xf32>, vector<8x16xf32>, vector<8x8xf32> -> vector<8x8xf32>
    %cst_41 = arith.constant dense<0xFF800000> : vector<8xf32>
    %118 = vector.multi_reduction <maximumf>, %117, %cst_41 [1] : vector<8x8xf32> to vector<8xf32>
    %119 = vector.shape_cast %118 : vector<8xf32> to vector<8x1xf32>
    %120 = vector.broadcast %119 : vector<8x1xf32> to vector<8x8xf32>
    %121 = arith.subf %117, %120 : vector<8x8xf32>
    %122 = math.exp %121 : vector<8x8xf32>
    %cst_42 = arith.constant dense<0.000000e+00> : vector<8xf32>
    %123 = vector.multi_reduction <add>, %122, %cst_42 [1] : vector<8x8xf32> to vector<8xf32>
    %124 = vector.shape_cast %123 : vector<8xf32> to vector<8x1xf32>
    %125 = vector.broadcast %124 : vector<8x1xf32> to vector<8x8xf32>
    %126 = arith.divf %122, %125 : vector<8x8xf32>
    %127 = vector.extract_strided_slice %16 {offsets = [0, 112], sizes = [8, 16], strides = [1, 1]} : vector<8x128xf32> to vector<8x16xf32>
    %cst_43 = arith.constant dense<0.000000e+00> : vector<8x16xf32>
    %128 = tpu.matmul %126, %127, %cst_43 {dimension_numbers = #tpu.dot_dimension_numbers<[1], [0], [0], [1], [0, 0, 1, 1], [], []>} : vector<8x8xf32>, vector<8x16xf32>, vector<8x16xf32> -> vector<8x16xf32>
    %129 = tpu.concatenate %30, %44, %58, %72, %86, %100, %114, %128 in 1 : vector<8x16xf32>, vector<8x16xf32>, vector<8x16xf32>, vector<8x16xf32>, vector<8x16xf32>, vector<8x16xf32>, vector<8x16xf32>, vector<8x16xf32> -> vector<8x128xf32>
    %c0_44 = arith.constant 0 : index
    %c0_45 = arith.constant 0 : index
    %130 = vector.load %arg6[%c0_44, %c0_45] : memref<128x128xf32, #tpu.memory_space<vmem>>, vector<128x128xf32>
    %cst_46 = arith.constant dense<0.000000e+00> : vector<8x128xf32>
    %131 = tpu.matmul %129, %130, %cst_46 {dimension_numbers = #tpu.dot_dimension_numbers<[1], [0], [0], [1], [0, 0, 1, 1], [], []>} : vector<8x128xf32>, vector<128x128xf32>, vector<8x128xf32> -> vector<8x128xf32>
    %c0_47 = arith.constant 0 : index
    %c0_48 = arith.constant 0 : index
    %132 = vector.load %arg7[%c0_47, %c0_48] : memref<1x128xf32, #tpu.memory_space<vmem>>, vector<1x128xf32>
    %133 = vector.broadcast %132 : vector<1x128xf32> to vector<8x128xf32>
    %134 = arith.addf %131, %133 : vector<8x128xf32>
    %cst_49 = arith.constant dense<0.000000e+00> : vector<8xf32>
    %135 = vector.multi_reduction <add>, %134, %cst_49 [1] : vector<8x128xf32> to vector<8xf32>
    %136 = vector.shape_cast %135 : vector<8xf32> to vector<8x1xf32>
    %cst_50 = arith.constant 1.280000e+02 : f32
    %137 = vector.broadcast %cst_50 : f32 to vector<8x1xf32>
    %138 = arith.divf %136, %137 : vector<8x1xf32>
    %139 = vector.broadcast %138 : vector<8x1xf32> to vector<8x128xf32>
    %140 = arith.subf %134, %139 : vector<8x128xf32>
    %141 = arith.mulf %140, %140 : vector<8x128xf32>
    %cst_51 = arith.constant dense<0.000000e+00> : vector<8xf32>
    %142 = vector.multi_reduction <add>, %141, %cst_51 [1] : vector<8x128xf32> to vector<8xf32>
    %143 = vector.shape_cast %142 : vector<8xf32> to vector<8x1xf32>
    %cst_52 = arith.constant 1.280000e+02 : f32
    %144 = vector.broadcast %cst_52 : f32 to vector<8x1xf32>
    %145 = arith.divf %143, %144 : vector<8x1xf32>
    %146 = vector.broadcast %138 : vector<8x1xf32> to vector<8x128xf32>
    %147 = arith.subf %134, %146 : vector<8x128xf32>
    %cst_53 = arith.constant 9.99999974E-6 : f32
    %148 = vector.broadcast %cst_53 : f32 to vector<8x1xf32>
    %149 = arith.addf %145, %148 : vector<8x1xf32>
    %150 = math.rsqrt %149 : vector<8x1xf32>
    %151 = vector.broadcast %150 : vector<8x1xf32> to vector<8x128xf32>
    %152 = arith.mulf %147, %151 : vector<8x128xf32>
    %c0_54 = arith.constant 0 : index
    %c0_55 = arith.constant 0 : index
    %153 = vector.load %arg8[%c0_54, %c0_55] : memref<1x128xf32, #tpu.memory_space<vmem>>, vector<1x128xf32>
    %154 = vector.broadcast %153 : vector<1x128xf32> to vector<8x128xf32>
    %155 = arith.mulf %152, %154 : vector<8x128xf32>
    %c0_56 = arith.constant 0 : index
    %c0_57 = arith.constant 0 : index
    %156 = vector.load %arg9[%c0_56, %c0_57] : memref<1x128xf32, #tpu.memory_space<vmem>>, vector<1x128xf32>
    %157 = vector.broadcast %156 : vector<1x128xf32> to vector<8x128xf32>
    %158 = arith.addf %155, %157 : vector<8x128xf32>
    %c0_58 = arith.constant 0 : index
    %c0_59 = arith.constant 0 : index
    %159 = vector.load %arg10[%c0_58, %c0_59] : memref<1x128xf32, #tpu.memory_space<vmem>>, vector<1x128xf32>
    %cst_60 = arith.constant dense<0.000000e+00> : vector<1x8xf32>
    %160 = tpu.matmul %159, %158, %cst_60 {dimension_numbers = #tpu.dot_dimension_numbers<[1], [1], [0], [0], [0, 0, 1, 0], [], []>} : vector<1x128xf32>, vector<8x128xf32>, vector<1x8xf32> -> vector<1x8xf32>
    %c0_61 = arith.constant 0 : index
    %c0_62 = arith.constant 0 : index
    %161 = vector.load %arg11[%c0_61, %c0_62] : memref<1x1xf32, #tpu.memory_space<vmem>>, vector<1x1xf32>
    %162 = vector.broadcast %161 : vector<1x1xf32> to vector<1x8xf32>
    %163 = arith.addf %160, %162 : vector<1x8xf32>
    %164 = vector.shape_cast %163 : vector<1x8xf32> to vector<1x1x8xf32>
    %c0_63 = arith.constant 0 : index
    %c0_64 = arith.constant 0 : index
    %c0_65 = arith.constant 0 : index
    %165 = vector.load %arg12[%c0_63, %c0_64, %c0_65] : memref<2x1x8xf32, #tpu.memory_space<vmem>>, vector<1x1x8xf32>
    tpu.vector_store %arg12[%c0_63, %c0_64, %c0_65], %164 {strides = array<i32>} : memref<2x1x8xf32, #tpu.memory_space<vmem>>, vector<1x1x8xf32>,
    %cst_66 = arith.constant dense<0.000000e+00> : vector<1xf32>
    %166 = vector.multi_reduction <add>, %163, %cst_66 [1] : vector<1x8xf32> to vector<1xf32>
    %167 = vector.shape_cast %166 : vector<1xf32> to vector<1x1xf32>
    %cst_67 = arith.constant 8.000000e+00 : f32
    %168 = vector.broadcast %cst_67 : f32 to vector<1x1xf32>
    %169 = arith.divf %167, %168 : vector<1x1xf32>
    %170 = vector.shape_cast %169 : vector<1x1xf32> to vector<1x1x1xf32>
    %c0_68 = arith.constant 0 : index
    %c0_69 = arith.constant 0 : index
    %c0_70 = arith.constant 0 : index
    %171 = vector.load %arg13[%c0_68, %c0_69, %c0_70] : memref<2x1x1xf32, #tpu.memory_space<vmem>>, vector<1x1x1xf32>
    tpu.vector_store %arg13[%c0_68, %c0_69, %c0_70], %170 {strides = array<i32>} : memref<2x1x1xf32, #tpu.memory_space<vmem>>, vector<1x1x1xf32>,
    %c0_71 = arith.constant 0 : index
    %c1 = arith.constant 1 : index
    %c0_72 = arith.constant 0 : index
    %172 = vector.load %arg1[%c0_71, %c1, %c0_72] : memref<8x2x256xf32, #tpu.memory_space<vmem>>, vector<8x1x256xf32>
    %173 = vector.shape_cast %172 : vector<8x1x256xf32> to vector<8x256xf32>
    %c0_73 = arith.constant 0 : index
    %c0_74 = arith.constant 0 : index
    %174 = vector.load %arg2[%c0_73, %c0_74] : memref<256x128xf32, #tpu.memory_space<vmem>>, vector<256x128xf32>
    %cst_75 = arith.constant dense<0.000000e+00> : vector<8x128xf32>
    %175 = tpu.matmul %173, %174, %cst_75 {dimension_numbers = #tpu.dot_dimension_numbers<[1], [0], [0], [1], [0, 0, 1, 1], [], []>} : vector<8x256xf32>, vector<256x128xf32>, vector<8x128xf32> -> vector<8x128xf32>
    %c0_76 = arith.constant 0 : index
    %c0_77 = arith.constant 0 : index
    %176 = vector.load %arg3[%c0_76, %c0_77] : memref<1x128xf32, #tpu.memory_space<vmem>>, vector<1x128xf32>
    %177 = vector.broadcast %176 : vector<1x128xf32> to vector<8x128xf32>
    %178 = arith.addf %175, %177 : vector<8x128xf32>
    %cst_78 = arith.constant 0.000000e+00 : f32
    %179 = vector.broadcast %cst_78 : f32 to vector<8x128xf32>
    %180 = arith.maximumf %178, %179 : vector<8x128xf32>
    %c0_79 = arith.constant 0 : index
    %c0_80 = arith.constant 0 : index
    %181 = vector.load %arg4[%c0_79, %c0_80] : memref<128x384xf32, #tpu.memory_space<vmem>>, vector<128x384xf32>
    %cst_81 = arith.constant dense<0.000000e+00> : vector<8x384xf32>
    %182 = tpu.matmul %180, %181, %cst_81 {dimension_numbers = #tpu.dot_dimension_numbers<[1], [0], [0], [1], [0, 0, 1, 1], [], []>} : vector<8x128xf32>, vector<128x384xf32>, vector<8x384xf32> -> vector<8x384xf32>
    %c0_82 = arith.constant 0 : index
    %c0_83 = arith.constant 0 : index
    %183 = vector.load %arg5[%c0_82, %c0_83] : memref<1x384xf32, #tpu.memory_space<vmem>>, vector<1x384xf32>
    %184 = vector.broadcast %183 : vector<1x384xf32> to vector<8x384xf32>
    %185 = arith.addf %182, %184 : vector<8x384xf32>
    %186 = vector.extract_strided_slice %185 {offsets = [0, 0], sizes = [8, 128], strides = [1, 1]} : vector<8x384xf32> to vector<8x128xf32>
    %187 = vector.extract_strided_slice %185 {offsets = [0, 128], sizes = [8, 128], strides = [1, 1]} : vector<8x384xf32> to vector<8x128xf32>
    %188 = vector.extract_strided_slice %185 {offsets = [0, 256], sizes = [8, 128], strides = [1, 1]} : vector<8x384xf32> to vector<8x128xf32>
    %189 = vector.extract_strided_slice %186 {offsets = [0, 0], sizes = [8, 16], strides = [1, 1]} : vector<8x128xf32> to vector<8x16xf32>
    %190 = vector.extract_strided_slice %187 {offsets = [0, 0], sizes = [8, 16], strides = [1, 1]} : vector<8x128xf32> to vector<8x16xf32>
    %cst_84 = arith.constant dense<0.000000e+00> : vector<8x8xf32>
    %191 = tpu.matmul %189, %190, %cst_84 {dimension_numbers = #tpu.dot_dimension_numbers<[1], [1], [0], [0], [0, 0, 1, 0], [], []>} : vector<8x16xf32>, vector<8x16xf32>, vector<8x8xf32> -> vector<8x8xf32>
    %cst_85 = arith.constant dense<0xFF800000> : vector<8xf32>
    %192 = vector.multi_reduction <maximumf>, %191, %cst_85 [1] : vector<8x8xf32> to vector<8xf32>
    %193 = vector.shape_cast %192 : vector<8xf32> to vector<8x1xf32>
    %194 = vector.broadcast %193 : vector<8x1xf32> to vector<8x8xf32>
    %195 = arith.subf %191, %194 : vector<8x8xf32>
    %196 = math.exp %195 : vector<8x8xf32>
    %cst_86 = arith.constant dense<0.000000e+00> : vector<8xf32>
    %197 = vector.multi_reduction <add>, %196, %cst_86 [1] : vector<8x8xf32> to vector<8xf32>
    %198 = vector.shape_cast %197 : vector<8xf32> to vector<8x1xf32>
    %199 = vector.broadcast %198 : vector<8x1xf32> to vector<8x8xf32>
    %200 = arith.divf %196, %199 : vector<8x8xf32>
    %201 = vector.extract_strided_slice %188 {offsets = [0, 0], sizes = [8, 16], strides = [1, 1]} : vector<8x128xf32> to vector<8x16xf32>
    %cst_87 = arith.constant dense<0.000000e+00> : vector<8x16xf32>
    %202 = tpu.matmul %200, %201, %cst_87 {dimension_numbers = #tpu.dot_dimension_numbers<[1], [0], [0], [1], [0, 0, 1, 1], [], []>} : vector<8x8xf32>, vector<8x16xf32>, vector<8x16xf32> -> vector<8x16xf32>
    %203 = vector.extract_strided_slice %186 {offsets = [0, 16], sizes = [8, 16], strides = [1, 1]} : vector<8x128xf32> to vector<8x16xf32>
    %204 = vector.extract_strided_slice %187 {offsets = [0, 16], sizes = [8, 16], strides = [1, 1]} : vector<8x128xf32> to vector<8x16xf32>
    %cst_88 = arith.constant dense<0.000000e+00> : vector<8x8xf32>
    %205 = tpu.matmul %203, %204, %cst_88 {dimension_numbers = #tpu.dot_dimension_numbers<[1], [1], [0], [0], [0, 0, 1, 0], [], []>} : vector<8x16xf32>, vector<8x16xf32>, vector<8x8xf32> -> vector<8x8xf32>
    %cst_89 = arith.constant dense<0xFF800000> : vector<8xf32>
    %206 = vector.multi_reduction <maximumf>, %205, %cst_89 [1] : vector<8x8xf32> to vector<8xf32>
    %207 = vector.shape_cast %206 : vector<8xf32> to vector<8x1xf32>
    %208 = vector.broadcast %207 : vector<8x1xf32> to vector<8x8xf32>
    %209 = arith.subf %205, %208 : vector<8x8xf32>
    %210 = math.exp %209 : vector<8x8xf32>
    %cst_90 = arith.constant dense<0.000000e+00> : vector<8xf32>
    %211 = vector.multi_reduction <add>, %210, %cst_90 [1] : vector<8x8xf32> to vector<8xf32>
    %212 = vector.shape_cast %211 : vector<8xf32> to vector<8x1xf32>
    %213 = vector.broadcast %212 : vector<8x1xf32> to vector<8x8xf32>
    %214 = arith.divf %210, %213 : vector<8x8xf32>
    %215 = vector.extract_strided_slice %188 {offsets = [0, 16], sizes = [8, 16], strides = [1, 1]} : vector<8x128xf32> to vector<8x16xf32>
    %cst_91 = arith.constant dense<0.000000e+00> : vector<8x16xf32>
    %216 = tpu.matmul %214, %215, %cst_91 {dimension_numbers = #tpu.dot_dimension_numbers<[1], [0], [0], [1], [0, 0, 1, 1], [], []>} : vector<8x8xf32>, vector<8x16xf32>, vector<8x16xf32> -> vector<8x16xf32>
    %217 = vector.extract_strided_slice %186 {offsets = [0, 32], sizes = [8, 16], strides = [1, 1]} : vector<8x128xf32> to vector<8x16xf32>
    %218 = vector.extract_strided_slice %187 {offsets = [0, 32], sizes = [8, 16], strides = [1, 1]} : vector<8x128xf32> to vector<8x16xf32>
    %cst_92 = arith.constant dense<0.000000e+00> : vector<8x8xf32>
    %219 = tpu.matmul %217, %218, %cst_92 {dimension_numbers = #tpu.dot_dimension_numbers<[1], [1], [0], [0], [0, 0, 1, 0], [], []>} : vector<8x16xf32>, vector<8x16xf32>, vector<8x8xf32> -> vector<8x8xf32>
    %cst_93 = arith.constant dense<0xFF800000> : vector<8xf32>
    %220 = vector.multi_reduction <maximumf>, %219, %cst_93 [1] : vector<8x8xf32> to vector<8xf32>
    %221 = vector.shape_cast %220 : vector<8xf32> to vector<8x1xf32>
    %222 = vector.broadcast %221 : vector<8x1xf32> to vector<8x8xf32>
    %223 = arith.subf %219, %222 : vector<8x8xf32>
    %224 = math.exp %223 : vector<8x8xf32>
    %cst_94 = arith.constant dense<0.000000e+00> : vector<8xf32>
    %225 = vector.multi_reduction <add>, %224, %cst_94 [1] : vector<8x8xf32> to vector<8xf32>
    %226 = vector.shape_cast %225 : vector<8xf32> to vector<8x1xf32>
    %227 = vector.broadcast %226 : vector<8x1xf32> to vector<8x8xf32>
    %228 = arith.divf %224, %227 : vector<8x8xf32>
    %229 = vector.extract_strided_slice %188 {offsets = [0, 32], sizes = [8, 16], strides = [1, 1]} : vector<8x128xf32> to vector<8x16xf32>
    %cst_95 = arith.constant dense<0.000000e+00> : vector<8x16xf32>
    %230 = tpu.matmul %228, %229, %cst_95 {dimension_numbers = #tpu.dot_dimension_numbers<[1], [0], [0], [1], [0, 0, 1, 1], [], []>} : vector<8x8xf32>, vector<8x16xf32>, vector<8x16xf32> -> vector<8x16xf32>
    %231 = vector.extract_strided_slice %186 {offsets = [0, 48], sizes = [8, 16], strides = [1, 1]} : vector<8x128xf32> to vector<8x16xf32>
    %232 = vector.extract_strided_slice %187 {offsets = [0, 48], sizes = [8, 16], strides = [1, 1]} : vector<8x128xf32> to vector<8x16xf32>
    %cst_96 = arith.constant dense<0.000000e+00> : vector<8x8xf32>
    %233 = tpu.matmul %231, %232, %cst_96 {dimension_numbers = #tpu.dot_dimension_numbers<[1], [1], [0], [0], [0, 0, 1, 0], [], []>} : vector<8x16xf32>, vector<8x16xf32>, vector<8x8xf32> -> vector<8x8xf32>
    %cst_97 = arith.constant dense<0xFF800000> : vector<8xf32>
    %234 = vector.multi_reduction <maximumf>, %233, %cst_97 [1] : vector<8x8xf32> to vector<8xf32>
    %235 = vector.shape_cast %234 : vector<8xf32> to vector<8x1xf32>
    %236 = vector.broadcast %235 : vector<8x1xf32> to vector<8x8xf32>
    %237 = arith.subf %233, %236 : vector<8x8xf32>
    %238 = math.exp %237 : vector<8x8xf32>
    %cst_98 = arith.constant dense<0.000000e+00> : vector<8xf32>
    %239 = vector.multi_reduction <add>, %238, %cst_98 [1] : vector<8x8xf32> to vector<8xf32>
    %240 = vector.shape_cast %239 : vector<8xf32> to vector<8x1xf32>
    %241 = vector.broadcast %240 : vector<8x1xf32> to vector<8x8xf32>
    %242 = arith.divf %238, %241 : vector<8x8xf32>
    %243 = vector.extract_strided_slice %188 {offsets = [0, 48], sizes = [8, 16], strides = [1, 1]} : vector<8x128xf32> to vector<8x16xf32>
    %cst_99 = arith.constant dense<0.000000e+00> : vector<8x16xf32>
    %244 = tpu.matmul %242, %243, %cst_99 {dimension_numbers = #tpu.dot_dimension_numbers<[1], [0], [0], [1], [0, 0, 1, 1], [], []>} : vector<8x8xf32>, vector<8x16xf32>, vector<8x16xf32> -> vector<8x16xf32>
    %245 = vector.extract_strided_slice %186 {offsets = [0, 64], sizes = [8, 16], strides = [1, 1]} : vector<8x128xf32> to vector<8x16xf32>
    %246 = vector.extract_strided_slice %187 {offsets = [0, 64], sizes = [8, 16], strides = [1, 1]} : vector<8x128xf32> to vector<8x16xf32>
    %cst_100 = arith.constant dense<0.000000e+00> : vector<8x8xf32>
    %247 = tpu.matmul %245, %246, %cst_100 {dimension_numbers = #tpu.dot_dimension_numbers<[1], [1], [0], [0], [0, 0, 1, 0], [], []>} : vector<8x16xf32>, vector<8x16xf32>, vector<8x8xf32> -> vector<8x8xf32>
    %cst_101 = arith.constant dense<0xFF800000> : vector<8xf32>
    %248 = vector.multi_reduction <maximumf>, %247, %cst_101 [1] : vector<8x8xf32> to vector<8xf32>
    %249 = vector.shape_cast %248 : vector<8xf32> to vector<8x1xf32>
    %250 = vector.broadcast %249 : vector<8x1xf32> to vector<8x8xf32>
    %251 = arith.subf %247, %250 : vector<8x8xf32>
    %252 = math.exp %251 : vector<8x8xf32>
    %cst_102 = arith.constant dense<0.000000e+00> : vector<8xf32>
    %253 = vector.multi_reduction <add>, %252, %cst_102 [1] : vector<8x8xf32> to vector<8xf32>
    %254 = vector.shape_cast %253 : vector<8xf32> to vector<8x1xf32>
    %255 = vector.broadcast %254 : vector<8x1xf32> to vector<8x8xf32>
    %256 = arith.divf %252, %255 : vector<8x8xf32>
    %257 = vector.extract_strided_slice %188 {offsets = [0, 64], sizes = [8, 16], strides = [1, 1]} : vector<8x128xf32> to vector<8x16xf32>
    %cst_103 = arith.constant dense<0.000000e+00> : vector<8x16xf32>
    %258 = tpu.matmul %256, %257, %cst_103 {dimension_numbers = #tpu.dot_dimension_numbers<[1], [0], [0], [1], [0, 0, 1, 1], [], []>} : vector<8x8xf32>, vector<8x16xf32>, vector<8x16xf32> -> vector<8x16xf32>
    %259 = vector.extract_strided_slice %186 {offsets = [0, 80], sizes = [8, 16], strides = [1, 1]} : vector<8x128xf32> to vector<8x16xf32>
    %260 = vector.extract_strided_slice %187 {offsets = [0, 80], sizes = [8, 16], strides = [1, 1]} : vector<8x128xf32> to vector<8x16xf32>
    %cst_104 = arith.constant dense<0.000000e+00> : vector<8x8xf32>
    %261 = tpu.matmul %259, %260, %cst_104 {dimension_numbers = #tpu.dot_dimension_numbers<[1], [1], [0], [0], [0, 0, 1, 0], [], []>} : vector<8x16xf32>, vector<8x16xf32>, vector<8x8xf32> -> vector<8x8xf32>
    %cst_105 = arith.constant dense<0xFF800000> : vector<8xf32>
    %262 = vector.multi_reduction <maximumf>, %261, %cst_105 [1] : vector<8x8xf32> to vector<8xf32>
    %263 = vector.shape_cast %262 : vector<8xf32> to vector<8x1xf32>
    %264 = vector.broadcast %263 : vector<8x1xf32> to vector<8x8xf32>
    %265 = arith.subf %261, %264 : vector<8x8xf32>
    %266 = math.exp %265 : vector<8x8xf32>
    %cst_106 = arith.constant dense<0.000000e+00> : vector<8xf32>
    %267 = vector.multi_reduction <add>, %266, %cst_106 [1] : vector<8x8xf32> to vector<8xf32>
    %268 = vector.shape_cast %267 : vector<8xf32> to vector<8x1xf32>
    %269 = vector.broadcast %268 : vector<8x1xf32> to vector<8x8xf32>
    %270 = arith.divf %266, %269 : vector<8x8xf32>
    %271 = vector.extract_strided_slice %188 {offsets = [0, 80], sizes = [8, 16], strides = [1, 1]} : vector<8x128xf32> to vector<8x16xf32>
    %cst_107 = arith.constant dense<0.000000e+00> : vector<8x16xf32>
    %272 = tpu.matmul %270, %271, %cst_107 {dimension_numbers = #tpu.dot_dimension_numbers<[1], [0], [0], [1], [0, 0, 1, 1], [], []>} : vector<8x8xf32>, vector<8x16xf32>, vector<8x16xf32> -> vector<8x16xf32>
    %273 = vector.extract_strided_slice %186 {offsets = [0, 96], sizes = [8, 16], strides = [1, 1]} : vector<8x128xf32> to vector<8x16xf32>
    %274 = vector.extract_strided_slice %187 {offsets = [0, 96], sizes = [8, 16], strides = [1, 1]} : vector<8x128xf32> to vector<8x16xf32>
    %cst_108 = arith.constant dense<0.000000e+00> : vector<8x8xf32>
    %275 = tpu.matmul %273, %274, %cst_108 {dimension_numbers = #tpu.dot_dimension_numbers<[1], [1], [0], [0], [0, 0, 1, 0], [], []>} : vector<8x16xf32>, vector<8x16xf32>, vector<8x8xf32> -> vector<8x8xf32>
    %cst_109 = arith.constant dense<0xFF800000> : vector<8xf32>
    %276 = vector.multi_reduction <maximumf>, %275, %cst_109 [1] : vector<8x8xf32> to vector<8xf32>
    %277 = vector.shape_cast %276 : vector<8xf32> to vector<8x1xf32>
    %278 = vector.broadcast %277 : vector<8x1xf32> to vector<8x8xf32>
    %279 = arith.subf %275, %278 : vector<8x8xf32>
    %280 = math.exp %279 : vector<8x8xf32>
    %cst_110 = arith.constant dense<0.000000e+00> : vector<8xf32>
    %281 = vector.multi_reduction <add>, %280, %cst_110 [1] : vector<8x8xf32> to vector<8xf32>
    %282 = vector.shape_cast %281 : vector<8xf32> to vector<8x1xf32>
    %283 = vector.broadcast %282 : vector<8x1xf32> to vector<8x8xf32>
    %284 = arith.divf %280, %283 : vector<8x8xf32>
    %285 = vector.extract_strided_slice %188 {offsets = [0, 96], sizes = [8, 16], strides = [1, 1]} : vector<8x128xf32> to vector<8x16xf32>
    %cst_111 = arith.constant dense<0.000000e+00> : vector<8x16xf32>
    %286 = tpu.matmul %284, %285, %cst_111 {dimension_numbers = #tpu.dot_dimension_numbers<[1], [0], [0], [1], [0, 0, 1, 1], [], []>} : vector<8x8xf32>, vector<8x16xf32>, vector<8x16xf32> -> vector<8x16xf32>
    %287 = vector.extract_strided_slice %186 {offsets = [0, 112], sizes = [8, 16], strides = [1, 1]} : vector<8x128xf32> to vector<8x16xf32>
    %288 = vector.extract_strided_slice %187 {offsets = [0, 112], sizes = [8, 16], strides = [1, 1]} : vector<8x128xf32> to vector<8x16xf32>
    %cst_112 = arith.constant dense<0.000000e+00> : vector<8x8xf32>
    %289 = tpu.matmul %287, %288, %cst_112 {dimension_numbers = #tpu.dot_dimension_numbers<[1], [1], [0], [0], [0, 0, 1, 0], [], []>} : vector<8x16xf32>, vector<8x16xf32>, vector<8x8xf32> -> vector<8x8xf32>
    %cst_113 = arith.constant dense<0xFF800000> : vector<8xf32>
    %290 = vector.multi_reduction <maximumf>, %289, %cst_113 [1] : vector<8x8xf32> to vector<8xf32>
    %291 = vector.shape_cast %290 : vector<8xf32> to vector<8x1xf32>
    %292 = vector.broadcast %291 : vector<8x1xf32> to vector<8x8xf32>
    %293 = arith.subf %289, %292 : vector<8x8xf32>
    %294 = math.exp %293 : vector<8x8xf32>
    %cst_114 = arith.constant dense<0.000000e+00> : vector<8xf32>
    %295 = vector.multi_reduction <add>, %294, %cst_114 [1] : vector<8x8xf32> to vector<8xf32>
    %296 = vector.shape_cast %295 : vector<8xf32> to vector<8x1xf32>
    %297 = vector.broadcast %296 : vector<8x1xf32> to vector<8x8xf32>
    %298 = arith.divf %294, %297 : vector<8x8xf32>
    %299 = vector.extract_strided_slice %188 {offsets = [0, 112], sizes = [8, 16], strides = [1, 1]} : vector<8x128xf32> to vector<8x16xf32>
    %cst_115 = arith.constant dense<0.000000e+00> : vector<8x16xf32>
    %300 = tpu.matmul %298, %299, %cst_115 {dimension_numbers = #tpu.dot_dimension_numbers<[1], [0], [0], [1], [0, 0, 1, 1], [], []>} : vector<8x8xf32>, vector<8x16xf32>, vector<8x16xf32> -> vector<8x16xf32>
    %301 = tpu.concatenate %202, %216, %230, %244, %258, %272, %286, %300 in 1 : vector<8x16xf32>, vector<8x16xf32>, vector<8x16xf32>, vector<8x16xf32>, vector<8x16xf32>, vector<8x16xf32>, vector<8x16xf32>, vector<8x16xf32> -> vector<8x128xf32>
    %c0_116 = arith.constant 0 : index
    %c0_117 = arith.constant 0 : index
    %302 = vector.load %arg6[%c0_116, %c0_117] : memref<128x128xf32, #tpu.memory_space<vmem>>, vector<128x128xf32>
    %cst_118 = arith.constant dense<0.000000e+00> : vector<8x128xf32>
    %303 = tpu.matmul %301, %302, %cst_118 {dimension_numbers = #tpu.dot_dimension_numbers<[1], [0], [0], [1], [0, 0, 1, 1], [], []>} : vector<8x128xf32>, vector<128x128xf32>, vector<8x128xf32> -> vector<8x128xf32>
    %c0_119 = arith.constant 0 : index
    %c0_120 = arith.constant 0 : index
    %304 = vector.load %arg7[%c0_119, %c0_120] : memref<1x128xf32, #tpu.memory_space<vmem>>, vector<1x128xf32>
    %305 = vector.broadcast %304 : vector<1x128xf32> to vector<8x128xf32>
    %306 = arith.addf %303, %305 : vector<8x128xf32>
    %cst_121 = arith.constant dense<0.000000e+00> : vector<8xf32>
    %307 = vector.multi_reduction <add>, %306, %cst_121 [1] : vector<8x128xf32> to vector<8xf32>
    %308 = vector.shape_cast %307 : vector<8xf32> to vector<8x1xf32>
    %cst_122 = arith.constant 1.280000e+02 : f32
    %309 = vector.broadcast %cst_122 : f32 to vector<8x1xf32>
    %310 = arith.divf %308, %309 : vector<8x1xf32>
    %311 = vector.broadcast %310 : vector<8x1xf32> to vector<8x128xf32>
    %312 = arith.subf %306, %311 : vector<8x128xf32>
    %313 = arith.mulf %312, %312 : vector<8x128xf32>
    %cst_123 = arith.constant dense<0.000000e+00> : vector<8xf32>
    %314 = vector.multi_reduction <add>, %313, %cst_123 [1] : vector<8x128xf32> to vector<8xf32>
    %315 = vector.shape_cast %314 : vector<8xf32> to vector<8x1xf32>
    %cst_124 = arith.constant 1.280000e+02 : f32
    %316 = vector.broadcast %cst_124 : f32 to vector<8x1xf32>
    %317 = arith.divf %315, %316 : vector<8x1xf32>
    %318 = vector.broadcast %310 : vector<8x1xf32> to vector<8x128xf32>
    %319 = arith.subf %306, %318 : vector<8x128xf32>
    %cst_125 = arith.constant 9.99999974E-6 : f32
    %320 = vector.broadcast %cst_125 : f32 to vector<8x1xf32>
    %321 = arith.addf %317, %320 : vector<8x1xf32>
    %322 = math.rsqrt %321 : vector<8x1xf32>
    %323 = vector.broadcast %322 : vector<8x1xf32> to vector<8x128xf32>
    %324 = arith.mulf %319, %323 : vector<8x128xf32>
    %c0_126 = arith.constant 0 : index
    %c0_127 = arith.constant 0 : index
    %325 = vector.load %arg8[%c0_126, %c0_127] : memref<1x128xf32, #tpu.memory_space<vmem>>, vector<1x128xf32>
    %326 = vector.broadcast %325 : vector<1x128xf32> to vector<8x128xf32>
    %327 = arith.mulf %324, %326 : vector<8x128xf32>
    %c0_128 = arith.constant 0 : index
    %c0_129 = arith.constant 0 : index
    %328 = vector.load %arg9[%c0_128, %c0_129] : memref<1x128xf32, #tpu.memory_space<vmem>>, vector<1x128xf32>
    %329 = vector.broadcast %328 : vector<1x128xf32> to vector<8x128xf32>
    %330 = arith.addf %327, %329 : vector<8x128xf32>
    %c0_130 = arith.constant 0 : index
    %c0_131 = arith.constant 0 : index
    %331 = vector.load %arg10[%c0_130, %c0_131] : memref<1x128xf32, #tpu.memory_space<vmem>>, vector<1x128xf32>
    %cst_132 = arith.constant dense<0.000000e+00> : vector<1x8xf32>
    %332 = tpu.matmul %331, %330, %cst_132 {dimension_numbers = #tpu.dot_dimension_numbers<[1], [1], [0], [0], [0, 0, 1, 0], [], []>} : vector<1x128xf32>, vector<8x128xf32>, vector<1x8xf32> -> vector<1x8xf32>
    %c0_133 = arith.constant 0 : index
    %c0_134 = arith.constant 0 : index
    %333 = vector.load %arg11[%c0_133, %c0_134] : memref<1x1xf32, #tpu.memory_space<vmem>>, vector<1x1xf32>
    %334 = vector.broadcast %333 : vector<1x1xf32> to vector<1x8xf32>
    %335 = arith.addf %332, %334 : vector<1x8xf32>
    %336 = vector.shape_cast %335 : vector<1x8xf32> to vector<1x1x8xf32>
    %c1_135 = arith.constant 1 : index
    %c0_136 = arith.constant 0 : index
    %c0_137 = arith.constant 0 : index
    %337 = vector.load %arg12[%c1_135, %c0_136, %c0_137] : memref<2x1x8xf32, #tpu.memory_space<vmem>>, vector<1x1x8xf32>
    tpu.vector_store %arg12[%c1_135, %c0_136, %c0_137], %336 {strides = array<i32>} : memref<2x1x8xf32, #tpu.memory_space<vmem>>, vector<1x1x8xf32>,
    %cst_138 = arith.constant dense<0.000000e+00> : vector<1xf32>
    %338 = vector.multi_reduction <add>, %335, %cst_138 [1] : vector<1x8xf32> to vector<1xf32>
    %339 = vector.shape_cast %338 : vector<1xf32> to vector<1x1xf32>
    %cst_139 = arith.constant 8.000000e+00 : f32
    %340 = vector.broadcast %cst_139 : f32 to vector<1x1xf32>
    %341 = arith.divf %339, %340 : vector<1x1xf32>
    %342 = vector.shape_cast %341 : vector<1x1xf32> to vector<1x1x1xf32>
    %c1_140 = arith.constant 1 : index
    %c0_141 = arith.constant 0 : index
    %c0_142 = arith.constant 0 : index
    %343 = vector.load %arg13[%c1_140, %c0_141, %c0_142] : memref<2x1x1xf32, #tpu.memory_space<vmem>>, vector<1x1x1xf32>
    tpu.vector_store %arg13[%c1_140, %c0_141, %c0_142], %342 {strides = array<i32>} : memref<2x1x1xf32, #tpu.memory_space<vmem>>, vector<1x1x1xf32>,
    return
  }
  func.func @transform_0(%arg0: i32) -> (i32, i32, i32) {
    %c0_i32 = arith.constant 0 : i32
    %c0_i32_0 = arith.constant 0 : i32
    %c0_i32_1 = arith.constant 0 : i32
    return %c0_i32, %arg0, %c0_i32_0 : i32, i32, i32
  }
  func.func @transform_1(%arg0: i32) -> (i32, i32) {
    %c0_i32 = arith.constant 0 : i32
    %c0_i32_0 = arith.constant 0 : i32
    %c0_i32_1 = arith.constant 0 : i32
    return %c0_i32, %c0_i32_0 : i32, i32
  }
  func.func @transform_2(%arg0: i32) -> (i32, i32) {
    %c0_i32 = arith.constant 0 : i32
    %c0_i32_0 = arith.constant 0 : i32
    %c0_i32_1 = arith.constant 0 : i32
    return %c0_i32, %c0_i32_0 : i32, i32
  }
  func.func @transform_3(%arg0: i32) -> (i32, i32) {
    %c0_i32 = arith.constant 0 : i32
    %c0_i32_0 = arith.constant 0 : i32
    %c0_i32_1 = arith.constant 0 : i32
    return %c0_i32, %c0_i32_0 : i32, i32
  }
  func.func @transform_4(%arg0: i32) -> (i32, i32) {
    %c0_i32 = arith.constant 0 : i32
    %c0_i32_0 = arith.constant 0 : i32
    %c0_i32_1 = arith.constant 0 : i32
    return %c0_i32, %c0_i32_0 : i32, i32
  }
  func.func @transform_5(%arg0: i32) -> (i32, i32) {
    %c0_i32 = arith.constant 0 : i32
    %c0_i32_0 = arith.constant 0 : i32
    %c0_i32_1 = arith.constant 0 : i32
    return %c0_i32, %c0_i32_0 : i32, i32
  }
  func.func @transform_6(%arg0: i32) -> (i32, i32) {
    %c0_i32 = arith.constant 0 : i32
    %c0_i32_0 = arith.constant 0 : i32
    %c0_i32_1 = arith.constant 0 : i32
    return %c0_i32, %c0_i32_0 : i32, i32
  }
  func.func @transform_7(%arg0: i32) -> (i32, i32) {
    %c0_i32 = arith.constant 0 : i32
    %c0_i32_0 = arith.constant 0 : i32
    %c0_i32_1 = arith.constant 0 : i32
    return %c0_i32, %c0_i32_0 : i32, i32
  }
  func.func @transform_8(%arg0: i32) -> (i32, i32) {
    %c0_i32 = arith.constant 0 : i32
    %c0_i32_0 = arith.constant 0 : i32
    %c0_i32_1 = arith.constant 0 : i32
    return %c0_i32, %c0_i32_0 : i32, i32
  }
  func.func @transform_9(%arg0: i32) -> (i32, i32) {
    %c0_i32 = arith.constant 0 : i32
    %c0_i32_0 = arith.constant 0 : i32
    %c0_i32_1 = arith.constant 0 : i32
    return %c0_i32, %c0_i32_0 : i32, i32
  }
  func.func @transform_10(%arg0: i32) -> (i32, i32) {
    %c0_i32 = arith.constant 0 : i32
    %c0_i32_0 = arith.constant 0 : i32
    %c0_i32_1 = arith.constant 0 : i32
    return %c0_i32, %c0_i32_0 : i32, i32
  }
  func.func @transform_11(%arg0: i32) -> (i32, i32, i32) {
    %c0_i32 = arith.constant 0 : i32
    %c0_i32_0 = arith.constant 0 : i32
    %c0_i32_1 = arith.constant 0 : i32
    return %arg0, %c0_i32, %c0_i32_0 : i32, i32, i32
  }
  func.func @transform_12(%arg0: i32) -> (i32, i32, i32) {
    %c0_i32 = arith.constant 0 : i32
    %c0_i32_0 = arith.constant 0 : i32
    %c0_i32_1 = arith.constant 0 : i32
    return %arg0, %c0_i32, %c0_i32_0 : i32, i32, i32
  }
}

module attributes {stable_mosaic.version = 11 : i64} {
  func.func @_bilstm_kernel(%arg0: i32, %arg1: memref<2x8x384xf32, #tpu.memory_space<vmem>>, %arg2: memref<384x1024xf32, #tpu.memory_space<vmem>>, %arg3: memref<128x512xf32, #tpu.memory_space<vmem>>, %arg4: memref<128x512xf32, #tpu.memory_space<vmem>>, %arg5: memref<1x1024xf32, #tpu.memory_space<vmem>>, %arg6: memref<8x2x256xf32, #tpu.memory_space<vmem>>, %arg7: memref<2x8x1024xf32, #tpu.memory_space<vmem>>) attributes {dimension_semantics = [#tpu.dimension_semantics<parallel>], iteration_bounds = array<i64: 1>, scalar_prefetch = 0 : i64, scratch_operands = 1 : i64, tpu.core_type = #tpu.core_type<tc>, window_params = [{transform_indices = @transform_0, window_bounds = array<i64: 2, 8, 384>}, {pipeline_mode = #tpu.pipeline_mode<synchronous>, transform_indices = @transform_1, window_bounds = array<i64: 384, 1024>}, {pipeline_mode = #tpu.pipeline_mode<synchronous>, transform_indices = @transform_2, window_bounds = array<i64: 128, 512>}, {pipeline_mode = #tpu.pipeline_mode<synchronous>, transform_indices = @transform_3, window_bounds = array<i64: 128, 512>}, {pipeline_mode = #tpu.pipeline_mode<synchronous>, transform_indices = @transform_4, window_bounds = array<i64: 1, 1024>}, {transform_indices = @transform_5, window_bounds = array<i64: 8, 2, 256>}]} {
    %c0 = arith.constant 0 : index
    %c0_0 = arith.constant 0 : index
    %c0_1 = arith.constant 0 : index
    %0 = vector.load %arg1[%c0, %c0_0, %c0_1] : memref<2x8x384xf32, #tpu.memory_space<vmem>>, vector<2x8x384xf32>
    %1 = vector.shape_cast %0 : vector<2x8x384xf32> to vector<16x384xf32>
    %c0_2 = arith.constant 0 : index
    %c0_3 = arith.constant 0 : index
    %2 = vector.load %arg2[%c0_2, %c0_3] : memref<384x1024xf32, #tpu.memory_space<vmem>>, vector<384x1024xf32>
    %cst = arith.constant dense<0.000000e+00> : vector<16x1024xf32>
    %3 = tpu.matmul %1, %2, %cst {dimension_numbers = #tpu.dot_dimension_numbers<[1], [0], [0], [1], [0, 0, 1, 1], [], []>} : vector<16x384xf32>, vector<384x1024xf32>, vector<16x1024xf32> -> vector<16x1024xf32>
    %c0_4 = arith.constant 0 : index
    %c0_5 = arith.constant 0 : index
    %4 = vector.load %arg5[%c0_4, %c0_5] : memref<1x1024xf32, #tpu.memory_space<vmem>>, vector<1x1024xf32>
    %5 = vector.broadcast %4 : vector<1x1024xf32> to vector<16x1024xf32>
    %6 = arith.addf %3, %5 : vector<16x1024xf32>
    %7 = vector.shape_cast %6 : vector<16x1024xf32> to vector<2x8x1024xf32>
    %c0_6 = arith.constant 0 : index
    %c0_7 = arith.constant 0 : index
    %c0_8 = arith.constant 0 : index
    %8 = vector.load %arg7[%c0_6, %c0_7, %c0_8] : memref<2x8x1024xf32, #tpu.memory_space<vmem>>, vector<2x8x1024xf32>
    tpu.vector_store %arg7[%c0_6, %c0_7, %c0_8], %7 {strides = array<i32>} : memref<2x8x1024xf32, #tpu.memory_space<vmem>>, vector<2x8x1024xf32>,
    %cst_9 = arith.constant 0.000000e+00 : f32
    %9 = vector.broadcast %cst_9 : f32 to vector<2x128xf32>
    %c0_i32 = arith.constant 0 : i32
    %c8_i32 = arith.constant 8 : i32
    %10 = arith.addi %c0_i32, %c8_i32 : i32
    %c1_i32 = arith.constant 1 : i32
    %11:4 = scf.for %arg8 = %c0_i32 to %10 step %c1_i32 iter_args(%arg9 = %9, %arg10 = %9, %arg11 = %9, %arg12 = %9) -> (vector<2x128xf32>, vector<2x128xf32>, vector<2x128xf32>, vector<2x128xf32>)  : i32 {
      %c7_i32 = arith.constant 7 : i32
      %12 = arith.subi %c7_i32, %arg8 : i32
      %c0_11 = arith.constant 0 : index
      %13 = arith.index_cast %arg8 : i32 to index
      %c0_12 = arith.constant 0 : index
      %14 = vector.load %arg7[%c0_11, %13, %c0_12] : memref<2x8x1024xf32, #tpu.memory_space<vmem>>, vector<2x1x512xf32>
      %15 = vector.shape_cast %14 : vector<2x1x512xf32> to vector<2x512xf32>
      %c0_13 = arith.constant 0 : index
      %16 = arith.index_cast %12 : i32 to index
      %c512 = arith.constant 512 : index
      %17 = vector.load %arg7[%c0_13, %16, %c512] : memref<2x8x1024xf32, #tpu.memory_space<vmem>>, vector<2x1x512xf32>
      %18 = vector.shape_cast %17 : vector<2x1x512xf32> to vector<2x512xf32>
      %c0_14 = arith.constant 0 : index
      %c0_15 = arith.constant 0 : index
      %19 = vector.load %arg3[%c0_14, %c0_15] : memref<128x512xf32, #tpu.memory_space<vmem>>, vector<128x512xf32>
      %cst_16 = arith.constant dense<0.000000e+00> : vector<2x512xf32>
      %20 = tpu.matmul %arg9, %19, %cst_16 {dimension_numbers = #tpu.dot_dimension_numbers<[1], [0], [0], [1], [0, 0, 1, 1], [], []>} : vector<2x128xf32>, vector<128x512xf32>, vector<2x512xf32> -> vector<2x512xf32>
      %21 = arith.addf %15, %20 : vector<2x512xf32>
      %c0_17 = arith.constant 0 : index
      %c0_18 = arith.constant 0 : index
      %22 = vector.load %arg4[%c0_17, %c0_18] : memref<128x512xf32, #tpu.memory_space<vmem>>, vector<128x512xf32>
      %cst_19 = arith.constant dense<0.000000e+00> : vector<2x512xf32>
      %23 = tpu.matmul %arg10, %22, %cst_19 {dimension_numbers = #tpu.dot_dimension_numbers<[1], [0], [0], [1], [0, 0, 1, 1], [], []>} : vector<2x128xf32>, vector<128x512xf32>, vector<2x512xf32> -> vector<2x512xf32>
      %24 = arith.addf %18, %23 : vector<2x512xf32>
      %25 = vector.extract_strided_slice %21 {offsets = [0, 0], sizes = [2, 384], strides = [1, 1]} : vector<2x512xf32> to vector<2x384xf32>
      %26 = arith.negf %25 : vector<2x384xf32>
      %27 = math.exp %26 : vector<2x384xf32>
      %cst_20 = arith.constant 1.000000e+00 : f32
      %28 = vector.broadcast %cst_20 : f32 to vector<2x384xf32>
      %29 = arith.addf %28, %27 : vector<2x384xf32>
      %30 = arith.divf %28, %29 : vector<2x384xf32>
      %31 = vector.extract_strided_slice %24 {offsets = [0, 0], sizes = [2, 384], strides = [1, 1]} : vector<2x512xf32> to vector<2x384xf32>
      %32 = arith.negf %31 : vector<2x384xf32>
      %33 = math.exp %32 : vector<2x384xf32>
      %cst_21 = arith.constant 1.000000e+00 : f32
      %34 = vector.broadcast %cst_21 : f32 to vector<2x384xf32>
      %35 = arith.addf %34, %33 : vector<2x384xf32>
      %36 = arith.divf %34, %35 : vector<2x384xf32>
      %37 = vector.extract_strided_slice %21 {offsets = [0, 384], sizes = [2, 128], strides = [1, 1]} : vector<2x512xf32> to vector<2x128xf32>
      %38 = math.tanh %37 : vector<2x128xf32>
      %39 = vector.extract_strided_slice %24 {offsets = [0, 384], sizes = [2, 128], strides = [1, 1]} : vector<2x512xf32> to vector<2x128xf32>
      %40 = math.tanh %39 : vector<2x128xf32>
      %41 = vector.extract_strided_slice %30 {offsets = [0, 128], sizes = [2, 128], strides = [1, 1]} : vector<2x384xf32> to vector<2x128xf32>
      %42 = arith.mulf %41, %arg11 : vector<2x128xf32>
      %43 = vector.extract_strided_slice %30 {offsets = [0, 0], sizes = [2, 128], strides = [1, 1]} : vector<2x384xf32> to vector<2x128xf32>
      %44 = arith.mulf %43, %38 : vector<2x128xf32>
      %45 = arith.addf %42, %44 : vector<2x128xf32>
      %46 = vector.extract_strided_slice %36 {offsets = [0, 128], sizes = [2, 128], strides = [1, 1]} : vector<2x384xf32> to vector<2x128xf32>
      %47 = arith.mulf %46, %arg12 : vector<2x128xf32>
      %48 = vector.extract_strided_slice %36 {offsets = [0, 0], sizes = [2, 128], strides = [1, 1]} : vector<2x384xf32> to vector<2x128xf32>
      %49 = arith.mulf %48, %40 : vector<2x128xf32>
      %50 = arith.addf %47, %49 : vector<2x128xf32>
      %51 = vector.extract_strided_slice %30 {offsets = [0, 256], sizes = [2, 128], strides = [1, 1]} : vector<2x384xf32> to vector<2x128xf32>
      %52 = math.tanh %45 : vector<2x128xf32>
      %53 = arith.mulf %51, %52 : vector<2x128xf32>
      %54 = vector.extract_strided_slice %36 {offsets = [0, 256], sizes = [2, 128], strides = [1, 1]} : vector<2x384xf32> to vector<2x128xf32>
      %55 = math.tanh %50 : vector<2x128xf32>
      %56 = arith.mulf %54, %55 : vector<2x128xf32>
      %57 = vector.shape_cast %53 : vector<2x128xf32> to vector<1x2x128xf32>
      %58 = arith.index_cast %arg8 : i32 to index
      %c0_22 = arith.constant 0 : index
      %c0_23 = arith.constant 0 : index
      %59 = vector.load %arg6[%58, %c0_22, %c0_23] : memref<8x2x256xf32, #tpu.memory_space<vmem>>, vector<1x2x128xf32>
      tpu.vector_store %arg6[%58, %c0_22, %c0_23], %57 {strides = array<i32>} : memref<8x2x256xf32, #tpu.memory_space<vmem>>, vector<1x2x128xf32>,
      %60 = vector.shape_cast %56 : vector<2x128xf32> to vector<1x2x128xf32>
      %61 = arith.index_cast %12 : i32 to index
      %c0_24 = arith.constant 0 : index
      %c128 = arith.constant 128 : index
      %62 = vector.load %arg6[%61, %c0_24, %c128] : memref<8x2x256xf32, #tpu.memory_space<vmem>>, vector<1x2x128xf32>
      tpu.vector_store %arg6[%61, %c0_24, %c128], %60 {strides = array<i32>} : memref<8x2x256xf32, #tpu.memory_space<vmem>>, vector<1x2x128xf32>,
      scf.yield %53, %56, %45, %50 : vector<2x128xf32>, vector<2x128xf32>, vector<2x128xf32>, vector<2x128xf32>
    }
    %c8_i32_10 = arith.constant 8 : i32
    return
  }
  func.func @transform_0(%arg0: i32) -> (i32, i32, i32) {
    %c0_i32 = arith.constant 0 : i32
    %c0_i32_0 = arith.constant 0 : i32
    %c0_i32_1 = arith.constant 0 : i32
    return %arg0, %c0_i32, %c0_i32_0 : i32, i32, i32
  }
  func.func @transform_1(%arg0: i32) -> (i32, i32) {
    %c0_i32 = arith.constant 0 : i32
    %c0_i32_0 = arith.constant 0 : i32
    %c0_i32_1 = arith.constant 0 : i32
    return %c0_i32, %c0_i32_0 : i32, i32
  }
  func.func @transform_2(%arg0: i32) -> (i32, i32) {
    %c0_i32 = arith.constant 0 : i32
    %c0_i32_0 = arith.constant 0 : i32
    %c0_i32_1 = arith.constant 0 : i32
    return %c0_i32, %c0_i32_0 : i32, i32
  }
  func.func @transform_3(%arg0: i32) -> (i32, i32) {
    %c0_i32 = arith.constant 0 : i32
    %c0_i32_0 = arith.constant 0 : i32
    %c0_i32_1 = arith.constant 0 : i32
    return %c0_i32, %c0_i32_0 : i32, i32
  }
  func.func @transform_4(%arg0: i32) -> (i32, i32) {
    %c0_i32 = arith.constant 0 : i32
    %c0_i32_0 = arith.constant 0 : i32
    %c0_i32_1 = arith.constant 0 : i32
    return %c0_i32, %c0_i32_0 : i32, i32
  }
  func.func @transform_5(%arg0: i32) -> (i32, i32, i32) {
    %c0_i32 = arith.constant 0 : i32
    %c0_i32_0 = arith.constant 0 : i32
    %c0_i32_1 = arith.constant 0 : i32
    return %c0_i32, %arg0, %c0_i32_0 : i32, i32, i32
  }
}

</mosaic_0001>

<bundles_post_ra>
// kernel: hasanet_forward.2
= control target key start
LH: loop header
LB: loop body
LE: loop exit
PB: predicated region body
PF: predicated region fallthrough
CT: control target
= control target key end

     0   :  { %10 = vsyncpa [#allocation4], 0  ;;  %s2426_s0 = inlined_call_operand.vmem [shape: f32[2,8,384], index: 0, kind: input, shape index: {}]   ;;  %s2427_s1 = inlined_call_operand.hbm [shape: f32[384,1024], index: 1, kind: input, shape index: {}]   ;;  %s2428_s2 = inlined_call_operand.hbm [shape: f32[128,512], index: 2, kind: input, shape index: {}]   ;;  %s2429_s3 = inlined_call_operand.hbm [shape: f32[128,512], index: 3, kind: input, shape index: {}]   ;;  %s2430_s4 = inlined_call_operand.hbm [shape: f32[1,1024], index: 4, kind: input, shape index: {}]   ;;  %s2431_s5 = inlined_call_operand.vmem [shape: f32[8,2,256], index: 5, kind: output, shape index: {}]  }
   0x1   :  { %11 = vsyncpa [#allocation6], 0 }
   0x2   :  { %12 = vsyncpa [#allocation9], 0  ;;  %s2173_s18 = smov [#allocation5]  }
   0x3   :  { %s32_s19 = sshll.u32 %s2173_s18, 4  ;;  %s33_s19 = int_to_ptr.vmem [resolvable:$true] %s32_s19 }
   0x4   :  { %s2023_s20 = scalar_lea.vmem %s33_s19, 8192  ;;  %p2028_p1 = scmp.lt.s32.totalorder %s33_s19, %s33_s19 }
   0x5   :  { %p2024_p0 = scmp.ne.s32.totalorder %s33_s19, %s2023_s20  ;;  %p2029_p2 = scmp.lt.s32.totalorder %s2023_s20, %s2023_s20 }
   0x7   :  { %p2030_p3 = por %p2029_p2, %p2028_p1 }
   0x9   :  { %p2031_p4 = pnand %p2030_p3, %p2024_p0 }
   0xb   :  { %2034 = shalt.err (!%p2031_p4)
}
   0xc   :  { %s2174_s21 = smov 512   ;;  %s2175_s22 = smov 32  }
   0xd   :  { %38 = dma.hbm_to_vmem [thread:$0]  %s2428_s2, 8192, %s33_s19, [#allocation6], %s2174_s21, %s2174_s21, %s2175_s22  }
   0xe   :  { %s2176_s25 = smov [#allocation3]  }
   0xf   :  { %s20_s26 = sshll.u32 %s2176_s25, 4  ;;  %s21_s26 = int_to_ptr.vmem [resolvable:$true] %s20_s26 }
  0x10   :  { %s2043_s27 = scalar_lea.vmem %s21_s26, 49152  ;;  %p2048_p6 = scmp.lt.s32.totalorder %s21_s26, %s21_s26 }
  0x11   :  { %p2044_p5 = scmp.ne.s32.totalorder %s21_s26, %s2043_s27  ;;  %p2049_p7 = scmp.lt.s32.totalorder %s2043_s27, %s2043_s27 }
  0x13   :  { %p2050_p8 = por %p2049_p7, %p2048_p6 }
  0x15   :  { %p2051_p9 = pnand %p2050_p8, %p2044_p5 }
  0x17   :  { %2054 = shalt.err (!%p2051_p9)
}
  0x18   :  { %s2177_s28 = smov 1024   ;;  %s2178_s29 = smov 64  }
  0x19   :  { %26 = dma.hbm_to_vmem [thread:$0]  %s2427_s1, 49152, %s21_s26, [#allocation4], %s2177_s28, %s2177_s28, %s2178_s29  }
  0x1a   :  { %s2179_s7 = smov [#allocation7]   ;;  %s2180_s9 = smov [#allocation8]  }
  0x1b   :  { %s44_s8 = sshll.u32 %s2179_s7, 4  ;;  %s57_s2 = sshll.u32 %s2180_s9, 4  ;;  %s45_s8 = int_to_ptr.vmem [resolvable:$true] %s44_s8  ;;  %s58_s2 = int_to_ptr.vmem [resolvable:$true] %s57_s2 }
  0x1c   :  { %s2063_s10 = scalar_lea.vmem %s45_s8, 8192  ;;  %p2068_p11 = scmp.lt.s32.totalorder %s45_s8, %s45_s8 }
  0x1d   :  { %p2064_p10 = scmp.ne.s32.totalorder %s45_s8, %s2063_s10  ;;  %p2069_p12 = scmp.lt.s32.totalorder %s2063_s10, %s2063_s10 }
  0x1f   :  { %p2070_p13 = por %p2069_p12, %p2068_p11 }
  0x21   :  { %p2071_p0 = pnand %p2070_p13, %p2064_p10 }
  0x23   :  { %2074 = shalt.err (!%p2071_p0)
}
  0x24   :  { %50 = dma.hbm_to_vmem [thread:$0]  %s2429_s3, 8192, %s45_s8, [#allocation6], %s2174_s21, %s2174_s21, %s2175_s22  }
  0x25   :  { %s2083_s1 = scalar_lea.vmem %s58_s2, 128  ;;  %p2088_p2 = scmp.lt.s32.totalorder %s58_s2, %s58_s2 }
  0x26   :  { %p2084_p1 = scmp.ne.s32.totalorder %s58_s2, %s2083_s1  ;;  %p2089_p3 = scmp.lt.s32.totalorder %s2083_s1, %s2083_s1 }
  0x28   :  { %p2090_p4 = por %p2089_p3, %p2088_p2 }
  0x2a   :  { %p2091_p5 = pnand %p2090_p4, %p2084_p1 }
  0x2c   :  { %2094 = shalt.err (!%p2091_p5)
}
  0x2d   :  { %60 = dma.hbm_to_vmem [thread:$0]  %s2430_s4, 128, %s58_s2, [#allocation9]  }
  0x2e   :  { %2131 = dma.done.wait [#allocation4], 49152  }
  0x2f   :  { %2132 = vsyncadd [#allocation4], 4294918144 }
  0x30   :  { %2133 = dma.done.wait [#allocation6], 16384  }
  0x31   :  { %2134 = vsyncadd [#allocation6], 4294950912 }
  0x32   :  { %2135 = dma.done.wait [#allocation9], 128  }
  0x33   :  { %2136 = vsyncadd [#allocation9], 4294967168  ;;  %v2181_v0 = vmov 0.0   ;;  %v200_v1 = vld [vmem:[#allocation3 + $0x3c8] sm:$0xff]  ;;  %v199_v3 = vld [vmem:[#allocation3 + $0x3c0] sm:$0xff] }
  0x34   :  { %646 = vmatprep.mubr.f32.mxu1 %v2181_v0  ;;  %v456_v2 = vld [vmem:[#allocation3 + $0xbc8] sm:$0xff]  ;;  %505 = vmatprep.subr.mxu0 %v200_v1  ;;  %v455_v4 = vld [vmem:[#allocation3 + $0xbc0] sm:$0xff] }
  0x35   :  { %582 = vmatprep.subr.mxu1 %v456_v2  ;;  %v192_v5 = vld [vmem:[#allocation3 + $0x388] sm:$0xff]  ;;  %506 = vmatpush1.msra.mxu0 %v199_v3  ;;  %v191_v7 = vld [vmem:[#allocation3 + $0x380] sm:$0xff]  ;;  %v2236_v3 = vld [vmem:[%s2426_s0 + $0x10] sm:$0xff] }
  0x36   :  { %v448_v6 = vld [vmem:[#allocation3 + $0xb88] sm:$0xff]  ;;  %583 = vmatpush1.msra.mxu1 %v455_v4  ;;  %v447_v8 = vld [vmem:[#allocation3 + $0xb80] sm:$0xff]  ;;  %507 = vmatprep.subr.mxu0 %v192_v5  ;;  %v202_v4 = vld [vmem:[#allocation3 + $0x3d8] sm:$0xff] }
  0x37   :  { %v184_v9 = vld [vmem:[#allocation3 + $0x348] sm:$0xff]  ;;  %584 = vmatprep.subr.mxu1 %v448_v6  ;;  %v183_v11 = vld [vmem:[#allocation3 + $0x340] sm:$0xff]  ;;  %508 = vmatpush1.msra.mxu0 %v191_v7  ;;  %v201_v6 = vld [vmem:[#allocation3 + $0x3d0] sm:$0xff] }
  0x38   :  { %v440_v10 = vld [vmem:[#allocation3 + $0xb48] sm:$0xff]  ;;  %v439_v12 = vld [vmem:[#allocation3 + $0xb40] sm:$0xff]  ;;  %585 = vmatpush1.msra.mxu1 %v447_v8  ;;  %509 = vmatprep.subr.mxu0 %v184_v9  ;;  %v194_v8 = vld [vmem:[#allocation3 + $0x398] sm:$0xff] }
  0x39   :  { %v176_v13 = vld [vmem:[#allocation3 + $0x308] sm:$0xff]  ;;  %586 = vmatprep.subr.mxu1 %v440_v10  ;;  %v175_v15 = vld [vmem:[#allocation3 + $0x300] sm:$0xff]  ;;  %510 = vmatpush1.msra.mxu0 %v183_v11  ;;  %v193_v10 = vld [vmem:[#allocation3 + $0x390] sm:$0xff] }
  0x3a   :  { %v432_v14 = vld [vmem:[#allocation3 + $0xb08] sm:$0xff]  ;;  %v431_v16 = vld [vmem:[#allocation3 + $0xb00] sm:$0xff]  ;;  %587 = vmatpush1.msra.mxu1 %v439_v12  ;;  %511 = vmatprep.subr.mxu0 %v176_v13  ;;  %v186_v12 = vld [vmem:[#allocation3 + $0x358] sm:$0xff] }
  0x3b   :  { %v168_v17 = vld [vmem:[#allocation3 + $0x2c8] sm:$0xff]  ;;  %588 = vmatprep.subr.mxu1 %v432_v14  ;;  %v167_v19 = vld [vmem:[#allocation3 + $0x2c0] sm:$0xff]  ;;  %512 = vmatpush1.msra.mxu0 %v175_v15  ;;  %v185_v14 = vld [vmem:[#allocation3 + $0x350] sm:$0xff] }
  0x3c   :  { %v424_v18 = vld [vmem:[#allocation3 + $0xac8] sm:$0xff]  ;;  %v423_v20 = vld [vmem:[#allocation3 + $0xac0] sm:$0xff]  ;;  %589 = vmatpush1.msra.mxu1 %v431_v16  ;;  %513 = vmatprep.subr.mxu0 %v168_v17  ;;  %v178_v16 = vld [vmem:[#allocation3 + $0x318] sm:$0xff] }
  0x3d   :  { %v160_v21 = vld [vmem:[#allocation3 + $0x288] sm:$0xff]  ;;  %590 = vmatprep.subr.mxu1 %v424_v18  ;;  %v159_v23 = vld [vmem:[#allocation3 + $0x280] sm:$0xff]  ;;  %514 = vmatpush1.msra.mxu0 %v167_v19  ;;  %v177_v18 = vld [vmem:[#allocation3 + $0x310] sm:$0xff] }
  0x3e   :  { %v416_v22 = vld [vmem:[#allocation3 + $0xa88] sm:$0xff]  ;;  %v415_v24 = vld [vmem:[#allocation3 + $0xa80] sm:$0xff]  ;;  %591 = vmatpush1.msra.mxu1 %v423_v20  ;;  %515 = vmatprep.subr.mxu0 %v160_v21  ;;  %v170_v20 = vld [vmem:[#allocation3 + $0x2d8] sm:$0xff] }
  0x3f   :  { %v152_v25 = vld [vmem:[#allocation3 + $0x248] sm:$0xff]  ;;  %592 = vmatprep.subr.mxu1 %v416_v22  ;;  %v151_v27 = vld [vmem:[#allocation3 + $0x240] sm:$0xff]  ;;  %516 = vmatpush1.msra.mxu0 %v159_v23  ;;  %v169_v22 = vld [vmem:[#allocation3 + $0x2d0] sm:$0xff] }
  0x40   :  { %v408_v26 = vld [vmem:[#allocation3 + $0xa48] sm:$0xff]  ;;  %v407_v28 = vld [vmem:[#allocation3 + $0xa40] sm:$0xff]  ;;  %593 = vmatpush1.msra.mxu1 %v415_v24  ;;  %517 = vmatprep.subr.mxu0 %v152_v25  ;;  %v162_v24 = vld [vmem:[#allocation3 + $0x298] sm:$0xff] }
  0x41   :  { %v144_v29 = vld [vmem:[#allocation3 + $0x208] sm:$0xff]  ;;  %594 = vmatprep.subr.mxu1 %v408_v26  ;;  %v143_v31 = vld [vmem:[#allocation3 + $0x200] sm:$0xff]  ;;  %518 = vmatpush1.msra.mxu0 %v151_v27  ;;  %v161_v26 = vld [vmem:[#allocation3 + $0x290] sm:$0xff] }
  0x42   :  { %v400_v30 = vld [vmem:[#allocation3 + $0xa08] sm:$0xff]  ;;  %v399_v32 = vld [vmem:[#allocation3 + $0xa00] sm:$0xff]  ;;  %595 = vmatpush1.msra.mxu1 %v407_v28  ;;  %519 = vmatprep.subr.mxu0 %v144_v29  ;;  %v154_v28 = vld [vmem:[#allocation3 + $0x258] sm:$0xff] }
  0x43   :  { %v136_v33 = vld [vmem:[#allocation3 + $0x1c8] sm:$0xff]  ;;  %596 = vmatprep.subr.mxu1 %v400_v30  ;;  %v135_v35 = vld [vmem:[#allocation3 + $0x1c0] sm:$0xff]  ;;  %520 = vmatpush1.msra.mxu0 %v143_v31  ;;  %v153_v30 = vld [vmem:[#allocation3 + $0x250] sm:$0xff] }
  0x44   :  { %v392_v34 = vld [vmem:[#allocation3 + $0x9c8] sm:$0xff]  ;;  %v391_v36 = vld [vmem:[#allocation3 + $0x9c0] sm:$0xff]  ;;  %597 = vmatpush1.msra.mxu1 %v399_v32  ;;  %521 = vmatprep.subr.mxu0 %v136_v33  ;;  %v146_v32 = vld [vmem:[#allocation3 + $0x218] sm:$0xff] }
  0x45   :  { %v128_v37 = vld [vmem:[#allocation3 + $0x188] sm:$0xff]  ;;  %598 = vmatprep.subr.mxu1 %v392_v34  ;;  %v127_v39 = vld [vmem:[#allocation3 + $0x180] sm:$0xff]  ;;  %522 = vmatpush1.msra.mxu0 %v135_v35  ;;  %v145_v34 = vld [vmem:[#allocation3 + $0x210] sm:$0xff] }
  0x46   :  { %v384_v38 = vld [vmem:[#allocation3 + $0x988] sm:$0xff]  ;;  %v383_v40 = vld [vmem:[#allocation3 + $0x980] sm:$0xff]  ;;  %599 = vmatpush1.msra.mxu1 %v391_v36  ;;  %523 = vmatprep.subr.mxu0 %v128_v37  ;;  %v138_v36 = vld [vmem:[#allocation3 + $0x1d8] sm:$0xff] }
  0x47   :  { %v120_v41 = vld [vmem:[#allocation3 + $0x148] sm:$0xff]  ;;  %600 = vmatprep.subr.mxu1 %v384_v38  ;;  %v119_v43 = vld [vmem:[#allocation3 + $0x140] sm:$0xff]  ;;  %524 = vmatpush1.msra.mxu0 %v127_v39  ;;  %v137_v38 = vld [vmem:[#allocation3 + $0x1d0] sm:$0xff] }
  0x48   :  { %v376_v42 = vld [vmem:[#allocation3 + $0x948] sm:$0xff]  ;;  %v375_v44 = vld [vmem:[#allocation3 + $0x940] sm:$0xff]  ;;  %601 = vmatpush1.msra.mxu1 %v383_v40  ;;  %525 = vmatprep.subr.mxu0 %v120_v41  ;;  %v130_v40 = vld [vmem:[#allocation3 + $0x198] sm:$0xff] }
  0x49   :  { %v112_v45 = vld [vmem:[#allocation3 + $0x108] sm:$0xff]  ;;  %602 = vmatprep.subr.mxu1 %v376_v42  ;;  %v111_v47 = vld [vmem:[#allocation3 + $0x100] sm:$0xff]  ;;  %526 = vmatpush1.msra.mxu0 %v119_v43  ;;  %v129_v42 = vld [vmem:[#allocation3 + $0x190] sm:$0xff] }
  0x4a   :  { %v368_v46 = vld [vmem:[#allocation3 + $0x908] sm:$0xff]  ;;  %v367_v48 = vld [vmem:[#allocation3 + $0x900] sm:$0xff]  ;;  %603 = vmatpush1.msra.mxu1 %v375_v44  ;;  %527 = vmatprep.subr.mxu0 %v112_v45  ;;  %v122_v44 = vld [vmem:[#allocation3 + $0x158] sm:$0xff] }
  0x4b   :  { %v104_v49 = vld [vmem:[#allocation3 + $0xc8] sm:$0xff]  ;;  %604 = vmatprep.subr.mxu1 %v368_v46  ;;  %v103_v51 = vld [vmem:[#allocation3 + $0xc0] sm:$0xff]  ;;  %528 = vmatpush1.msra.mxu0 %v111_v47  ;;  %v121_v46 = vld [vmem:[#allocation3 + $0x150] sm:$0xff] }
  0x4c   :  { %v360_v50 = vld [vmem:[#allocation3 + $0x8c8] sm:$0xff]  ;;  %v359_v52 = vld [vmem:[#allocation3 + $0x8c0] sm:$0xff]  ;;  %605 = vmatpush1.msra.mxu1 %v367_v48  ;;  %529 = vmatprep.subr.mxu0 %v104_v49  ;;  %v114_v48 = vld [vmem:[#allocation3 + $0x118] sm:$0xff] }
  0x4d   :  { %v96_v53 = vld [vmem:[#allocation3 + $0x88] sm:$0xff]  ;;  %606 = vmatprep.subr.mxu1 %v360_v50  ;;  %v95_v55 = vld [vmem:[#allocation3 + $0x80] sm:$0xff]  ;;  %530 = vmatpush1.msra.mxu0 %v103_v51  ;;  %v113_v50 = vld [vmem:[#allocation3 + $0x110] sm:$0xff] }
  0x4e   :  { %v352_v54 = vld [vmem:[#allocation3 + $0x888] sm:$0xff]  ;;  %v351_v56 = vld [vmem:[#allocation3 + $0x880] sm:$0xff]  ;;  %607 = vmatpush1.msra.mxu1 %v359_v52  ;;  %531 = vmatprep.subr.mxu0 %v96_v53  ;;  %v106_v52 = vld [vmem:[#allocation3 + $0xd8] sm:$0xff] }
  0x4f   :  { %v88_v57 = vld [vmem:[#allocation3 + $0x48] sm:$0xff]  ;;  %608 = vmatprep.subr.mxu1 %v352_v54  ;;  %v87_v59 = vld [vmem:[#allocation3 + $0x40] sm:$0xff]  ;;  %532 = vmatpush1.msra.mxu0 %v95_v55  ;;  %v105_v54 = vld [vmem:[#allocation3 + $0xd0] sm:$0xff] }
  0x50   :  { %v344_v58 = vld [vmem:[#allocation3 + $0x848] sm:$0xff]  ;;  %v343_v60 = vld [vmem:[#allocation3 + $0x840] sm:$0xff]  ;;  %609 = vmatpush1.msra.mxu1 %v351_v56  ;;  %533 = vmatprep.subr.mxu0 %v88_v57  ;;  %v98_v56 = vld [vmem:[#allocation3 + $0x98] sm:$0xff] }
  0x51   :  { %v80_v61 = vld [vmem:[#allocation3 + $0x8] sm:$0xff]  ;;  %610 = vmatprep.subr.mxu1 %v344_v58  ;;  %v79_v63 = vld [vmem:[#allocation3] sm:$0xff]  ;;  %534 = vmatpush1.msra.mxu0 %v87_v59  ;;  %v97_v58 = vld [vmem:[#allocation3 + $0x90] sm:$0xff] }
  0x52   :  { %v336_v62 = vld [vmem:[#allocation3 + $0x808] sm:$0xff]  ;;  %v335_v1 = vld [vmem:[#allocation3 + $0x800] sm:$0xff]  ;;  %611 = vmatpush1.msra.mxu1 %v343_v60  ;;  %535 = vmatprep.subr.mxu0 %v80_v61  ;;  %v90_v60 = vld [vmem:[#allocation3 + $0x58] sm:$0xff] }
  0x53   :  { %v328_v2 = vld [vmem:[#allocation3 + $0x7c8] sm:$0xff]  ;;  %612 = vmatprep.subr.mxu1 %v336_v62  ;;  %v327_v5 = vld [vmem:[#allocation3 + $0x7c0] sm:$0xff]  ;;  %536 = vmatpush1.msra.mxu0 %v79_v63  ;;  %v89_v62 = vld [vmem:[#allocation3 + $0x50] sm:$0xff] }
  0x54   :  { %613 = vmatpush1.msra.mxu1 %v335_v1  ;;  %v320_v7 = vld [vmem:[#allocation3 + $0x788] sm:$0xff]  ;;  %537 = vmatprep.subr.mxu0 %v328_v2  ;;  %v319_v9 = vld [vmem:[#allocation3 + $0x780] sm:$0xff]  ;;  %v82_v1 = vld [vmem:[#allocation3 + $0x18] sm:$0xff] }
  0x55   :  { %647 = vmatmul.mubr.f32.vlgmr.msra.gmra.mxu1 %v2236_v3  ;;  %659 = vmatprep.subr.mxu1 %v202_v4  ;;  %v312_v11 = vld [vmem:[#allocation3 + $0x748] sm:$0xff]  ;;  %v311_v13 = vld [vmem:[#allocation3 + $0x740] sm:$0xff] }
  0x56   :  { %538 = vmatpush2.msra.mxu0 %v327_v5  ;;  %660 = vmatpush1.msra.mxu1 %v201_v6  ;;  %v304_v15 = vld [vmem:[#allocation3 + $0x708] sm:$0xff]  ;;  %v303_v17 = vld [vmem:[#allocation3 + $0x700] sm:$0xff]  ;;  %v81_v5 = vld [vmem:[#allocation3 + $0x10] sm:$0xff] }
  0x57   :  { %539 = vmatprep.subr.mxu0 %v320_v7  ;;  %661 = vmatprep.subr.mxu1 %v194_v8  ;;  %v296_v19 = vld [vmem:[#allocation3 + $0x6c8] sm:$0xff]  ;;  %v295_v21 = vld [vmem:[#allocation3 + $0x6c0] sm:$0xff]  ;;  %v330_v7 = vld [vmem:[#allocation3 + $0x7d8] sm:$0xff] }
  0x58   :  { %540 = vmatpush2.msra.mxu0 %v319_v9  ;;  %662 = vmatpush1.msra.mxu1 %v193_v10  ;;  %v288_v23 = vld [vmem:[#allocation3 + $0x688] sm:$0xff]  ;;  %v287_v25 = vld [vmem:[#allocation3 + $0x680] sm:$0xff]  ;;  %v458_v8 = vld [vmem:[#allocation3 + $0xbd8] sm:$0xff] }
  0x59   :  { %541 = vmatprep.subr.mxu0 %v312_v11  ;;  %663 = vmatprep.subr.mxu1 %v186_v12  ;;  %v280_v27 = vld [vmem:[#allocation3 + $0x648] sm:$0xff]  ;;  %v279_v29 = vld [vmem:[#allocation3 + $0x640] sm:$0xff]  ;;  %v329_v9 = vld [vmem:[#allocation3 + $0x7d0] sm:$0xff] }
  0x5a   :  { %542 = vmatpush2.msra.mxu0 %v311_v13  ;;  %664 = vmatpush1.msra.mxu1 %v185_v14  ;;  %v272_v31 = vld [vmem:[#allocation3 + $0x608] sm:$0xff]  ;;  %v271_v33 = vld [vmem:[#allocation3 + $0x600] sm:$0xff]  ;;  %v457_v10 = vld [vmem:[#allocation3 + $0xbd0] sm:$0xff] }
  0x5b   :  { %543 = vmatprep.subr.mxu0 %v304_v15  ;;  %665 = vmatprep.subr.mxu1 %v178_v16  ;;  %v264_v35 = vld [vmem:[#allocation3 + $0x5c8] sm:$0xff]  ;;  %v263_v37 = vld [vmem:[#allocation3 + $0x5c0] sm:$0xff]  ;;  %v322_v11 = vld [vmem:[#allocation3 + $0x798] sm:$0xff] }
  0x5c   :  { %544 = vmatpush2.msra.mxu0 %v303_v17  ;;  %666 = vmatpush1.msra.mxu1 %v177_v18  ;;  %v256_v39 = vld [vmem:[#allocation3 + $0x588] sm:$0xff]  ;;  %v255_v41 = vld [vmem:[#allocation3 + $0x580] sm:$0xff]  ;;  %v450_v12 = vld [vmem:[#allocation3 + $0xb98] sm:$0xff] }
  0x5d   :  { %545 = vmatprep.subr.mxu0 %v296_v19  ;;  %667 = vmatprep.subr.mxu1 %v170_v20  ;;  %v248_v43 = vld [vmem:[#allocation3 + $0x548] sm:$0xff]  ;;  %v247_v45 = vld [vmem:[#allocation3 + $0x540] sm:$0xff]  ;;  %v321_v13 = vld [vmem:[#allocation3 + $0x790] sm:$0xff] }
  0x5e   :  { %546 = vmatpush2.msra.mxu0 %v295_v21  ;;  %668 = vmatpush1.msra.mxu1 %v169_v22  ;;  %v240_v47 = vld [vmem:[#allocation3 + $0x508] sm:$0xff]  ;;  %v239_v49 = vld [vmem:[#allocation3 + $0x500] sm:$0xff]  ;;  %v449_v14 = vld [vmem:[#allocation3 + $0xb90] sm:$0xff] }
  0x5f   :  { %547 = vmatprep.subr.mxu0 %v288_v23  ;;  %669 = vmatprep.subr.mxu1 %v162_v24  ;;  %v232_v51 = vld [vmem:[#allocation3 + $0x4c8] sm:$0xff]  ;;  %v231_v53 = vld [vmem:[#allocation3 + $0x4c0] sm:$0xff]  ;;  %v314_v15 = vld [vmem:[#allocation3 + $0x758] sm:$0xff] }
  0x60   :  { %548 = vmatpush2.msra.mxu0 %v287_v25  ;;  %670 = vmatpush1.msra.mxu1 %v161_v26  ;;  %v224_v55 = vld [vmem:[#allocation3 + $0x488] sm:$0xff]  ;;  %v223_v57 = vld [vmem:[#allocation3 + $0x480] sm:$0xff]  ;;  %v442_v16 = vld [vmem:[#allocation3 + $0xb58] sm:$0xff] }
  0x61   :  { %549 = vmatprep.subr.mxu0 %v280_v27  ;;  %671 = vmatprep.subr.mxu1 %v154_v28  ;;  %v216_v59 = vld [vmem:[#allocation3 + $0x448] sm:$0xff]  ;;  %v215_v61 = vld [vmem:[#allocation3 + $0x440] sm:$0xff]  ;;  %v313_v17 = vld [vmem:[#allocation3 + $0x750] sm:$0xff] }
  0x62   :  { %550 = vmatpush2.msra.mxu0 %v279_v29  ;;  %672 = vmatpush1.msra.mxu1 %v153_v30  ;;  %v208_v63 = vld [vmem:[#allocation3 + $0x408] sm:$0xff]  ;;  %v207_v2 = vld [vmem:[#allocation3 + $0x400] sm:$0xff]  ;;  %v441_v18 = vld [vmem:[#allocation3 + $0xb50] sm:$0xff] }
  0x63   :  { %551 = vmatprep.subr.mxu0 %v272_v31  ;;  %673 = vmatprep.subr.mxu1 %v146_v32  ;;  %v2242_v4 = vld [vmem:[%s2426_s0 + $0x8] sm:$0xff]  ;;  %v2247_v6 = vld [vmem:[%s2426_s0] sm:$0xff]  ;;  %v306_v19 = vld [vmem:[#allocation3 + $0x718] sm:$0xff] }
  0x64   :  { %552 = vmatpush2.msra.mxu0 %v271_v33  ;;  %674 = vmatpush1.msra.mxu1 %v145_v34  ;;  %v434_v20 = vld [vmem:[#allocation3 + $0xb18] sm:$0xff]  ;;  %v305_v21 = vld [vmem:[#allocation3 + $0x710] sm:$0xff] }
  0x65   :  { %553 = vmatprep.subr.mxu0 %v264_v35  ;;  %675 = vmatprep.subr.mxu1 %v138_v36  ;;  %v433_v22 = vld [vmem:[#allocation3 + $0xb10] sm:$0xff]  ;;  %v298_v23 = vld [vmem:[#allocation3 + $0x6d8] sm:$0xff] }
  0x66   :  { %554 = vmatpush2.msra.mxu0 %v263_v37  ;;  %676 = vmatpush1.msra.mxu1 %v137_v38  ;;  %v426_v24 = vld [vmem:[#allocation3 + $0xad8] sm:$0xff]  ;;  %v297_v25 = vld [vmem:[#allocation3 + $0x6d0] sm:$0xff] }
  0x67   :  { %555 = vmatprep.subr.mxu0 %v256_v39  ;;  %677 = vmatprep.subr.mxu1 %v130_v40  ;;  %v425_v26 = vld [vmem:[#allocation3 + $0xad0] sm:$0xff]  ;;  %v290_v27 = vld [vmem:[#allocation3 + $0x698] sm:$0xff] }
  0x68   :  { %556 = vmatpush2.msra.mxu0 %v255_v41  ;;  %678 = vmatpush1.msra.mxu1 %v129_v42  ;;  %v418_v28 = vld [vmem:[#allocation3 + $0xa98] sm:$0xff]  ;;  %v289_v29 = vld [vmem:[#allocation3 + $0x690] sm:$0xff] }
  0x69   :  { %557 = vmatprep.subr.mxu0 %v248_v43  ;;  %679 = vmatprep.subr.mxu1 %v122_v44  ;;  %v417_v30 = vld [vmem:[#allocation3 + $0xa90] sm:$0xff]  ;;  %v282_v31 = vld [vmem:[#allocation3 + $0x658] sm:$0xff] }
  0x6a   :  { %558 = vmatpush2.msra.mxu0 %v247_v45  ;;  %680 = vmatpush1.msra.mxu1 %v121_v46  ;;  %v410_v32 = vld [vmem:[#allocation3 + $0xa58] sm:$0xff]  ;;  %v281_v33 = vld [vmem:[#allocation3 + $0x650] sm:$0xff] }
  0x6b   :  { %559 = vmatprep.subr.mxu0 %v240_v47  ;;  %681 = vmatprep.subr.mxu1 %v114_v48  ;;  %v409_v34 = vld [vmem:[#allocation3 + $0xa50] sm:$0xff]  ;;  %v274_v35 = vld [vmem:[#allocation3 + $0x618] sm:$0xff] }
  0x6c   :  { %560 = vmatpush2.msra.mxu0 %v239_v49  ;;  %682 = vmatpush1.msra.mxu1 %v113_v50  ;;  %v402_v36 = vld [vmem:[#allocation3 + $0xa18] sm:$0xff]  ;;  %v273_v37 = vld [vmem:[#allocation3 + $0x610] sm:$0xff] }
  0x6d   :  { %561 = vmatprep.subr.mxu0 %v232_v51  ;;  %683 = vmatprep.subr.mxu1 %v106_v52  ;;  %v401_v38 = vld [vmem:[#allocation3 + $0xa10] sm:$0xff]  ;;  %v266_v39 = vld [vmem:[#allocation3 + $0x5d8] sm:$0xff] }
  0x6e   :  { %562 = vmatpush2.msra.mxu0 %v231_v53  ;;  %684 = vmatpush1.msra.mxu1 %v105_v54  ;;  %v394_v40 = vld [vmem:[#allocation3 + $0x9d8] sm:$0xff]  ;;  %v265_v41 = vld [vmem:[#allocation3 + $0x5d0] sm:$0xff] }
  0x6f   :  { %563 = vmatprep.subr.mxu0 %v224_v55  ;;  %685 = vmatprep.subr.mxu1 %v98_v56  ;;  %v393_v42 = vld [vmem:[#allocation3 + $0x9d0] sm:$0xff]  ;;  %v258_v43 = vld [vmem:[#allocation3 + $0x598] sm:$0xff]  ;;  %v2254_v55 = vld [vmem:[%s2426_s0 + $0x20] sm:$0xff] }
  0x70   :  { %564 = vmatpush2.msra.mxu0 %v223_v57  ;;  %686 = vmatpush1.msra.mxu1 %v97_v58  ;;  %v386_v44 = vld [vmem:[#allocation3 + $0x998] sm:$0xff]  ;;  %v257_v45 = vld [vmem:[#allocation3 + $0x590] sm:$0xff] }
  0x71   :  { %565 = vmatprep.subr.mxu0 %v216_v59  ;;  %687 = vmatprep.subr.mxu1 %v90_v60  ;;  %v385_v46 = vld [vmem:[#allocation3 + $0x990] sm:$0xff]  ;;  %v250_v47 = vld [vmem:[#allocation3 + $0x558] sm:$0xff] }
  0x72   :  { %566 = vmatpush2.msra.mxu0 %v215_v61  ;;  %688 = vmatpush1.msra.mxu1 %v89_v62  ;;  %v378_v48 = vld [vmem:[#allocation3 + $0x958] sm:$0xff]  ;;  %v249_v49 = vld [vmem:[#allocation3 + $0x550] sm:$0xff] }
  0x73   :  { %567 = vmatprep.subr.mxu0 %v208_v63  ;;  %689 = vmatprep.subr.mxu1 %v82_v1  ;;  %v377_v50 = vld [vmem:[#allocation3 + $0x950] sm:$0xff]  ;;  %v242_v51 = vld [vmem:[#allocation3 + $0x518] sm:$0xff]  ;;  %v2266_v63 = vld [vmem:[%s2426_s0 + $0x28] sm:$0xff] }
  0x74   :  { %568 = vmatpush2.msra.mxu0 %v207_v2  ;;  %569 = vmatprep.mubr.f32.mxu0 %v2242_v4  ;;  %v370_v52 = vld [vmem:[#allocation3 + $0x918] sm:$0xff]  ;;  %v241_v53 = vld [vmem:[#allocation3 + $0x510] sm:$0xff] }
  0x75   :  { %690 = vmatpush1.msra.mxu1 %v81_v5  ;;  %570 = vmatmul.mubr.f32.vlgmr.msra.gmra.mxu0 %v2247_v6  ;;  %v369_v54 = vld [vmem:[#allocation3 + $0x910] sm:$0xff]  ;;  %v234_v56 = vld [vmem:[#allocation3 + $0x4d8] sm:$0xff] }
  0x76   :  { %691 = vmatprep.subr.mxu1 %v330_v7  ;;  %736 = vmatprep.subr.mxu0 %v458_v8  ;;  %v362_v57 = vld [vmem:[#allocation3 + $0x8d8] sm:$0xff]  ;;  %v233_v59 = vld [vmem:[#allocation3 + $0x4d0] sm:$0xff] }
  0x77   :  { %692 = vmatpush2.msra.mxu1 %v329_v9  ;;  %737 = vmatpush1.msra.mxu0 %v457_v10  ;;  %v2259_v58 = vld [vmem:[%s2426_s0 + $0x18] sm:$0xff]  ;;  %v361_v60 = vld [vmem:[#allocation3 + $0x8d0] sm:$0xff] }
  0x78   :  { %693 = vmatprep.subr.mxu1 %v322_v11  ;;  %738 = vmatprep.subr.mxu0 %v450_v12  ;;  %v226_v61 = vld [vmem:[#allocation3 + $0x498] sm:$0xff]  ;;  %v353_v1 = vld [vmem:[#allocation3 + $0x890] sm:$0xff] }
  0x79   :  { %694 = vmatpush2.msra.mxu1 %v321_v13  ;;  %739 = vmatpush1.msra.mxu0 %v449_v14  ;;  %v354_v62 = vld [vmem:[#allocation3 + $0x898] sm:$0xff]  ;;  %v225_v2 = vld [vmem:[#allocation3 + $0x490] sm:$0xff]  ;;  %v204_v14 = vld [vmem:[#allocation3 + $0x3e8] sm:$0xff] }
  0x7a   :  { %695 = vmatprep.subr.mxu1 %v314_v15  ;;  %740 = vmatprep.subr.mxu0 %v442_v16  ;;  %v346_v5 = vld [vmem:[#allocation3 + $0x858] sm:$0xff]  ;;  %v345_v8 = vld [vmem:[#allocation3 + $0x850] sm:$0xff]  ;;  %v460_v15 = vld [vmem:[#allocation3 + $0xbe8] sm:$0xff] }
  0x7b   :  { %696 = vmatpush2.msra.mxu1 %v313_v17  ;;  %741 = vmatpush1.msra.mxu0 %v441_v18  ;;  %v218_v7 = vld [vmem:[#allocation3 + $0x458] sm:$0xff]  ;;  %v217_v9 = vld [vmem:[#allocation3 + $0x450] sm:$0xff]  ;;  %v459_v16 = vld [vmem:[#allocation3 + $0xbe0] sm:$0xff] }
  0x7c   :  { %697 = vmatprep.subr.mxu1 %v306_v19  ;;  %742 = vmatprep.subr.mxu0 %v434_v20  ;;  %v338_v10 = vld [vmem:[#allocation3 + $0x818] sm:$0xff]  ;;  %v209_v12 = vld [vmem:[#allocation3 + $0x410] sm:$0xff]  ;;  %v203_v17 = vld [vmem:[#allocation3 + $0x3e0] sm:$0xff] }
  0x7d   :  { %698 = vmatpush2.msra.mxu1 %v305_v21  ;;  %743 = vmatpush1.msra.mxu0 %v433_v22  ;;  %v210_v11 = vld [vmem:[#allocation3 + $0x418] sm:$0xff]  ;;  %v337_v13 = vld [vmem:[#allocation3 + $0x810] sm:$0xff]  ;;  %v452_v18 = vld [vmem:[#allocation3 + $0xba8] sm:$0xff] }
  0x7e   :  { %699 = vmatprep.subr.mxu1 %v298_v23  ;;  %744 = vmatprep.subr.mxu0 %v426_v24  ;;  %v196_v19 = vld [vmem:[#allocation3 + $0x3a8] sm:$0xff]  ;;  %v451_v20 = vld [vmem:[#allocation3 + $0xba0] sm:$0xff] }
  0x7f   :  { %700 = vmatpush2.msra.mxu1 %v297_v25  ;;  %745 = vmatpush1.msra.mxu0 %v425_v26  ;;  %v195_v21 = vld [vmem:[#allocation3 + $0x3a0] sm:$0xff]  ;;  %v444_v22 = vld [vmem:[#allocation3 + $0xb68] sm:$0xff] }
  0x80   :  { %701 = vmatprep.subr.mxu1 %v290_v27  ;;  %746 = vmatprep.subr.mxu0 %v418_v28  ;;  %v188_v23 = vld [vmem:[#allocation3 + $0x368] sm:$0xff]  ;;  %v443_v24 = vld [vmem:[#allocation3 + $0xb60] sm:$0xff] }
  0x81   :  { %702 = vmatpush2.msra.mxu1 %v289_v29  ;;  %747 = vmatpush1.msra.mxu0 %v417_v30  ;;  %v187_v25 = vld [vmem:[#allocation3 + $0x360] sm:$0xff]  ;;  %v436_v26 = vld [vmem:[#allocation3 + $0xb28] sm:$0xff] }
  0x82   :  { %703 = vmatprep.subr.mxu1 %v282_v31  ;;  %748 = vmatprep.subr.mxu0 %v410_v32  ;;  %v180_v27 = vld [vmem:[#allocation3 + $0x328] sm:$0xff]  ;;  %v435_v28 = vld [vmem:[#allocation3 + $0xb20] sm:$0xff] }
  0x83   :  { %704 = vmatpush2.msra.mxu1 %v281_v33  ;;  %749 = vmatpush1.msra.mxu0 %v409_v34  ;;  %v179_v29 = vld [vmem:[#allocation3 + $0x320] sm:$0xff]  ;;  %v428_v30 = vld [vmem:[#allocation3 + $0xae8] sm:$0xff] }
  0x84   :  { %705 = vmatprep.subr.mxu1 %v274_v35  ;;  %750 = vmatprep.subr.mxu0 %v402_v36  ;;  %v172_v31 = vld [vmem:[#allocation3 + $0x2e8] sm:$0xff]  ;;  %v427_v32 = vld [vmem:[#allocation3 + $0xae0] sm:$0xff] }
  0x85   :  { %706 = vmatpush2.msra.mxu1 %v273_v37  ;;  %751 = vmatpush1.msra.mxu0 %v401_v38  ;;  %v171_v33 = vld [vmem:[#allocation3 + $0x2e0] sm:$0xff]  ;;  %v420_v34 = vld [vmem:[#allocation3 + $0xaa8] sm:$0xff] }
  0x86   :  { %707 = vmatprep.subr.mxu1 %v266_v39  ;;  %752 = vmatprep.subr.mxu0 %v394_v40  ;;  %v164_v35 = vld [vmem:[#allocation3 + $0x2a8] sm:$0xff]  ;;  %v419_v36 = vld [vmem:[#allocation3 + $0xaa0] sm:$0xff] }
  0x87   :  { %708 = vmatpush2.msra.mxu1 %v265_v41  ;;  %753 = vmatpush1.msra.mxu0 %v393_v42  ;;  %v163_v37 = vld [vmem:[#allocation3 + $0x2a0] sm:$0xff]  ;;  %v412_v38 = vld [vmem:[#allocation3 + $0xa68] sm:$0xff] }
  0x88   :  { %709 = vmatprep.subr.mxu1 %v258_v43  ;;  %754 = vmatprep.subr.mxu0 %v386_v44  ;;  %v156_v39 = vld [vmem:[#allocation3 + $0x268] sm:$0xff]  ;;  %v411_v40 = vld [vmem:[#allocation3 + $0xa60] sm:$0xff] }
  0x89   :  { %710 = vmatpush2.msra.mxu1 %v257_v45  ;;  %755 = vmatpush1.msra.mxu0 %v385_v46  ;;  %v155_v41 = vld [vmem:[#allocation3 + $0x260] sm:$0xff]  ;;  %v404_v42 = vld [vmem:[#allocation3 + $0xa28] sm:$0xff] }
  0x8a   :  { %711 = vmatprep.subr.mxu1 %v250_v47  ;;  %756 = vmatprep.subr.mxu0 %v378_v48  ;;  %v148_v43 = vld [vmem:[#allocation3 + $0x228] sm:$0xff]  ;;  %v403_v44 = vld [vmem:[#allocation3 + $0xa20] sm:$0xff] }
  0x8b   :  { %712 = vmatpush2.msra.mxu1 %v249_v49  ;;  %757 = vmatpush1.msra.mxu0 %v377_v50  ;;  %v147_v45 = vld [vmem:[#allocation3 + $0x220] sm:$0xff]  ;;  %v396_v46 = vld [vmem:[#allocation3 + $0x9e8] sm:$0xff] }
  0x8c   :  { %713 = vmatprep.subr.mxu1 %v242_v51  ;;  %758 = vmatprep.subr.mxu0 %v370_v52  ;;  %v140_v47 = vld [vmem:[#allocation3 + $0x1e8] sm:$0xff]  ;;  %v395_v48 = vld [vmem:[#allocation3 + $0x9e0] sm:$0xff] }
  0x8d   :  { %714 = vmatpush2.msra.mxu1 %v241_v53  ;;  %759 = vmatpush1.msra.mxu0 %v369_v54  ;;  %v139_v49 = vld [vmem:[#allocation3 + $0x1e0] sm:$0xff]  ;;  %v388_v50 = vld [vmem:[#allocation3 + $0x9a8] sm:$0xff] }
  0x8e   :  { %575 = vmatprep.mubr.f32.mxu0 %v2254_v55  ;;  %715 = vmatprep.subr.mxu1 %v234_v56  ;;  %v132_v51 = vld [vmem:[#allocation3 + $0x1a8] sm:$0xff]  ;;  %v387_v52 = vld [vmem:[#allocation3 + $0x9a0] sm:$0xff] }
  0x8f   :  { %760 = vmatprep.subr.mxu0 %v362_v57  ;;  %576 = vmatmul.mubr.f32.gmra.mxu0 %v2259_v58  ;;  %v131_v53 = vld [vmem:[#allocation3 + $0x1a0] sm:$0xff]  ;;  %v380_v54 = vld [vmem:[#allocation3 + $0x968] sm:$0xff] }
  0x90   :  { %716 = vmatpush2.msra.mxu1 %v233_v59  ;;  %761 = vmatpush1.msra.mxu0 %v361_v60  ;;  %v124_v56 = vld [vmem:[#allocation3 + $0x168] sm:$0xff]  ;;  %v379_v57 = vld [vmem:[#allocation3 + $0x960] sm:$0xff] }
  0x91   :  { %652 = vmatprep.mubr.f32.mxu1 %v2181_v0  ;;  %717 = vmatprep.subr.mxu1 %v226_v61  ;;  %v123_v59 = vld [vmem:[#allocation3 + $0x160] sm:$0xff]  ;;  %v372_v60 = vld [vmem:[#allocation3 + $0x928] sm:$0xff] }
  0x92   :  { %762 = vmatprep.subr.mxu0 %v354_v62  ;;  %653 = vmatmul.mubr.f32.gmra.mxu1 %v2266_v63  ;;  %v116_v61 = vld [vmem:[#allocation3 + $0x128] sm:$0xff]  ;;  %v371_v62 = vld [vmem:[#allocation3 + $0x920] sm:$0xff] }
  0x93   :  { %763 = vmatpush1.msra.mxu0 %v353_v1  ;;  %718 = vmatpush2.msra.mxu1 %v225_v2  ;;  %v115_v1 = vld [vmem:[#allocation3 + $0x120] sm:$0xff]  ;;  %v364_v2 = vld [vmem:[#allocation3 + $0x8e8] sm:$0xff] }
  0x94   :  { %764 = vmatprep.subr.mxu0 %v346_v5  ;;  %719 = vmatprep.subr.mxu1 %v218_v7  ;;  %v108_v5 = vld [vmem:[#allocation3 + $0xe8] sm:$0xff]  ;;  %v363_v7 = vld [vmem:[#allocation3 + $0x8e0] sm:$0xff] }
  0x95   :  { %765 = vmatpush1.msra.mxu0 %v345_v8  ;;  %720 = vmatpush2.msra.mxu1 %v217_v9  ;;  %v107_v8 = vld [vmem:[#allocation3 + $0xe0] sm:$0xff]  ;;  %v100_v9 = vld [vmem:[#allocation3 + $0xa8] sm:$0xff] }
  0x96   :  { %766 = vmatprep.subr.mxu0 %v338_v10  ;;  %721 = vmatprep.subr.mxu1 %v210_v11  ;;  %v356_v10 = vld [vmem:[#allocation3 + $0x8a8] sm:$0xff]  ;;  %v99_v11 = vld [vmem:[#allocation3 + $0xa0] sm:$0xff] }
  0x97   :  { %723 = vmatprep.mubr.f32.mxu1 %v2242_v4  ;;  %722 = vmatpush2.msra.mxu1 %v209_v12  ;;  %v355_v12 = vld [vmem:[#allocation3 + $0x8a0] sm:$0xff] }
  0x98   :  { %767 = vmatpush1.msra.mxu0 %v337_v13  ;;  %724 = vmatmul.mubr.f32.vlgmr.msra.gmra.mxu1 %v2247_v6  ;;  %v92_v13 = vld [vmem:[#allocation3 + $0x68] sm:$0xff] }
  0x99   :  { %800 = vmatprep.mubr.f32.mxu0 %v2181_v0  ;;  %813 = vmatprep.subr.mxu0 %v204_v14  ;;  %v348_v14 = vld [vmem:[#allocation3 + $0x868] sm:$0xff] }
  0x9a   :  { %890 = vmatprep.subr.mxu1 %v460_v15  ;;  %801 = vmatmul.mubr.f32.vlgmr.msra.gmra.mxu0 %v2236_v3  ;;  %v347_v15 = vld [vmem:[#allocation3 + $0x860] sm:$0xff] }
  0x9b   :  { %891 = vmatpush1.msra.mxu1 %v459_v16  ;;  %814 = vmatpush1.msra.mxu0 %v203_v17  ;;  %v91_v16 = vld [vmem:[#allocation3 + $0x60] sm:$0xff]  ;;  %v340_v17 = vld [vmem:[#allocation3 + $0x828] sm:$0xff] }
  0x9c   :  { %892 = vmatprep.subr.mxu1 %v452_v18  ;;  %815 = vmatprep.subr.mxu0 %v196_v19  ;;  %v84_v18 = vld [vmem:[#allocation3 + $0x28] sm:$0xff]  ;;  %v339_v19 = vld [vmem:[#allocation3 + $0x820] sm:$0xff] }
  0x9d   :  { %893 = vmatpush1.msra.mxu1 %v451_v20  ;;  %816 = vmatpush1.msra.mxu0 %v195_v21  ;;  %v83_v20 = vld [vmem:[#allocation3 + $0x20] sm:$0xff]  ;;  %v332_v21 = vld [vmem:[#allocation3 + $0x7e8] sm:$0xff] }
  0x9e   :  { %894 = vmatprep.subr.mxu1 %v444_v22  ;;  %817 = vmatprep.subr.mxu0 %v188_v23  ;;  %v206_v22 = vld [vmem:[#allocation3 + $0x3f8] sm:$0xff]  ;;  %v331_v23 = vld [vmem:[#allocation3 + $0x7e0] sm:$0xff] }
  0x9f   :  { %895 = vmatpush1.msra.mxu1 %v443_v24  ;;  %818 = vmatpush1.msra.mxu0 %v187_v25  ;;  %v205_v24 = vld [vmem:[#allocation3 + $0x3f0] sm:$0xff]  ;;  %v324_v25 = vld [vmem:[#allocation3 + $0x7a8] sm:$0xff] }
  0xa0   :  { %896 = vmatprep.subr.mxu1 %v436_v26  ;;  %819 = vmatprep.subr.mxu0 %v180_v27  ;;  %v198_v26 = vld [vmem:[#allocation3 + $0x3b8] sm:$0xff]  ;;  %v323_v27 = vld [vmem:[#allocation3 + $0x7a0] sm:$0xff] }
  0xa1   :  { %897 = vmatpush1.msra.mxu1 %v435_v28  ;;  %820 = vmatpush1.msra.mxu0 %v179_v29  ;;  %v197_v28 = vld [vmem:[#allocation3 + $0x3b0] sm:$0xff]  ;;  %v316_v29 = vld [vmem:[#allocation3 + $0x768] sm:$0xff] }
  0xa2   :  { %898 = vmatprep.subr.mxu1 %v428_v30  ;;  %821 = vmatprep.subr.mxu0 %v172_v31  ;;  %v190_v30 = vld [vmem:[#allocation3 + $0x378] sm:$0xff]  ;;  %v315_v31 = vld [vmem:[#allocation3 + $0x760] sm:$0xff] }
  0xa3   :  { %899 = vmatpush1.msra.mxu1 %v427_v32  ;;  %822 = vmatpush1.msra.mxu0 %v171_v33  ;;  %v189_v32 = vld [vmem:[#allocation3 + $0x370] sm:$0xff]  ;;  %v308_v33 = vld [vmem:[#allocation3 + $0x728] sm:$0xff] }
  0xa4   :  { %900 = vmatprep.subr.mxu1 %v420_v34  ;;  %823 = vmatprep.subr.mxu0 %v164_v35  ;;  %v182_v34 = vld [vmem:[#allocation3 + $0x338] sm:$0xff]  ;;  %v307_v35 = vld [vmem:[#allocation3 + $0x720] sm:$0xff] }
  0xa5   :  { %901 = vmatpush1.msra.mxu1 %v419_v36  ;;  %824 = vmatpush1.msra.mxu0 %v163_v37  ;;  %v300_v36 = vld [vmem:[#allocation3 + $0x6e8] sm:$0xff]  ;;  %v174_v37 = vld [vmem:[#allocation3 + $0x2f8] sm:$0xff] }
  0xa6   :  { %902 = vmatprep.subr.mxu1 %v412_v38  ;;  %825 = vmatprep.subr.mxu0 %v156_v39  ;;  %v299_v38 = vld [vmem:[#allocation3 + $0x6e0] sm:$0xff]  ;;  %v173_v39 = vld [vmem:[#allocation3 + $0x2f0] sm:$0xff] }
  0xa7   :  { %903 = vmatpush1.msra.mxu1 %v411_v40  ;;  %826 = vmatpush1.msra.mxu0 %v155_v41  ;;  %v292_v40 = vld [vmem:[#allocation3 + $0x6a8] sm:$0xff]  ;;  %v166_v41 = vld [vmem:[#allocation3 + $0x2b8] sm:$0xff] }
  0xa8   :  { %904 = vmatprep.subr.mxu1 %v404_v42  ;;  %827 = vmatprep.subr.mxu0 %v148_v43  ;;  %v291_v42 = vld [vmem:[#allocation3 + $0x6a0] sm:$0xff]  ;;  %v165_v43 = vld [vmem:[#allocation3 + $0x2b0] sm:$0xff] }
  0xa9   :  { %905 = vmatpush1.msra.mxu1 %v403_v44  ;;  %828 = vmatpush1.msra.mxu0 %v147_v45  ;;  %v284_v44 = vld [vmem:[#allocation3 + $0x668] sm:$0xff]  ;;  %v158_v45 = vld [vmem:[#allocation3 + $0x278] sm:$0xff] }
  0xaa   :  { %906 = vmatprep.subr.mxu1 %v396_v46  ;;  %829 = vmatprep.subr.mxu0 %v140_v47  ;;  %v283_v46 = vld [vmem:[#allocation3 + $0x660] sm:$0xff]  ;;  %v157_v47 = vld [vmem:[#allocation3 + $0x270] sm:$0xff] }
  0xab   :  { %907 = vmatpush1.msra.mxu1 %v395_v48  ;;  %830 = vmatpush1.msra.mxu0 %v139_v49  ;;  %v276_v48 = vld [vmem:[#allocation3 + $0x628] sm:$0xff]  ;;  %v150_v49 = vld [vmem:[#allocation3 + $0x238] sm:$0xff] }
  0xac   :  { %908 = vmatprep.subr.mxu1 %v388_v50  ;;  %831 = vmatprep.subr.mxu0 %v132_v51  ;;  %v275_v50 = vld [vmem:[#allocation3 + $0x620] sm:$0xff]  ;;  %v149_v51 = vld [vmem:[#allocation3 + $0x230] sm:$0xff] }
  0xad   :  { %909 = vmatpush1.msra.mxu1 %v387_v52  ;;  %832 = vmatpush1.msra.mxu0 %v131_v53  ;;  %v268_v52 = vld [vmem:[#allocation3 + $0x5e8] sm:$0xff]  ;;  %v142_v53 = vld [vmem:[#allocation3 + $0x1f8] sm:$0xff] }
  0xae   :  { %910 = vmatprep.subr.mxu1 %v380_v54  ;;  %833 = vmatprep.subr.mxu0 %v124_v56  ;;  %v267_v54 = vld [vmem:[#allocation3 + $0x5e0] sm:$0xff]  ;;  %v141_v56 = vld [vmem:[#allocation3 + $0x1f0] sm:$0xff] }
  0xaf   :  { %911 = vmatpush1.msra.mxu1 %v379_v57  ;;  %834 = vmatpush1.msra.mxu0 %v123_v59  ;;  %v260_v57 = vld [vmem:[#allocation3 + $0x5a8] sm:$0xff]  ;;  %v134_v59 = vld [vmem:[#allocation3 + $0x1b8] sm:$0xff] }
  0xb0   :  { %912 = vmatprep.subr.mxu1 %v372_v60  ;;  %835 = vmatprep.subr.mxu0 %v116_v61  ;;  %v259_v60 = vld [vmem:[#allocation3 + $0x5a0] sm:$0xff]  ;;  %v133_v61 = vld [vmem:[#allocation3 + $0x1b0] sm:$0xff] }
  0xb1   :  { %913 = vmatpush1.msra.mxu1 %v371_v62  ;;  %836 = vmatpush1.msra.mxu0 %v115_v1  ;;  %v252_v62 = vld [vmem:[#allocation3 + $0x568] sm:$0xff]  ;;  %v126_v1 = vld [vmem:[#allocation3 + $0x178] sm:$0xff] }
  0xb2   :  { %914 = vmatprep.subr.mxu1 %v364_v2  ;;  %837 = vmatprep.subr.mxu0 %v108_v5  ;;  %v251_v2 = vld [vmem:[#allocation3 + $0x560] sm:$0xff]  ;;  %v125_v5 = vld [vmem:[#allocation3 + $0x170] sm:$0xff] }
  0xb3   :  { %915 = vmatpush1.msra.mxu1 %v363_v7  ;;  %838 = vmatpush1.msra.mxu0 %v107_v8  ;;  %v244_v7 = vld [vmem:[#allocation3 + $0x528] sm:$0xff]  ;;  %v118_v8 = vld [vmem:[#allocation3 + $0x138] sm:$0xff] }
  0xb4   :  { %729 = vmatprep.mubr.f32.mxu1 %v2254_v55  ;;  %839 = vmatprep.subr.mxu0 %v100_v9  ;;  %v243_v9 = vld [vmem:[#allocation3 + $0x520] sm:$0xff] }
  0xb5   :  { %916 = vmatprep.subr.mxu1 %v356_v10  ;;  %730 = vmatmul.mubr.f32.gmra.mxu1 %v2259_v58  ;;  %v117_v10 = vld [vmem:[#allocation3 + $0x130] sm:$0xff] }
  0xb6   :  { %840 = vmatpush1.msra.mxu0 %v99_v11  ;;  %917 = vmatpush1.msra.mxu1 %v355_v12  ;;  %v236_v11 = vld [vmem:[#allocation3 + $0x4e8] sm:$0xff]  ;;  %v110_v12 = vld [vmem:[#allocation3 + $0xf8] sm:$0xff] }
  0xb7   :  { %806 = vmatprep.mubr.f32.mxu0 %v2181_v0  ;;  %841 = vmatprep.subr.mxu0 %v92_v13  ;;  %v235_v13 = vld [vmem:[#allocation3 + $0x4e0] sm:$0xff] }
  0xb8   :  { %918 = vmatprep.subr.mxu1 %v348_v14  ;;  %807 = vmatmul.mubr.f32.gmra.mxu0 %v2266_v63  ;;  %v109_v14 = vld [vmem:[#allocation3 + $0xf0] sm:$0xff] }
  0xb9   :  { %919 = vmatpush1.msra.mxu1 %v347_v15  ;;  %842 = vmatpush1.msra.mxu0 %v91_v16  ;;  %v228_v15 = vld [vmem:[#allocation3 + $0x4a8] sm:$0xff]  ;;  %v102_v16 = vld [vmem:[#allocation3 + $0xb8] sm:$0xff] }
  0xba   :  { %920 = vmatprep.subr.mxu1 %v340_v17  ;;  %843 = vmatprep.subr.mxu0 %v84_v18  ;;  %v227_v17 = vld [vmem:[#allocation3 + $0x4a0] sm:$0xff]  ;;  %v101_v18 = vld [vmem:[#allocation3 + $0xb0] sm:$0xff] }
  0xbb   :  { %921 = vmatpush1.msra.mxu1 %v339_v19  ;;  %844 = vmatpush1.msra.mxu0 %v83_v20  ;;  %v220_v19 = vld [vmem:[#allocation3 + $0x468] sm:$0xff]  ;;  %v94_v20 = vld [vmem:[#allocation3 + $0x78] sm:$0xff] }
  0xbc   :  { %954 = vmatprep.mubr.f32.mxu1 %v2181_v0  ;;  %845 = vmatprep.subr.mxu0 %v332_v21  ;;  %v219_v21 = vld [vmem:[#allocation3 + $0x460] sm:$0xff] }
  0xbd   :  { %955 = vmatmul.mubr.f32.vlgmr.msra.gmra.mxu1 %v2236_v3  ;;  %967 = vmatprep.subr.mxu1 %v206_v22  ;;  %v181_v3 = vld [vmem:[#allocation3 + $0x330] sm:$0xff] }
  0xbe   :  { %846 = vmatpush2.msra.mxu0 %v331_v23  ;;  %968 = vmatpush1.msra.mxu1 %v205_v24  ;;  %v93_v22 = vld [vmem:[#allocation3 + $0x70] sm:$0xff]  ;;  %v212_v23 = vld [vmem:[#allocation3 + $0x428] sm:$0xff]  ;;  %v86_v24 = vld [vmem:[#allocation3 + $0x38] sm:$0xff] }
  0xbf   :  { %847 = vmatprep.subr.mxu0 %v324_v25  ;;  %969 = vmatprep.subr.mxu1 %v198_v26  ;;  %v211_v25 = vld [vmem:[#allocation3 + $0x420] sm:$0xff]  ;;  %v85_v26 = vld [vmem:[#allocation3 + $0x30] sm:$0xff] }
  0xc0   :  { %848 = vmatpush2.msra.mxu0 %v323_v27  ;;  %970 = vmatpush1.msra.mxu1 %v197_v28  ;;  %v334_v27 = vld [vmem:[#allocation3 + $0x7f8] sm:$0xff] }
  0xc1   :  { %849 = vmatprep.subr.mxu0 %v316_v29  ;;  %971 = vmatprep.subr.mxu1 %v190_v30  ;;  %v462_v28 = vld [vmem:[#allocation3 + $0xbf8] sm:$0xff]  ;;  %v333_v29 = vld [vmem:[#allocation3 + $0x7f0] sm:$0xff] }
  0xc2   :  { %850 = vmatpush2.msra.mxu0 %v315_v31  ;;  %972 = vmatpush1.msra.mxu1 %v189_v32  ;;  %v461_v30 = vld [vmem:[#allocation3 + $0xbf0] sm:$0xff]  ;;  %v326_v31 = vld [vmem:[#allocation3 + $0x7b8] sm:$0xff] }
  0xc3   :  { %851 = vmatprep.subr.mxu0 %v308_v33  ;;  %973 = vmatprep.subr.mxu1 %v182_v34  ;;  %v454_v32 = vld [vmem:[#allocation3 + $0xbb8] sm:$0xff]  ;;  %v325_v33 = vld [vmem:[#allocation3 + $0x7b0] sm:$0xff] }
  0xc4   :  { %852 = vmatpush2.msra.mxu0 %v307_v35  ;;  %974 = vmatpush1.msra.mxu1 %v181_v3  ;;  %v453_v34 = vld [vmem:[#allocation3 + $0xbb0] sm:$0xff]  ;;  %v318_v35 = vld [vmem:[#allocation3 + $0x778] sm:$0xff] }
  0xc5   :  { %853 = vmatprep.subr.mxu0 %v300_v36  ;;  %975 = vmatprep.subr.mxu1 %v174_v37  ;;  %v446_v3 = vld [vmem:[#allocation3 + $0xb78] sm:$0xff]  ;;  %v317_v36 = vld [vmem:[#allocation3 + $0x770] sm:$0xff] }
  0xc6   :  { %854 = vmatpush2.msra.mxu0 %v299_v38  ;;  %976 = vmatpush1.msra.mxu1 %v173_v39  ;;  %v445_v37 = vld [vmem:[#allocation3 + $0xb70] sm:$0xff]  ;;  %v438_v38 = vld [vmem:[#allocation3 + $0xb38] sm:$0xff] }
  0xc7   :  { %855 = vmatprep.subr.mxu0 %v292_v40  ;;  %977 = vmatprep.subr.mxu1 %v166_v41  ;;  %v309_v39 = vld [vmem:[#allocation3 + $0x730] sm:$0xff]  ;;  %v302_v40 = vld [vmem:[#allocation3 + $0x6f8] sm:$0xff] }
  0xc8   :  { %856 = vmatpush2.msra.mxu0 %v291_v42  ;;  %978 = vmatpush1.msra.mxu1 %v165_v43  ;;  %v430_v41 = vld [vmem:[#allocation3 + $0xaf8] sm:$0xff]  ;;  %v301_v42 = vld [vmem:[#allocation3 + $0x6f0] sm:$0xff] }
  0xc9   :  { %857 = vmatprep.subr.mxu0 %v284_v44  ;;  %979 = vmatprep.subr.mxu1 %v158_v45  ;;  %v429_v43 = vld [vmem:[#allocation3 + $0xaf0] sm:$0xff]  ;;  %v294_v44 = vld [vmem:[#allocation3 + $0x6b8] sm:$0xff] }
  0xca   :  { %858 = vmatpush2.msra.mxu0 %v283_v46  ;;  %980 = vmatpush1.msra.mxu1 %v157_v47  ;;  %v422_v45 = vld [vmem:[#allocation3 + $0xab8] sm:$0xff]  ;;  %v293_v46 = vld [vmem:[#allocation3 + $0x6b0] sm:$0xff] }
  0xcb   :  { %859 = vmatprep.subr.mxu0 %v276_v48  ;;  %981 = vmatprep.subr.mxu1 %v150_v49  ;;  %v421_v47 = vld [vmem:[#allocation3 + $0xab0] sm:$0xff]  ;;  %v286_v48 = vld [vmem:[#allocation3 + $0x678] sm:$0xff] }
  0xcc   :  { %860 = vmatpush2.msra.mxu0 %v275_v50  ;;  %982 = vmatpush1.msra.mxu1 %v149_v51  ;;  %v414_v49 = vld [vmem:[#allocation3 + $0xa78] sm:$0xff]  ;;  %v285_v50 = vld [vmem:[#allocation3 + $0x670] sm:$0xff] }
  0xcd   :  { %861 = vmatprep.subr.mxu0 %v268_v52  ;;  %983 = vmatprep.subr.mxu1 %v142_v53  ;;  %v413_v51 = vld [vmem:[#allocation3 + $0xa70] sm:$0xff]  ;;  %v278_v52 = vld [vmem:[#allocation3 + $0x638] sm:$0xff] }
  0xce   :  { %862 = vmatpush2.msra.mxu0 %v267_v54  ;;  %984 = vmatpush1.msra.mxu1 %v141_v56  ;;  %v406_v53 = vld [vmem:[#allocation3 + $0xa38] sm:$0xff]  ;;  %v277_v54 = vld [vmem:[#allocation3 + $0x630] sm:$0xff] }
  0xcf   :  { %863 = vmatprep.subr.mxu0 %v260_v57  ;;  %985 = vmatprep.subr.mxu1 %v134_v59  ;;  %v405_v56 = vld [vmem:[#allocation3 + $0xa30] sm:$0xff]  ;;  %v270_v57 = vld [vmem:[#allocation3 + $0x5f8] sm:$0xff] }
  0xd0   :  { %864 = vmatpush2.msra.mxu0 %v259_v60  ;;  %986 = vmatpush1.msra.mxu1 %v133_v61  ;;  %v398_v59 = vld [vmem:[#allocation3 + $0x9f8] sm:$0xff]  ;;  %v269_v60 = vld [vmem:[#allocation3 + $0x5f0] sm:$0xff] }
  0xd1   :  { %865 = vmatprep.subr.mxu0 %v252_v62  ;;  %987 = vmatprep.subr.mxu1 %v126_v1  ;;  %v397_v61 = vld [vmem:[#allocation3 + $0x9f0] sm:$0xff]  ;;  %v262_v62 = vld [vmem:[#allocation3 + $0x5b8] sm:$0xff] }
  0xd2   :  { %866 = vmatpush2.msra.mxu0 %v251_v2  ;;  %988 = vmatpush1.msra.mxu1 %v125_v5  ;;  %v390_v1 = vld [vmem:[#allocation3 + $0x9b8] sm:$0xff]  ;;  %v261_v2 = vld [vmem:[#allocation3 + $0x5b0] sm:$0xff] }
  0xd3   :  { %867 = vmatprep.subr.mxu0 %v244_v7  ;;  %989 = vmatprep.subr.mxu1 %v118_v8  ;;  %v389_v5 = vld [vmem:[#allocation3 + $0x9b0] sm:$0xff]  ;;  %v254_v7 = vld [vmem:[#allocation3 + $0x578] sm:$0xff] }
  0xd4   :  { %868 = vmatpush2.msra.mxu0 %v243_v9  ;;  %990 = vmatpush1.msra.mxu1 %v117_v10  ;;  %v382_v8 = vld [vmem:[#allocation3 + $0x978] sm:$0xff]  ;;  %v253_v9 = vld [vmem:[#allocation3 + $0x570] sm:$0xff] }
  0xd5   :  { %869 = vmatprep.subr.mxu0 %v236_v11  ;;  %991 = vmatprep.subr.mxu1 %v110_v12  ;;  %v381_v10 = vld [vmem:[#allocation3 + $0x970] sm:$0xff]  ;;  %v246_v11 = vld [vmem:[#allocation3 + $0x538] sm:$0xff] }
  0xd6   :  { %870 = vmatpush2.msra.mxu0 %v235_v13  ;;  %992 = vmatpush1.msra.mxu1 %v109_v14  ;;  %v374_v12 = vld [vmem:[#allocation3 + $0x938] sm:$0xff]  ;;  %v245_v13 = vld [vmem:[#allocation3 + $0x530] sm:$0xff] }
  0xd7   :  { %871 = vmatprep.subr.mxu0 %v228_v15  ;;  %993 = vmatprep.subr.mxu1 %v102_v16  ;;  %v373_v14 = vld [vmem:[#allocation3 + $0x930] sm:$0xff]  ;;  %v238_v15 = vld [vmem:[#allocation3 + $0x4f8] sm:$0xff] }
  0xd8   :  { %872 = vmatpush2.msra.mxu0 %v227_v17  ;;  %994 = vmatpush1.msra.mxu1 %v101_v18  ;;  %v366_v16 = vld [vmem:[#allocation3 + $0x8f8] sm:$0xff]  ;;  %v237_v17 = vld [vmem:[#allocation3 + $0x4f0] sm:$0xff] }
  0xd9   :  { %873 = vmatprep.subr.mxu0 %v220_v19  ;;  %995 = vmatprep.subr.mxu1 %v94_v20  ;;  %v365_v18 = vld [vmem:[#allocation3 + $0x8f0] sm:$0xff]  ;;  %v230_v19 = vld [vmem:[#allocation3 + $0x4b8] sm:$0xff] }
  0xda   :  { %874 = vmatpush2.msra.mxu0 %v219_v21  ;;  %996 = vmatpush1.msra.mxu1 %v93_v22  ;;  %v358_v20 = vld [vmem:[#allocation3 + $0x8b8] sm:$0xff]  ;;  %v229_v21 = vld [vmem:[#allocation3 + $0x4b0] sm:$0xff] }
  0xdb   :  { %875 = vmatprep.subr.mxu0 %v212_v23  ;;  %997 = vmatprep.subr.mxu1 %v86_v24  ;;  %v357_v22 = vld [vmem:[#allocation3 + $0x8b0] sm:$0xff]  ;;  %v222_v23 = vld [vmem:[#allocation3 + $0x478] sm:$0xff] }
  0xdc   :  { %876 = vmatpush2.msra.mxu0 %v211_v25  ;;  %877 = vmatprep.mubr.f32.mxu0 %v2242_v4  ;;  %v310_v4 = vld [vmem:[#allocation3 + $0x738] sm:$0xff]  ;;  %v221_v25 = vld [vmem:[#allocation3 + $0x470] sm:$0xff] }
  0xdd   :  { %998 = vmatpush1.msra.mxu1 %v85_v26  ;;  %878 = vmatmul.mubr.f32.vlgmr.msra.gmra.mxu0 %v2247_v6  ;;  %v437_v6 = vld [vmem:[#allocation3 + $0xb30] sm:$0xff]  ;;  %v350_v24 = vld [vmem:[#allocation3 + $0x878] sm:$0xff] }
  0xde   :  { %999 = vmatprep.subr.mxu1 %v334_v27  ;;  %1044 = vmatprep.subr.mxu0 %v462_v28  ;;  %v349_v26 = vld [vmem:[#allocation3 + $0x870] sm:$0xff]  ;;  %v214_v27 = vld [vmem:[#allocation3 + $0x438] sm:$0xff] }
  0xdf   :  { %1000 = vmatpush2.msra.mxu1 %v333_v29  ;;  %1045 = vmatpush1.msra.mxu0 %v461_v30  ;;  %v342_v28 = vld [vmem:[#allocation3 + $0x838] sm:$0xff]  ;;  %v213_v29 = vld [vmem:[#allocation3 + $0x430] sm:$0xff] }
  0xe0   :  { %1001 = vmatprep.subr.mxu1 %v326_v31  ;;  %1046 = vmatprep.subr.mxu0 %v454_v32  ;;  %v341_v30 = vld [vmem:[#allocation3 + $0x830] sm:$0xff]  ;;  %v1980_v31 = vld [vmem:[%s2426_s0 + $0x8] sm:$0xff]  ;;  %v1981_v32 = vld [vmem:[%s2426_s0] sm:$0xff] }
  0xe1   :  { %1002 = vmatpush2.msra.mxu1 %v325_v33  ;;  %1047 = vmatpush1.msra.mxu0 %v453_v34  ;;  %v1982_v33 = vld [vmem:[%s2426_s0 + $0x10] sm:$0xff]  ;;  %v465_v34 = vlaneseq  ;;  %s2336_s0 = smov 0  }
  0xe2   :  { %1003 = vmatprep.subr.mxu1 %v318_v35  ;;  %1048 = vmatprep.subr.mxu0 %v446_v3 }
  0xe3   :  { %1004 = vmatpush2.msra.mxu1 %v317_v36  ;;  %1049 = vmatpush1.msra.mxu0 %v445_v37  ;;  %v2300_v35 = vshrl.u32 %v465_v34, 7  ;;  %v2303_v36 = vld [vmem:[#allocation8] sm:$0xff] }
  0xe4   :  { %1005 = vmatprep.subr.mxu1 %v310_v4  ;;  %1050 = vmatprep.subr.mxu0 %v438_v38 }
  0xe5   :  { %1006 = vmatpush2.msra.mxu1 %v309_v39  ;;  %1051 = vmatpush1.msra.mxu0 %v437_v6  ;;  %v467_v3 = vsub.s32 0, %v2300_v35  ;;  %v471_v37 = vsub.s32 1, %v2300_v35 }
  0xe6   :  { %1007 = vmatprep.subr.mxu1 %v302_v40  ;;  %1052 = vmatprep.subr.mxu0 %v430_v41 }
  0xe7   :  { %1008 = vmatpush2.msra.mxu1 %v301_v42  ;;  %1053 = vmatpush1.msra.mxu0 %v429_v43  ;;  %v468_v4 = vrot.slane %v2303_v36, %v467_v3  ;;  %v472_v38 = vrot.slane %v2303_v36, %v471_v37 }
  0xe8   :  { %1009 = vmatprep.subr.mxu1 %v294_v44  ;;  %1054 = vmatprep.subr.mxu0 %v422_v45  ;;  %v475_v45 = vsub.s32 2, %v2300_v35 }
  0xe9   :  { %1010 = vmatpush2.msra.mxu1 %v293_v46  ;;  %1055 = vmatpush1.msra.mxu0 %v421_v47 }
  0xea   :  { %1011 = vmatprep.subr.mxu1 %v286_v48  ;;  %1056 = vmatprep.subr.mxu0 %v414_v49  ;;  %v479_v49 = vsub.s32 3, %v2300_v35 }
  0xeb   :  { %1012 = vmatpush2.msra.mxu1 %v285_v50  ;;  %1057 = vmatpush1.msra.mxu0 %v413_v51 }
  0xec   :  { %1013 = vmatprep.subr.mxu1 %v278_v52  ;;  %1058 = vmatprep.subr.mxu0 %v406_v53  ;;  %v476_v52 = vrot.slane %v2303_v36, %v475_v45  ;;  %v480_v53 = vrot.slane %v2303_v36, %v479_v49  ;;  %v2324_v49 = vmov 0.0  }
  0xed   :  { %1014 = vmatpush2.msra.mxu1 %v277_v54  ;;  %1059 = vmatpush1.msra.mxu0 %v405_v56 }
  0xee   :  { %1015 = vmatprep.subr.mxu1 %v270_v57  ;;  %1060 = vmatprep.subr.mxu0 %v398_v59 }
  0xef   :  { %1016 = vmatpush2.msra.mxu1 %v269_v60  ;;  %1061 = vmatpush1.msra.mxu0 %v397_v61 }
  0xf0   :  { %1017 = vmatprep.subr.mxu1 %v262_v62  ;;  %1062 = vmatprep.subr.mxu0 %v390_v1 }
  0xf1   :  { %1018 = vmatpush2.msra.mxu1 %v261_v2  ;;  %1063 = vmatpush1.msra.mxu0 %v389_v5 }
  0xf2   :  { %1019 = vmatprep.subr.mxu1 %v254_v7  ;;  %1064 = vmatprep.subr.mxu0 %v382_v8 }
  0xf3   :  { %1020 = vmatpush2.msra.mxu1 %v253_v9  ;;  %1065 = vmatpush1.msra.mxu0 %v381_v10 }
  0xf4   :  { %1021 = vmatprep.subr.mxu1 %v246_v11  ;;  %1066 = vmatprep.subr.mxu0 %v374_v12 }
  0xf5   :  { %883 = vmatprep.mubr.f32.mxu0 %v2254_v55  ;;  %1022 = vmatpush2.msra.mxu1 %v245_v13  ;;  %v483_v13 = vsub.s32 4, %v2300_v35 }
  0xf6   :  { %1067 = vmatpush1.msra.mxu0 %v373_v14  ;;  %1023 = vmatprep.subr.mxu1 %v238_v15  ;;  %v487_v14 = vsub.s32 5, %v2300_v35 }
  0xf7   :  { %884 = vmatmul.mubr.f32.gmra.mxu0 %v2259_v58  ;;  %1068 = vmatprep.subr.mxu0 %v366_v16  ;;  %v484_v15 = vrot.slane %v2303_v36, %v483_v13 }
  0xf8   :  { %960 = vmatprep.mubr.f32.mxu1 %v2181_v0  ;;  %1024 = vmatpush2.msra.mxu1 %v237_v17  ;;  %v488_v16 = vrot.slane %v2303_v36, %v487_v14 }
  0xf9   :  { %1069 = vmatpush1.msra.mxu0 %v365_v18  ;;  %961 = vmatmul.mubr.f32.gmra.mxu1 %v2266_v63 }
  0xfa   :  { %1025 = vmatprep.subr.mxu1 %v230_v19  ;;  %1070 = vmatprep.subr.mxu0 %v358_v20 }
  0xfb   :  { %1026 = vmatpush2.msra.mxu1 %v229_v21  ;;  %1071 = vmatpush1.msra.mxu0 %v357_v22 }
  0xfc   :  { %1027 = vmatprep.subr.mxu1 %v222_v23  ;;  %1072 = vmatprep.subr.mxu0 %v350_v24 }
  0xfd   :  { %1028 = vmatpush2.msra.mxu1 %v221_v25  ;;  %1073 = vmatpush1.msra.mxu0 %v349_v26 }
  0xfe   :  { %1029 = vmatprep.subr.mxu1 %v214_v27  ;;  %1074 = vmatprep.subr.mxu0 %v342_v28 }
  0xff   :  { %1030 = vmatpush2.msra.mxu1 %v213_v29  ;;  %1031 = vmatprep.mubr.f32.mxu1 %v1980_v31 }
 0x100   :  { %1075 = vmatpush1.msra.mxu0 %v341_v30  ;;  %1108 = vmatprep.mubr.f32.mxu0 %v2181_v0  ;;  %v491_v30 = vsub.s32 6, %v2300_v35 }
 0x101   :  { %1032 = vmatmul.mubr.f32.vlgmr.msra.gmra.mxu1 %v1981_v32  ;;  %1109 = vmatmul.mubr.f32.vlgmr.msra.gmra.mxu0 %v1982_v33  ;;  %v495_v33 = vsub.s32 7, %v2300_v35 }
 0x102   :  { %1037 = vmatprep.mubr.f32.mxu1 %v2254_v55  ;;  %1114 = vmatprep.mubr.f32.mxu0 %v2181_v0  ;;  %v492_v3 = vrot.slane %v2303_v36, %v491_v30 }
 0x103   :  { %v496_v37 = vrot.slane %v2303_v36, %v495_v33  ;;  %v2320_v36 = vmov 0.0  }
 0x105   :  { %1038 = vmatmul.mubr.f32.gmra.mxu1 %v2259_v58  ;;  %1115 = vmatmul.mubr.f32.gmra.mxu0 %v2266_v63 }
 0x115   :  { %v648_v55 = vpop.f32.mrf.mxu1 }
 0x117   :  { %v650_v63 = vpop.f32.mrf.mxu1 }
 0x135   :  { %v571_v39 = vpop.f32.mrf.mxu0 }
 0x136   :  { %v572_v0 = vadd.f32 %v571_v39, %v468_v4 }
 0x137   :  { %v573_v6 = vpop.f32.mrf.mxu0 }
 0x138   :  { %v649_v58 = vadd.f32 %v648_v55, %v572_v0  ;;  %v574_v40 = vadd.f32 %v573_v6, %v472_v38 }
 0x13a   :  { %1121 = vst [vmem:[#allocation2] sm:$0xff] %v649_v58  ;;  %v651_v41 = vadd.f32 %v650_v63, %v574_v40 }
 0x13c   :  { %1122 = vst [vmem:[#allocation2 + $0x8] sm:$0xff] %v651_v41 }
 0x14f   :  { %v577_v42 = vpop.f32.mrf.mxu0 }
 0x150   :  { %v578_v43 = vadd.f32 %v577_v42, %v468_v4 }
 0x151   :  { %v579_v44 = vpop.f32.mrf.mxu0 }
 0x152   :  { %v580_v46 = vadd.f32 %v579_v44, %v472_v38  ;;  %v654_v47 = vpop.f32.mrf.mxu1 }
 0x153   :  { %v655_v48 = vadd.f32 %v654_v47, %v578_v43 }
 0x154   :  { %v656_v50 = vpop.f32.mrf.mxu1 }
 0x155   :  { %1129 = vst [vmem:[#allocation2 + $0x40] sm:$0xff] %v655_v48  ;;  %v657_v51 = vadd.f32 %v656_v50, %v580_v46  ;;  %v2322_v48 = vmov 0.0   ;;  %v2326_v50 = vmov 0.0  }
 0x157   :  { %1130 = vst [vmem:[#allocation2 + $0x48] sm:$0xff] %v657_v51  ;;  %v2328_v51 = vmov 0.0  }
 0x158   :  { %v725_v54 = vpop.f32.mrf.mxu1 }
 0x159   :  { %v726_v56 = vadd.f32 %v725_v54, %v476_v52  ;;  %v2334_v54 = vmov 0.0  }
 0x15a   :  { %v802_v57 = vpop.f32.mrf.mxu0  ;;  %v727_v59 = vpop.f32.mrf.mxu1 }
 0x15b   :  { %v803_v60 = vadd.f32 %v802_v57, %v726_v56  ;;  %v728_v61 = vadd.f32 %v727_v59, %v480_v53 }
 0x15c   :  { %v804_v62 = vpop.f32.mrf.mxu0 }
 0x15d   :  { %1123 = vst [vmem:[#allocation2 + $0x10] sm:$0xff] %v803_v60  ;;  %v805_v1 = vadd.f32 %v804_v62, %v728_v61 }
 0x15f   :  { %1124 = vst [vmem:[#allocation2 + $0x18] sm:$0xff] %v805_v1 }
 0x175   :  { %v731_v2 = vpop.f32.mrf.mxu1 }
 0x176   :  { %v732_v5 = vadd.f32 %v731_v2, %v476_v52  ;;  %v2330_v52 = vmov 0.0  }
 0x177   :  { %v733_v7 = vpop.f32.mrf.mxu1 }
 0x178   :  { %v734_v8 = vadd.f32 %v733_v7, %v480_v53  ;;  %v808_v9 = vpop.f32.mrf.mxu0  ;;  %v2332_v53 = vmov 0.0  }
 0x179   :  { %v809_v10 = vadd.f32 %v808_v9, %v732_v5 }
 0x17a   :  { %v810_v11 = vpop.f32.mrf.mxu0 }
 0x17b   :  { %1131 = vst [vmem:[#allocation2 + $0x50] sm:$0xff] %v809_v10  ;;  %v811_v12 = vadd.f32 %v810_v11, %v734_v8 }
 0x17d   :  { %1132 = vst [vmem:[#allocation2 + $0x58] sm:$0xff] %v811_v12  ;;  %v956_v17 = vpop.f32.mrf.mxu1 }
 0x17f   :  { %v958_v23 = vpop.f32.mrf.mxu1 }
 0x19d   :  { %v879_v18 = vpop.f32.mrf.mxu0 }
 0x19e   :  { %v880_v19 = vadd.f32 %v879_v18, %v484_v15 }
 0x19f   :  { %v881_v20 = vpop.f32.mrf.mxu0 }
 0x1a0   :  { %v957_v21 = vadd.f32 %v956_v17, %v880_v19  ;;  %v882_v22 = vadd.f32 %v881_v20, %v488_v16 }
 0x1a2   :  { %1125 = vst [vmem:[#allocation2 + $0x20] sm:$0xff] %v957_v21  ;;  %v959_v24 = vadd.f32 %v958_v23, %v882_v22 }
 0x1a4   :  { %1126 = vst [vmem:[#allocation2 + $0x28] sm:$0xff] %v959_v24 }
 0x1b7   :  { %v885_v25 = vpop.f32.mrf.mxu0 }
 0x1b8   :  { %v886_v26 = vadd.f32 %v885_v25, %v484_v15 }
 0x1b9   :  { %v887_v27 = vpop.f32.mrf.mxu0  ;;  %v962_v29 = vpop.f32.mrf.mxu1 }
 0x1ba   :  { %v888_v28 = vadd.f32 %v887_v27, %v488_v16  ;;  %v963_v31 = vadd.f32 %v962_v29, %v886_v26 }
 0x1bb   :  { %v964_v32 = vpop.f32.mrf.mxu1 }
 0x1bc   :  { %1133 = vst [vmem:[#allocation2 + $0x60] sm:$0xff] %v963_v31  ;;  %v965_v34 = vadd.f32 %v964_v32, %v888_v28 }
 0x1be   :  { %1134 = vst [vmem:[#allocation2 + $0x68] sm:$0xff] %v965_v34 }
 0x1c1   :  { %v1033_v4 = vpop.f32.mrf.mxu1  ;;  %v1110_v55 = vpop.f32.mrf.mxu0 }
 0x1c2   :  { %v1034_v38 = vadd.f32 %v1033_v4, %v492_v3 }
 0x1c3   :  { %v1035_v39 = vpop.f32.mrf.mxu1  ;;  %v1112_v58 = vpop.f32.mrf.mxu0 }
 0x1c4   :  { %v1111_v0 = vadd.f32 %v1110_v55, %v1034_v38  ;;  %v1036_v6 = vadd.f32 %v1035_v39, %v496_v37 }
 0x1c5   :  { %v1039_v40 = vpop.f32.mrf.mxu1  ;;  %v1116_v42 = vpop.f32.mrf.mxu0 }
 0x1c6   :  { %1127 = vst [vmem:[#allocation2 + $0x30] sm:$0xff] %v1111_v0  ;;  %v1113_v63 = vadd.f32 %v1112_v58, %v1036_v6  ;;  %v1040_v41 = vadd.f32 %v1039_v40, %v492_v3 }
 0x1c7   :  { %v1041_v43 = vpop.f32.mrf.mxu1  ;;  %v1118_v46 = vpop.f32.mrf.mxu0 }
 0x1c8   :  { %1128 = vst [vmem:[#allocation2 + $0x38] sm:$0xff] %v1113_v63  ;;  %v1117_v44 = vadd.f32 %v1116_v42, %v1040_v41  ;;  %v1042_v45 = vadd.f32 %v1041_v43, %v496_v37 }
 0x1ca   :  { %1135 = vst [vmem:[#allocation2 + $0x70] sm:$0xff] %v1117_v44  ;;  %v1119_v47 = vadd.f32 %v1118_v46, %v1042_v45 }
 0x1cc   :  { %1136 = vst [vmem:[#allocation2 + $0x78] sm:$0xff] %v1119_v47 }
 0x1cd LB: > { %v1238_v56 = vld [vmem:[#allocation5 + $0x1e8] sm:$0xff]  ;;  %v1240_v57 = vld [vmem:[#allocation5 + $0x1f8] sm:$0xff]  ;;  %v1237_v59 = vld [vmem:[#allocation5 + $0x1e0] sm:$0xff]  ;;  %v2182_v32 = vmov 1966171168   ;;  %v1243_v46 = vcombine.low %v2167_v54, %v2163_v53  ;;  %s1152_s6 = sshra.s32 %s2171_s0, 3  ;;  %s2171_s0 = sphi %s2336_s0, %s1142_s0   ;;  %v2167_v54 = vphi %v2334_v54, %v1775_v54   ;;  %v2163_v53 = vphi %v2332_v53, %v1776_v53   ;;  %v2159_v52 = vphi %v2330_v52, %v1783_v52   ;;  %v2155_v51 = vphi %v2328_v51, %v1784_v51   ;;  %v2151_v50 = vphi %v2326_v50, %v1755_v50   ;;  %v2147_v49 = vphi %v2324_v49, %v1756_v49   ;;  %v2143_v48 = vphi %v2322_v48, %v1767_v48   ;;  %v2139_v36 = vphi %v2320_v36, %v1768_v36  }
 0x1ce   : > { %1259 = vmatprep.subr.mxu0 %v1238_v56  ;;  %1330 = vmatprep.subr.mxu1 %v1240_v57  ;;  %v1239_v60 = vld [vmem:[#allocation5 + $0x1f0] sm:$0xff]  ;;  %v1234_v61 = vld [vmem:[#allocation5 + $0x1c8] sm:$0xff]  ;;  %v1236_v62 = vld [vmem:[#allocation5 + $0x1d8] sm:$0xff]  ;;  %v1245_v33 = vunpack.c.l.s4 %v2182_v32  ;;  %s1155_s7 = sand.u32 7, %s2171_s0  ;;  %s1892_s8 = sshll.u32 %s1152_s6, 6 }
 0x1cf   : > { %1260 = vmatpush1.msra.mxu0 %v1237_v59  ;;  %1331 = vmatpush1.msra.mxu1 %v1239_v60  ;;  %v1233_v1 = vld [vmem:[#allocation5 + $0x1c0] sm:$0xff]  ;;  %v1235_v2 = vld [vmem:[#allocation5 + $0x1d0] sm:$0xff]  ;;  %v1230_v5 = vld [vmem:[#allocation5 + $0x1a8] sm:$0xff]  ;;  %s1158_s9 = sadd.s32 %s1892_s8, %s1155_s7  ;;  %s2387_s10 = ssub.s32 7, %s2171_s0 }
 0x1d0   : > { %1261 = vmatprep.subr.mxu0 %v1234_v61  ;;  %1332 = vmatprep.subr.mxu1 %v1236_v62  ;;  %v1232_v7 = vld [vmem:[#allocation5 + $0x1b8] sm:$0xff]  ;;  %v1229_v8 = vld [vmem:[#allocation5 + $0x1a0] sm:$0xff]  ;;  %v1231_v9 = vld [vmem:[#allocation5 + $0x1b0] sm:$0xff]  ;;  %v1246_v6 = vunpack.c.0.s8 %v1245_v33  ;;  %s1159_s2 = scalar_lea.vmem [#allocation2], %s1158_s9  ;;  %s1164_s11 = sshra.s32 %s2387_s10, 3 }
 0x1d1   : > { %1262 = vmatpush1.msra.mxu0 %v1233_v1  ;;  %1333 = vmatpush1.msra.mxu1 %v1235_v2  ;;  %v1226_v10 = vld [vmem:[#allocation5 + $0x188] sm:$0xff]  ;;  %v1228_v11 = vld [vmem:[#allocation5 + $0x198] sm:$0xff]  ;;  %v1225_v12 = vld [vmem:[#allocation5 + $0x180] sm:$0xff]  ;;  %s1167_s12 = sand.u32 7, %s2387_s10  ;;  %s1893_s1 = sshll.u32 %s1164_s11, 6 }
 0x1d2   : > { %1263 = vmatprep.subr.mxu0 %v1230_v5  ;;  %1334 = vmatprep.subr.mxu1 %v1232_v7  ;;  %v1227_v13 = vld [vmem:[#allocation5 + $0x190] sm:$0xff]  ;;  %v1222_v14 = vld [vmem:[#allocation5 + $0x168] sm:$0xff]  ;;  %v1224_v15 = vld [vmem:[#allocation5 + $0x178] sm:$0xff]  ;;  %v2368_v47 = vsub.s32 %v1246_v6, %v2300_v35  ;;  %s1831_s13 = sadd.s32 %s1893_s1, %s1167_s12  ;;  %s1895_s3 = sshll.u32 %s2171_s0, 2 }
 0x1d3   : > { %1264 = vmatpush1.msra.mxu0 %v1229_v8  ;;  %1335 = vmatpush1.msra.mxu1 %v1231_v9  ;;  %v1221_v16 = vld [vmem:[#allocation5 + $0x160] sm:$0xff]  ;;  %v1223_v17 = vld [vmem:[#allocation5 + $0x170] sm:$0xff]  ;;  %v1218_v18 = vld [vmem:[#allocation5 + $0x148] sm:$0xff]  ;;  %s1832_s14 = scalar_lea.vmem [#allocation2], %s1831_s13  ;;  %s1798_s16 = scalar_lea.vmem %s2431_s5, %s1895_s3 }
 0x1d4   : > { %1265 = vmatprep.subr.mxu0 %v1226_v10  ;;  %1336 = vmatprep.subr.mxu1 %v1228_v11  ;;  %v1220_v19 = vld [vmem:[#allocation5 + $0x158] sm:$0xff]  ;;  %v1217_v20 = vld [vmem:[#allocation5 + $0x140] sm:$0xff]  ;;  %v1219_v21 = vld [vmem:[#allocation5 + $0x150] sm:$0xff]  ;;  %v1250_v53 = vrot.slane %v1243_v46, %v2368_v47  ;;  %s1896_s17 = sshll.u32 %s2387_s10, 2  ;;  %s1142_s0 = sadd.s32 1, %s2171_s0  }
 0x1d5   : > { %1266 = vmatpush1.msra.mxu0 %v1225_v12  ;;  %1337 = vmatpush1.msra.mxu1 %v1227_v13  ;;  %v1214_v22 = vld [vmem:[#allocation5 + $0x128] sm:$0xff]  ;;  %v1216_v23 = vld [vmem:[#allocation5 + $0x138] sm:$0xff]  ;;  %v1213_v24 = vld [vmem:[#allocation5 + $0x120] sm:$0xff]  ;;  %v2183_v12 = vmov 0.0   ;;  %s1813_s20 = scalar_lea.vmem %s2431_s5, %s1896_s17  ;;  %p1139_p6 = scmp.ge.s32.totalorder %s1142_s0, 8  }
 0x1d6   : > { %1267 = vmatprep.subr.mxu0 %v1222_v14  ;;  %1338 = vmatprep.subr.mxu1 %v1224_v15  ;;  %v1215_v25 = vld [vmem:[#allocation5 + $0x130] sm:$0xff]  ;;  %v1210_v26 = vld [vmem:[#allocation5 + $0x108] sm:$0xff]  ;;  %v1212_v27 = vld [vmem:[#allocation5 + $0x118] sm:$0xff]  ;;  %v1257_v11 = vrot.slane %v1250_v53, %v2368_v47 }
 0x1d7   : > { %1268 = vmatpush1.msra.mxu0 %v1221_v16  ;;  %1339 = vmatpush1.msra.mxu1 %v1223_v17  ;;  %v1209_v28 = vld [vmem:[#allocation5 + $0x100] sm:$0xff]  ;;  %v1211_v29 = vld [vmem:[#allocation5 + $0x110] sm:$0xff]  ;;  %v1206_v30 = vld [vmem:[#allocation5 + $0xe8] sm:$0xff] }
 0x1d8   : > { %1269 = vmatprep.subr.mxu0 %v1218_v18  ;;  %1340 = vmatprep.subr.mxu1 %v1220_v19  ;;  %v1208_v31 = vld [vmem:[#allocation5 + $0xf8] sm:$0xff]  ;;  %v1205_v34 = vld [vmem:[#allocation5 + $0xe0] sm:$0xff]  ;;  %v1207_v3 = vld [vmem:[#allocation5 + $0xf0] sm:$0xff] }
 0x1d9   : > { %1270 = vmatpush1.msra.mxu0 %v1217_v20  ;;  %1341 = vmatpush1.msra.mxu1 %v1219_v21  ;;  %v1202_v37 = vld [vmem:[#allocation5 + $0xc8] sm:$0xff]  ;;  %v1204_v4 = vld [vmem:[#allocation5 + $0xd8] sm:$0xff]  ;;  %v1201_v38 = vld [vmem:[#allocation5 + $0xc0] sm:$0xff] }
 0x1da   : > { %1271 = vmatprep.subr.mxu0 %v1214_v22  ;;  %1342 = vmatprep.subr.mxu1 %v1216_v23  ;;  %v1203_v55 = vld [vmem:[#allocation5 + $0xd0] sm:$0xff]  ;;  %v1198_v39 = vld [vmem:[#allocation5 + $0xa8] sm:$0xff]  ;;  %v1200_v0 = vld [vmem:[#allocation5 + $0xb8] sm:$0xff] }
 0x1db   : > { %1272 = vmatpush1.msra.mxu0 %v1213_v24  ;;  %1343 = vmatpush1.msra.mxu1 %v1215_v25  ;;  %v1197_v58 = vld [vmem:[#allocation5 + $0xa0] sm:$0xff]  ;;  %v1199_v40 = vld [vmem:[#allocation5 + $0xb0] sm:$0xff]  ;;  %v1194_v63 = vld [vmem:[#allocation5 + $0x88] sm:$0xff] }
 0x1dc   : > { %1273 = vmatprep.subr.mxu0 %v1210_v26  ;;  %1344 = vmatprep.subr.mxu1 %v1212_v27  ;;  %v1196_v41 = vld [vmem:[#allocation5 + $0x98] sm:$0xff]  ;;  %v1193_v42 = vld [vmem:[#allocation5 + $0x80] sm:$0xff]  ;;  %v1195_v43 = vld [vmem:[#allocation5 + $0x90] sm:$0xff] }
 0x1dd   : > { %1274 = vmatpush1.msra.mxu0 %v1209_v28  ;;  %1345 = vmatpush1.msra.mxu1 %v1211_v29  ;;  %v1190_v44 = vld [vmem:[#allocation5 + $0x68] sm:$0xff]  ;;  %v1192_v45 = vld [vmem:[#allocation5 + $0x78] sm:$0xff]  ;;  %v1189_v56 = vld [vmem:[#allocation5 + $0x60] sm:$0xff] }
 0x1de   : > { %1275 = vmatprep.subr.mxu0 %v1206_v30  ;;  %1346 = vmatprep.subr.mxu1 %v1208_v31  ;;  %v1191_v57 = vld [vmem:[#allocation5 + $0x70] sm:$0xff]  ;;  %v1186_v59 = vld [vmem:[#allocation5 + $0x48] sm:$0xff]  ;;  %v1188_v60 = vld [vmem:[#allocation5 + $0x58] sm:$0xff] }
 0x1df   : > { %1276 = vmatpush1.msra.mxu0 %v1205_v34  ;;  %1347 = vmatpush1.msra.mxu1 %v1207_v3  ;;  %v1185_v61 = vld [vmem:[#allocation5 + $0x40] sm:$0xff]  ;;  %v1187_v62 = vld [vmem:[#allocation5 + $0x50] sm:$0xff]  ;;  %v1182_v1 = vld [vmem:[#allocation5 + $0x28] sm:$0xff] }
 0x1e0   : > { %1277 = vmatprep.subr.mxu0 %v1202_v37  ;;  %1348 = vmatprep.subr.mxu1 %v1204_v4  ;;  %v1184_v2 = vld [vmem:[#allocation5 + $0x38] sm:$0xff]  ;;  %v1181_v54 = vld [vmem:[#allocation5 + $0x20] sm:$0xff]  ;;  %v1183_v5 = vld [vmem:[#allocation5 + $0x30] sm:$0xff] }
 0x1e1   : > { %1278 = vmatpush1.msra.mxu0 %v1201_v38  ;;  %1349 = vmatpush1.msra.mxu1 %v1203_v55  ;;  %v1178_v7 = vld [vmem:[#allocation5 + $0x8] sm:$0xff]  ;;  %v1180_v8 = vld [vmem:[#allocation5 + $0x18] sm:$0xff]  ;;  %v1177_v9 = vld [vmem:[#allocation5] sm:$0xff] }
 0x1e2   : > { %1279 = vmatprep.subr.mxu0 %v1198_v39  ;;  %1350 = vmatprep.subr.mxu1 %v1200_v0  ;;  %v1179_v10 = vld [vmem:[#allocation5 + $0x10] sm:$0xff]  ;;  %v1502_v13 = vld [vmem:[#allocation7 + $0x1e8] sm:$0xff]  ;;  %v1504_v14 = vld [vmem:[#allocation7 + $0x1f8] sm:$0xff] }
 0x1e3   : > { %1280 = vmatpush1.msra.mxu0 %v1197_v58  ;;  %1351 = vmatpush1.msra.mxu1 %v1199_v40  ;;  %v1501_v15 = vld [vmem:[#allocation7 + $0x1e0] sm:$0xff]  ;;  %v1503_v16 = vld [vmem:[#allocation7 + $0x1f0] sm:$0xff]  ;;  %v1498_v17 = vld [vmem:[#allocation7 + $0x1c8] sm:$0xff] }
 0x1e4   : > { %1281 = vmatprep.subr.mxu0 %v1194_v63  ;;  %1352 = vmatprep.subr.mxu1 %v1196_v41  ;;  %v1500_v18 = vld [vmem:[#allocation7 + $0x1d8] sm:$0xff]  ;;  %v1497_v19 = vld [vmem:[#allocation7 + $0x1c0] sm:$0xff]  ;;  %v1499_v20 = vld [vmem:[#allocation7 + $0x1d0] sm:$0xff] }
 0x1e5   : > { %1282 = vmatpush1.msra.mxu0 %v1193_v42  ;;  %1353 = vmatpush1.msra.mxu1 %v1195_v43  ;;  %v1494_v21 = vld [vmem:[#allocation7 + $0x1a8] sm:$0xff]  ;;  %v1496_v22 = vld [vmem:[#allocation7 + $0x1b8] sm:$0xff]  ;;  %v1493_v23 = vld [vmem:[#allocation7 + $0x1a0] sm:$0xff] }
 0x1e6   : > { %1283 = vmatprep.subr.mxu0 %v1190_v44  ;;  %1354 = vmatprep.subr.mxu1 %v1192_v45  ;;  %v1495_v24 = vld [vmem:[#allocation7 + $0x1b0] sm:$0xff]  ;;  %v1490_v25 = vld [vmem:[#allocation7 + $0x188] sm:$0xff]  ;;  %v1492_v26 = vld [vmem:[#allocation7 + $0x198] sm:$0xff] }
 0x1e7   : > { %1284 = vmatpush1.msra.mxu0 %v1189_v56  ;;  %1355 = vmatpush1.msra.mxu1 %v1191_v57  ;;  %v1489_v27 = vld [vmem:[#allocation7 + $0x180] sm:$0xff]  ;;  %v1491_v28 = vld [vmem:[#allocation7 + $0x190] sm:$0xff]  ;;  %v1486_v29 = vld [vmem:[#allocation7 + $0x168] sm:$0xff] }
 0x1e8   : > { %1285 = vmatprep.subr.mxu0 %v1186_v59  ;;  %1356 = vmatprep.subr.mxu1 %v1188_v60  ;;  %v1488_v30 = vld [vmem:[#allocation7 + $0x178] sm:$0xff]  ;;  %v1485_v31 = vld [vmem:[#allocation7 + $0x160] sm:$0xff]  ;;  %v1487_v32 = vld [vmem:[#allocation7 + $0x170] sm:$0xff] }
 0x1e9   : > { %1286 = vmatpush1.msra.mxu0 %v1185_v61  ;;  %1357 = vmatpush1.msra.mxu1 %v1187_v62  ;;  %v1482_v33 = vld [vmem:[#allocation7 + $0x148] sm:$0xff]  ;;  %v1484_v34 = vld [vmem:[#allocation7 + $0x158] sm:$0xff]  ;;  %v1481_v3 = vld [vmem:[#allocation7 + $0x140] sm:$0xff] }
 0x1ea   : > { %1287 = vmatprep.subr.mxu0 %v1182_v1  ;;  %1358 = vmatprep.subr.mxu1 %v1184_v2  ;;  %v1483_v37 = vld [vmem:[#allocation7 + $0x150] sm:$0xff]  ;;  %v1478_v4 = vld [vmem:[#allocation7 + $0x128] sm:$0xff]  ;;  %v1480_v38 = vld [vmem:[#allocation7 + $0x138] sm:$0xff] }
 0x1eb   : > { %1288 = vmatpush1.msra.mxu0 %v1181_v54  ;;  %1359 = vmatpush1.msra.mxu1 %v1183_v5  ;;  %v1477_v55 = vld [vmem:[#allocation7 + $0x120] sm:$0xff]  ;;  %v1479_v39 = vld [vmem:[#allocation7 + $0x130] sm:$0xff]  ;;  %v1474_v0 = vld [vmem:[#allocation7 + $0x108] sm:$0xff] }
 0x1ec   : > { %1289 = vmatprep.subr.mxu0 %v1178_v7  ;;  %1360 = vmatprep.subr.mxu1 %v1180_v8  ;;  %v1476_v6 = vld [vmem:[#allocation7 + $0x118] sm:$0xff]  ;;  %v1473_v58 = vld [vmem:[#allocation7 + $0x100] sm:$0xff]  ;;  %v1475_v40 = vld [vmem:[#allocation7 + $0x110] sm:$0xff]  ;;  %v1507_v7 = vcombine.low %v2159_v52, %v2155_v51 }
 0x1ed   : > { %1290 = vmatpush1.msra.mxu0 %v1177_v9  ;;  %1323 = vmatprep.mubr.f32.mxu0 %v2183_v12  ;;  %v1470_v63 = vld [vmem:[#allocation7 + $0xe8] sm:$0xff]  ;;  %v1472_v41 = vld [vmem:[#allocation7 + $0xf8] sm:$0xff]  ;;  %v1469_v42 = vld [vmem:[#allocation7 + $0xe0] sm:$0xff] }
 0x1ee   : > { %1361 = vmatpush1.msra.mxu1 %v1179_v10  ;;  %1394 = vmatprep.mubr.f32.mxu1 %v2183_v12  ;;  %v1471_v43 = vld [vmem:[#allocation7 + $0xf0] sm:$0xff]  ;;  %v1466_v44 = vld [vmem:[#allocation7 + $0xc8] sm:$0xff]  ;;  %v1468_v45 = vld [vmem:[#allocation7 + $0xd8] sm:$0xff] }
 0x1ef   : > { %1324 = vmatmul.mubr.f32.vlgmr.msra.gmra.mxu0 %v1257_v11  ;;  %1395 = vmatmul.mubr.f32.vlgmr.msra.gmra.mxu1 %v1257_v11  ;;  %v1465_v46 = vld [vmem:[#allocation7 + $0xc0] sm:$0xff]  ;;  %v1467_v56 = vld [vmem:[#allocation7 + $0xd0] sm:$0xff]  ;;  %v1462_v57 = vld [vmem:[#allocation7 + $0xa8] sm:$0xff] }
 0x1f0   : > { %1523 = vmatprep.subr.mxu0 %v1502_v13  ;;  %1594 = vmatprep.subr.mxu1 %v1504_v14  ;;  %v1464_v59 = vld [vmem:[#allocation7 + $0xb8] sm:$0xff]  ;;  %v1461_v60 = vld [vmem:[#allocation7 + $0xa0] sm:$0xff]  ;;  %v1463_v61 = vld [vmem:[#allocation7 + $0xb0] sm:$0xff] }
 0x1f1   : > { %1524 = vmatpush1.msra.mxu0 %v1501_v15  ;;  %1595 = vmatpush1.msra.mxu1 %v1503_v16  ;;  %v1458_v62 = vld [vmem:[#allocation7 + $0x88] sm:$0xff]  ;;  %v1460_v1 = vld [vmem:[#allocation7 + $0x98] sm:$0xff]  ;;  %v1457_v2 = vld [vmem:[#allocation7 + $0x80] sm:$0xff] }
 0x1f2   : > { %1525 = vmatprep.subr.mxu0 %v1498_v17  ;;  %1596 = vmatprep.subr.mxu1 %v1500_v18  ;;  %v1459_v53 = vld [vmem:[#allocation7 + $0x90] sm:$0xff]  ;;  %v1454_v54 = vld [vmem:[#allocation7 + $0x68] sm:$0xff]  ;;  %v1456_v5 = vld [vmem:[#allocation7 + $0x78] sm:$0xff]  ;;  %v1514_v17 = vrot.slane %v1507_v7, %v2368_v47 }
 0x1f3   : > { %1526 = vmatpush1.msra.mxu0 %v1497_v19  ;;  %1597 = vmatpush1.msra.mxu1 %v1499_v20  ;;  %v1453_v8 = vld [vmem:[#allocation7 + $0x60] sm:$0xff]  ;;  %v1455_v9 = vld [vmem:[#allocation7 + $0x70] sm:$0xff]  ;;  %v1450_v10 = vld [vmem:[#allocation7 + $0x48] sm:$0xff] }
 0x1f4   : > { %1527 = vmatprep.subr.mxu0 %v1494_v21  ;;  %1598 = vmatprep.subr.mxu1 %v1496_v22  ;;  %v1452_v11 = vld [vmem:[#allocation7 + $0x58] sm:$0xff]  ;;  %v1449_v13 = vld [vmem:[#allocation7 + $0x40] sm:$0xff]  ;;  %v1451_v14 = vld [vmem:[#allocation7 + $0x50] sm:$0xff]  ;;  %v1521_v22 = vrot.slane %v1514_v17, %v2368_v47 }
 0x1f5   : > { %1528 = vmatpush1.msra.mxu0 %v1493_v23  ;;  %1599 = vmatpush1.msra.mxu1 %v1495_v24  ;;  %v1446_v15 = vld [vmem:[#allocation7 + $0x28] sm:$0xff]  ;;  %v1448_v16 = vld [vmem:[#allocation7 + $0x38] sm:$0xff]  ;;  %v1445_v51 = vld [vmem:[#allocation7 + $0x20] sm:$0xff] }
 0x1f6   : > { %1529 = vmatprep.subr.mxu0 %v1490_v25  ;;  %1600 = vmatprep.subr.mxu1 %v1492_v26  ;;  %v1447_v52 = vld [vmem:[#allocation7 + $0x30] sm:$0xff]  ;;  %v1442_v18 = vld [vmem:[#allocation7 + $0x8] sm:$0xff]  ;;  %v1444_v19 = vld [vmem:[#allocation7 + $0x18] sm:$0xff] }
 0x1f7   : > { %1530 = vmatpush1.msra.mxu0 %v1489_v27  ;;  %1601 = vmatpush1.msra.mxu1 %v1491_v28  ;;  %v1441_v20 = vld [vmem:[#allocation7] sm:$0xff]  ;;  %v1443_v21 = vld [vmem:[#allocation7 + $0x10] sm:$0xff] }
 0x1f8   : > { %1531 = vmatprep.subr.mxu0 %v1486_v29  ;;  %1602 = vmatprep.subr.mxu1 %v1488_v30 }
 0x1f9   : > { %1532 = vmatpush1.msra.mxu0 %v1485_v31  ;;  %1603 = vmatpush1.msra.mxu1 %v1487_v32 }
 0x1fa   : > { %1533 = vmatprep.subr.mxu0 %v1482_v33  ;;  %1604 = vmatprep.subr.mxu1 %v1484_v34  ;;  %v1875_v33 = vld [vmem:[%s1159_s2 + $0x40] ss:$8 sm:$0xf] }
 0x1fb   : > { %1534 = vmatpush1.msra.mxu0 %v1481_v3  ;;  %1605 = vmatpush1.msra.mxu1 %v1483_v37 }
 0x1fc   : > { %1535 = vmatprep.subr.mxu0 %v1478_v4  ;;  %1606 = vmatprep.subr.mxu1 %v1480_v38 }
 0x1fd   : > { %1536 = vmatpush1.msra.mxu0 %v1477_v55  ;;  %1607 = vmatpush1.msra.mxu1 %v1479_v39 }
 0x1fe   : > { %1537 = vmatprep.subr.mxu0 %v1474_v0  ;;  %1608 = vmatprep.subr.mxu1 %v1476_v6 }
 0x1ff   : > { %1538 = vmatpush1.msra.mxu0 %v1473_v58  ;;  %1609 = vmatpush1.msra.mxu1 %v1475_v40 }
 0x200   : > { %1539 = vmatprep.subr.mxu0 %v1470_v63  ;;  %1610 = vmatprep.subr.mxu1 %v1472_v41 }
 0x201   : > { %1540 = vmatpush1.msra.mxu0 %v1469_v42  ;;  %1611 = vmatpush1.msra.mxu1 %v1471_v43 }
 0x202   : > { %1541 = vmatprep.subr.mxu0 %v1466_v44  ;;  %1612 = vmatprep.subr.mxu1 %v1468_v45 }
 0x203   : > { %1542 = vmatpush1.msra.mxu0 %v1465_v46  ;;  %1613 = vmatpush1.msra.mxu1 %v1467_v56 }
 0x204   : > { %1543 = vmatprep.subr.mxu0 %v1462_v57  ;;  %1614 = vmatprep.subr.mxu1 %v1464_v59 }
 0x205   : > { %1544 = vmatpush1.msra.mxu0 %v1461_v60  ;;  %1615 = vmatpush1.msra.mxu1 %v1463_v61  ;;  %v1878_v61 = vld [vmem:[%s1832_s14 + $0x20] ss:$8 sm:$0xf] }
 0x206   : > { %1545 = vmatprep.subr.mxu0 %v1458_v62  ;;  %1616 = vmatprep.subr.mxu1 %v1460_v1  ;;  %v1881_v62 = vld [vmem:[%s1832_s14 + $0x60] ss:$8 sm:$0xf] }
 0x207   : > { %1546 = vmatpush1.msra.mxu0 %v1457_v2  ;;  %1617 = vmatpush1.msra.mxu1 %v1459_v53 }
 0x208   : > { %1547 = vmatprep.subr.mxu0 %v1454_v54  ;;  %1618 = vmatprep.subr.mxu1 %v1456_v5 }
 0x209   : > { %1548 = vmatpush1.msra.mxu0 %v1453_v8  ;;  %1619 = vmatpush1.msra.mxu1 %v1455_v9 }
 0x20a   : > { %1549 = vmatprep.subr.mxu0 %v1450_v10  ;;  %1620 = vmatprep.subr.mxu1 %v1452_v11 }
 0x20b   : > { %1550 = vmatpush1.msra.mxu0 %v1449_v13  ;;  %1621 = vmatpush1.msra.mxu1 %v1451_v14 }
 0x20c   : > { %1551 = vmatprep.subr.mxu0 %v1446_v15  ;;  %1622 = vmatprep.subr.mxu1 %v1448_v16 }
 0x20d   : > { %1552 = vmatpush1.msra.mxu0 %v1445_v51  ;;  %1623 = vmatpush1.msra.mxu1 %v1447_v52 }
 0x20e   : > { %1553 = vmatprep.subr.mxu0 %v1442_v18  ;;  %1624 = vmatprep.subr.mxu1 %v1444_v19 }
 0x20f   : > { %1554 = vmatpush1.msra.mxu0 %v1441_v20  ;;  %1587 = vmatprep.mubr.f32.mxu0 %v2183_v12 }
 0x210   : > { %1625 = vmatpush1.msra.mxu1 %v1443_v21  ;;  %1658 = vmatprep.mubr.f32.mxu1 %v2183_v12  ;;  %v1160_v12 = vld [vmem:[%s1159_s2] ss:$8 sm:$0xf] }
 0x211   : > { %1588 = vmatmul.mubr.f32.vlgmr.msra.gmra.mxu0 %v1521_v22  ;;  %1659 = vmatmul.mubr.f32.vlgmr.msra.gmra.mxu1 %v1521_v22 }
 0x2af   : > { %v1325_v23 = vpop.f32.mrf.mxu0  ;;  %v1396_v24 = vpop.f32.mrf.mxu1 }
 0x2b1   : > { %v1327_v25 = vpop.f32.mrf.mxu0  ;;  %v1398_v26 = vpop.f32.mrf.mxu1 }
 0x2b2   : > { %v1405_v27 = vcombine.low %v1325_v23, %v1327_v25  ;;  %v1406_v28 = vcombine.low %v1396_v24, %v1398_v26 }
 0x2b4   : > { %v1413_v29 = vrot.slane %v1405_v27, %v2368_v47  ;;  %v1420_v30 = vrot.slane %v1406_v28, %v2368_v47 }
 0x2b6   : > { %v1421_v31 = vcombine.low %v1413_v29, %v1420_v30  ;;  %v1422_v32 = vcombine.high %v1413_v29, %v1420_v30 }
 0x2b8   : > { %v1429_v34 = vrot.slane %v1421_v31, %v2368_v47  ;;  %v1436_v3 = vrot.slane %v1422_v32, %v2368_v47 }
 0x2ba   : > { %v1439_v37 = vadd.f32 %v1429_v34, %v1160_v12  ;;  %v1440_v4 = vadd.f32 %v1875_v33, %v1436_v3 }
 0x2bc   : > { %v1882_v38 = vmul.f32 -1.442695, %v1439_v37  ;;  %v1883_v55 = vmul.f32 -1.442695, %v1440_v4  ;;  %v1731_v58 = vrot.slane %v1439_v37, 3  ;;  %v1732_v63 = vrot.slane %v1440_v4, 3 }
 0x2be   : > { %1983 = vpow2.f32 %v1882_v38 }
 0x2bf   : > { %1985 = vpow2.f32 %v1883_v55 }
 0x2cb   : > { %v1984_v39 = vpop.eup %1983 }
 0x2cc   : > { %v1986_v0 = vpop.eup %1985  ;;  %v1711_v6 = vadd.f32 1.0, %v1984_v39 }
 0x2cd   : > { %v1712_v40 = vadd.f32 1.0, %v1986_v0 }
 0x2ce   : > { %1987 = vrcp.f32 %v1711_v6 }
 0x2cf   : > { %1989 = vrcp.f32 %v1712_v40 }
 0x2d0   : > { %1991 = vtanh.f32 %v1731_v58 }
 0x2d1   : > { %1993 = vtanh.f32 %v1732_v63  ;;  %v1589_v41 = vpop.f32.mrf.mxu0  ;;  %v1660_v42 = vpop.f32.mrf.mxu1 }
 0x2d3   : > { %v1591_v43 = vpop.f32.mrf.mxu0  ;;  %v1662_v44 = vpop.f32.mrf.mxu1 }
 0x2d4   : > { %v1669_v45 = vcombine.low %v1589_v41, %v1591_v43  ;;  %v1670_v46 = vcombine.low %v1660_v42, %v1662_v44 }
 0x2d6   : > { %v1677_v56 = vrot.slane %v1669_v45, %v2368_v47  ;;  %v1684_v57 = vrot.slane %v1670_v46, %v2368_v47 }
 0x2d8   : > { %v1685_v59 = vcombine.low %v1677_v56, %v1684_v57  ;;  %v1686_v60 = vcombine.high %v1677_v56, %v1684_v57 }
 0x2da   : > { %v1693_v1 = vrot.slane %v1685_v59, %v2368_v47  ;;  %v1700_v2 = vrot.slane %v1686_v60, %v2368_v47 }
 0x2db   : > { %v1988_v53 = vpop.eup %1987 }
 0x2dc   : > { %v1990_v54 = vpop.eup %1989  ;;  %v1747_v5 = vrot.slane %v1988_v53, 1  ;;  %v1703_v7 = vadd.f32 %v1878_v61, %v1693_v1  ;;  %v1704_v8 = vadd.f32 %v1881_v62, %v1700_v2  ;;  %v1771_v20 = vrot.slane %v1988_v53, 2 }
 0x2dd   : > { %v1992_v9 = vpop.eup %1991  ;;  %v1748_v10 = vrot.slane %v1990_v54, 1  ;;  %v1772_v24 = vrot.slane %v1990_v54, 2 }
 0x2de   : > { %v1994_v11 = vpop.eup %1993  ;;  %v1751_v13 = vmul.f32 %v2151_v50, %v1747_v5  ;;  %v1753_v14 = vmul.f32 %v1992_v9, %v1988_v53  ;;  %v1884_v15 = vmul.f32 -1.442695, %v1703_v7  ;;  %v1885_v16 = vmul.f32 -1.442695, %v1704_v8 }
 0x2df   : > { %v1752_v17 = vmul.f32 %v2147_v49, %v1748_v10  ;;  %v1754_v51 = vmul.f32 %v1994_v11, %v1990_v54  ;;  %v1739_v19 = vrot.slane %v1703_v7, 3  ;;  %v1740_v23 = vrot.slane %v1704_v8, 3 }
 0x2e0   : > { %v1755_v50 = vadd.f32 %v1753_v14, %v1751_v13   ;;  %1995 = vpow2.f32 %v1884_v15 }
 0x2e1   : > { %v1756_v49 = vadd.f32 %v1754_v51, %v1752_v17   ;;  %1997 = vpow2.f32 %v1885_v16 }
 0x2e2   : > { %1999 = vtanh.f32 %v1755_v50 }
 0x2e3   : > { %2001 = vtanh.f32 %v1756_v49 }
 0x2ed   : > { %v1996_v47 = vpop.eup %1995 }
 0x2ee   : > { %v1998_v52 = vpop.eup %1997  ;;  %v1723_v18 = vadd.f32 1.0, %v1996_v47 }
 0x2ef   : > { %v2000_v21 = vpop.eup %1999  ;;  %v1724_v22 = vadd.f32 1.0, %v1998_v52 }
 0x2f0   : > { %v2002_v25 = vpop.eup %2001  ;;  %2003 = vrcp.f32 %v1723_v18  ;;  %v1775_v54 = vmul.f32 %v2000_v21, %v1771_v20  }
 0x2f1   : > { %2005 = vrcp.f32 %v1724_v22  ;;  %v1776_v53 = vmul.f32 %v2002_v25, %v1772_v24  }
 0x2f2   : > { %2007 = vtanh.f32 %v1739_v19 }
 0x2f3   : > { %2009 = vtanh.f32 %v1740_v23  ;;  %v1787_v26 = vcombine.low %v1775_v54, %v1776_v53 }
 0x2f5   : > { %1888 = vst.sshfl [vmem:[%s1798_s16] sm:$0x11 pattern:$0x75316420] %v1787_v26 }
 0x2fd   : > { %v2004_v27 = vpop.eup %2003 }
 0x2fe   : > { %v2006_v28 = vpop.eup %2005  ;;  %v1759_v29 = vrot.slane %v2004_v27, 1  ;;  %v1779_v37 = vrot.slane %v2004_v27, 2 }
 0x2ff   : > { %v2008_v30 = vpop.eup %2007  ;;  %v1760_v31 = vrot.slane %v2006_v28, 1  ;;  %v1780_v38 = vrot.slane %v2006_v28, 2 }
 0x300   : > { %v2010_v32 = vpop.eup %2009  ;;  %v1763_v12 = vmul.f32 %v2143_v48, %v1759_v29  ;;  %v1765_v33 = vmul.f32 %v2008_v30, %v2004_v27 }
 0x301   : > { %v1764_v34 = vmul.f32 %v2139_v36, %v1760_v31  ;;  %v1766_v3 = vmul.f32 %v2010_v32, %v2006_v28 }
 0x302   : > { %v1767_v48 = vadd.f32 %v1765_v33, %v1763_v12  }
 0x303   : > { %v1768_v36 = vadd.f32 %v1766_v3, %v1764_v34  }
 0x304   : > { %2011 = vtanh.f32 %v1767_v48 }
 0x305   : > { %2013 = vtanh.f32 %v1768_v36 }
 0x311   : > { %v2012_v4 = vpop.eup %2011 }
 0x312   : > { %v2014_v55 = vpop.eup %2013  ;;  %v1783_v52 = vmul.f32 %v2012_v4, %v1779_v37  }
 0x313   : > { %v1784_v51 = vmul.f32 %v2014_v55, %v1780_v38   ;;  %1141 = sbr.rel (!%p1139_p6) target bundleno = 461 (0x1cd), region = 69 }
 0x315   : > { %v1802_v39 = vcombine.low %v1783_v52, %v1784_v51 }
 0x317   : > { %1891 = vst.sshfl [vmem:[%s1813_s20 + $0x2] sm:$0x11 pattern:$0x75316420] %v1802_v39 }
 0x318   :  { %1819 = vsyncpa [#allocation4], 1 }
 0x319   :  { %1820 = vsyncpa [#allocation6], 1 }
 0x31a   :  { %1821 = vsyncpa [#allocation9], 1 }

// kernel: hasanet_forward.3
= control target key start
LH: loop header
LB: loop body
LE: loop exit
PB: predicated region body
PF: predicated region fallthrough
CT: control target
= control target key end

     0   :  { %s5911_s0 = inlined_call_operand.vmem [shape: f32[8,2,256], index: 0, kind: input, shape index: {}]   ;;  %s5912_s1 = inlined_call_operand.vmem [shape: f32[256,128], index: 1, kind: input, shape index: {}]   ;;  %s5913_s2 = inlined_call_operand.vmem [shape: f32[1,128], index: 2, kind: input, shape index: {}]   ;;  %s5914_s3 = inlined_call_operand.vmem [shape: f32[128,384], index: 3, kind: input, shape index: {}]   ;;  %s5915_s4 = inlined_call_operand.vmem [shape: f32[1,384], index: 4, kind: input, shape index: {}]   ;;  %s5916_s5 = inlined_call_operand.vmem [shape: f32[128,128], index: 5, kind: input, shape index: {}]   ;;  %s5917_s6 = inlined_call_operand.vmem [shape: f32[1,128], index: 6, kind: input, shape index: {}]   ;;  %s5918_s7 = inlined_call_operand.vmem [shape: f32[1,128], index: 7, kind: input, shape index: {}]   ;;  %s5919_s8 = inlined_call_operand.vmem [shape: f32[1,128], index: 8, kind: input, shape index: {}]   ;;  %s5920_s9 = inlined_call_operand.vmem [shape: f32[1,128], index: 9, kind: input, shape index: {}]   ;;  %s5921_s10 = inlined_call_operand.<no memory space> [shape: f32[1,1], index: 10, kind: input, shape index: {}]   ;;  %s5922_s11 = inlined_call_operand.hbm [shape: f32[2,1,8], index: 11, kind: output, shape index: {0}]   ;;  %s5923_s12 = inlined_call_operand.vmem [shape: f32[2,1,1], index: 12, kind: output, shape index: {1}]  }
   0x1   :  { %v18_v0 = vstv %s5921_s10 }
   0x2   :  { %19 = vst [vmem:[#allocation2] sm:$0x1] %v18_v0 }
   0x3   :  { %v89_v1 = vld [vmem:[%s5912_s1 + $0xf8] sm:$0xff]  ;;  %v88_v3 = vld [vmem:[%s5912_s1 + $0xf0] sm:$0xff]  ;;  %v4701_v5 = vmov 0.0   ;;  %v87_v6 = vld [vmem:[%s5912_s1 + $0xe8] sm:$0xff]  ;;  %v4702_v7 = vmov 1966171168   ;;  %v112_v9 = vlaneseq }
   0x4   :  { %v73_v2 = vld [vmem:[%s5912_s1 + $0x78] sm:$0xff]  ;;  %4080 = vmatprep.subr.mxu0 %v89_v1  ;;  %v72_v4 = vld [vmem:[%s5912_s1 + $0x70] sm:$0xff]  ;;  %373 = vmatprep.mubr.f32.mxu1 %v4701_v5  ;;  %v110_v8 = vunpack.c.l.s4 %v4702_v7  ;;  %v71_v10 = vld [vmem:[%s5912_s1 + $0x68] sm:$0xff] }
   0x5   :  { %4081 = vmatpush3.msra.mxu0 %v73_v2  ;;  %v86_v11 = vld [vmem:[%s5912_s1 + $0xe0] sm:$0xff]  ;;  %v85_v13 = vld [vmem:[%s5912_s1 + $0xd8] sm:$0xff]  ;;  %v4810_v15 = vshrl.u32 %v112_v9, 7  ;;  %v84_v17 = vld [vmem:[%s5912_s1 + $0xd0] sm:$0xff] }
   0x6   :  { %4082 = vmatprep.subr.mxu0 %v88_v3  ;;  %v70_v12 = vld [vmem:[%s5912_s1 + $0x60] sm:$0xff]  ;;  %v111_v14 = vunpack.c.0.s8 %v110_v8  ;;  %v69_v16 = vld [vmem:[%s5912_s1 + $0x58] sm:$0xff]  ;;  %v68_v18 = vld [vmem:[%s5912_s1 + $0x50] sm:$0xff] }
   0x7   :  { %4083 = vmatpush3.msra.mxu0 %v72_v4  ;;  %v83_v19 = vld [vmem:[%s5912_s1 + $0xc8] sm:$0xff]  ;;  %v82_v21 = vld [vmem:[%s5912_s1 + $0xc0] sm:$0xff]  ;;  %v81_v27 = vld [vmem:[%s5912_s1 + $0xb8] sm:$0xff] }
   0x8   :  { %4084 = vmatprep.subr.mxu0 %v87_v6  ;;  %v67_v20 = vld [vmem:[%s5912_s1 + $0x48] sm:$0xff]  ;;  %v43_v22 = vld [vmem:[%s5911_s0] ss:$2 sm:$0x3]  ;;  %v4834_v23 = vsub.s32 %v111_v14, %v4810_v15  ;;  %v290_v37 = vld [vmem:[%s5914_s3 + $0x170] sm:$0xff] }
   0x9   :  { %4085 = vmatpush3.msra.mxu0 %v71_v10  ;;  %v66_v24 = vld [vmem:[%s5912_s1 + $0x40] sm:$0xff]  ;;  %v4009_v26 = vld [vmem:[%s5911_s0 + $0x8] ss:$2 sm:$0x3]  ;;  %v65_v39 = vld [vmem:[%s5912_s1 + $0x38] sm:$0xff]  ;;  %309 = vmatprep.subr.mxu1 %v290_v37 }
   0xa   :  { %4086 = vmatprep.subr.mxu0 %v86_v11  ;;  %v4008_v25 = vld [vmem:[%s5911_s0 + $0x4] ss:$2 sm:$0x3]  ;;  %v4010_v28 = vld [vmem:[%s5911_s0 + $0xc] ss:$2 sm:$0x3] }
   0xb   :  { %4087 = vmatpush3.msra.mxu0 %v70_v12  ;;  %v4011_v29 = vld [vmem:[%s5911_s0 + $0x10] ss:$2 sm:$0x3]  ;;  %v105_v30 = vcombine.low %v43_v22, %v4008_v25  ;;  %v4012_v31 = vld [vmem:[%s5911_s0 + $0x14] ss:$2 sm:$0x3]  ;;  %v106_v33 = vcombine.low %v4009_v26, %v4010_v28 }
   0xc   :  { %4088 = vmatprep.subr.mxu0 %v85_v13  ;;  %v4013_v32 = vld [vmem:[%s5911_s0 + $0x18] ss:$2 sm:$0x3]  ;;  %v4014_v34 = vld [vmem:[%s5911_s0 + $0x1c] ss:$2 sm:$0x3]  ;;  %v107_v35 = vcombine.low %v4011_v29, %v4012_v31 }
   0xd   :  { %4089 = vmatpush3.msra.mxu0 %v69_v16  ;;  %v115_v36 = vrot.slane %v105_v30, %v4834_v23  ;;  %v289_v38 = vld [vmem:[%s5914_s3 + $0x168] sm:$0xff]  ;;  %v108_v40 = vcombine.low %v4013_v32, %v4014_v34  ;;  %v122_v41 = vrot.slane %v106_v33, %v4834_v23  ;;  %v287_v42 = vld [vmem:[%s5914_s3 + $0x158] sm:$0xff]  ;;  %v286_v43 = vld [vmem:[%s5914_s3 + $0x150] sm:$0xff] }
   0xe   :  { %4090 = vmatprep.subr.mxu0 %v84_v17  ;;  %v80_v44 = vld [vmem:[%s5912_s1 + $0xb0] sm:$0xff]  ;;  %v129_v45 = vrot.slane %v107_v35, %v4834_v23  ;;  %310 = vmatpush1.msra.mxu1 %v289_v38  ;;  %v284_v49 = vld [vmem:[%s5914_s3 + $0x140] sm:$0xff]  ;;  %v79_v50 = vld [vmem:[%s5912_s1 + $0xa8] sm:$0xff] }
   0xf   :  { %4091 = vmatpush3.msra.mxu0 %v68_v18  ;;  %v64_v46 = vld [vmem:[%s5912_s1 + $0x30] sm:$0xff]  ;;  %v136_v47 = vrot.slane %v108_v40, %v4834_v23  ;;  %v138_v48 = vcombine.high %v115_v36, %v122_v41  ;;  %311 = vmatprep.subr.mxu1 %v287_v42  ;;  %v283_v51 = vld [vmem:[%s5914_s3 + $0x138] sm:$0xff]  ;;  %v63_v52 = vld [vmem:[%s5912_s1 + $0x28] sm:$0xff]  ;;  %v137_v60 = vcombine.low %v115_v36, %v122_v41 }
  0x10   :  { %4092 = vmatprep.subr.mxu0 %v83_v19  ;;  %312 = vmatpush1.msra.mxu1 %v286_v43  ;;  %v281_v55 = vld [vmem:[%s5914_s3 + $0x128] sm:$0xff]  ;;  %v78_v56 = vld [vmem:[%s5912_s1 + $0xa0] sm:$0xff]  ;;  %v278_v62 = vld [vmem:[%s5914_s3 + $0x110] sm:$0xff] }
  0x11   :  { %4093 = vmatpush3.msra.mxu0 %v67_v20  ;;  %v140_v53 = vcombine.high %v129_v45, %v136_v47  ;;  %v154_v54 = vrot.slane %v138_v48, %v4834_v23  ;;  %313 = vmatprep.subr.mxu1 %v284_v49  ;;  %v280_v57 = vld [vmem:[%s5914_s3 + $0x120] sm:$0xff]  ;;  %v139_v61 = vcombine.low %v129_v45, %v136_v47  ;;  %v77_v63 = vld [vmem:[%s5912_s1 + $0x98] sm:$0xff]  ;;  %v277_v2 = vld [vmem:[%s5914_s3 + $0x108] sm:$0xff] }
  0x12   :  { %4094 = vmatprep.subr.mxu0 %v82_v21  ;;  %v62_v58 = vld [vmem:[%s5912_s1 + $0x20] sm:$0xff]  ;;  %314 = vmatpush1.msra.mxu1 %v283_v51  ;;  %v61_v0 = vld [vmem:[%s5912_s1 + $0x18] sm:$0xff]  ;;  %v76_v3 = vld [vmem:[%s5912_s1 + $0x90] sm:$0xff]  ;;  %v147_v7 = vrot.slane %v137_v60, %v4834_v23 }
  0x13   :  { %4095 = vmatpush3.msra.mxu0 %v66_v24  ;;  %v168_v59 = vrot.slane %v140_v53, %v4834_v23  ;;  %315 = vmatprep.subr.mxu1 %v281_v55  ;;  %v275_v4 = vld [vmem:[%s5914_s3 + $0xf8] sm:$0xff]  ;;  %v60_v6 = vld [vmem:[%s5912_s1 + $0x10] sm:$0xff]  ;;  %v161_v8 = vrot.slane %v139_v61, %v4834_v23 }
  0x14   :  { %4096 = vmatprep.subr.mxu0 %v81_v27  ;;  %316 = vmatpush1.msra.mxu1 %v280_v57  ;;  %v274_v9 = vld [vmem:[%s5914_s3 + $0xf0] sm:$0xff] }
  0x15   :  { %4097 = vmatpush3.msra.mxu0 %v65_v39  ;;  %v170_v1 = vcombine.low %v154_v54, %v168_v59  ;;  %317 = vmatprep.subr.mxu1 %v278_v62 }
  0x16   :  { %4098 = vmatprep.subr.mxu0 %v80_v44 }
  0x17   :  { %4099 = vmatpush3.msra.mxu0 %v64_v46  ;;  %237 = vmatprep.mubr.f32.mxu0 %v170_v1 }
  0x18   :  { %4100 = vmatprep.subr.mxu0 %v79_v50 }
  0x19   :  { %4101 = vmatpush3.msra.mxu0 %v63_v52 }
  0x1a   :  { %4102 = vmatprep.subr.mxu0 %v78_v56 }
  0x1b   :  { %4103 = vmatpush3.msra.mxu0 %v62_v58 }
  0x1c   :  { %4104 = vmatprep.subr.mxu0 %v77_v63 }
  0x1d   :  { %20 = vsyncpa [#allocation4], 0  ;;  %4105 = vmatpush3.msra.mxu0 %v61_v0  ;;  %v75_v10 = vld [vmem:[%s5912_s1 + $0x88] sm:$0xff]  ;;  %318 = vmatpush1.msra.mxu1 %v277_v2  ;;  %v272_v11 = vld [vmem:[%s5914_s3 + $0xe0] sm:$0xff]  ;;  %v169_v18 = vcombine.low %v147_v7, %v161_v8  ;;  %vm4703_vm0 = vmmov 0   ;;  %v300_v59 = vsub.s32 1, %v4810_v15 }
  0x1e   :  { %4106 = vmatprep.subr.mxu0 %v76_v3  ;;  %v59_v12 = vld [vmem:[%s5912_s1 + $0x8] sm:$0xff]  ;;  %319 = vmatprep.subr.mxu1 %v275_v4  ;;  %v271_v13 = vld [vmem:[%s5914_s3 + $0xd8] sm:$0xff]  ;;  %v74_v14 = vld [vmem:[%s5912_s1 + $0x80] sm:$0xff]  ;;  %v5092_v61 = vsub.s32 0, %v4810_v15  ;;  %v304_v62 = vsub.s32 2, %v4810_v15  ;;  %vm450_vm1 = vcmask 130048  }
  0x1f   :  { %4107 = vmatpush3.msra.mxu0 %v60_v6  ;;  %320 = vmatpush1.msra.mxu1 %v274_v9  ;;  %v269_v16 = vld [vmem:[%s5914_s3 + $0xc8] sm:$0xff]  ;;  %v58_v17 = vld [vmem:[%s5912_s1] sm:$0xff]  ;;  %v291_v20 = vld [vmem:[%s5914_s3 + $0x178] sm:$0xff]  ;;  %s4704_s13 = smov 112   ;;  %vm527_vm2 = vcmask 64512   ;;  %s4705_s14 = smov 96  }
  0x20   :  { %4108 = vmatprep.subr.mxu0 %v75_v10  ;;  %321 = vmatprep.subr.mxu1 %v272_v11  ;;  %v268_v19 = vld [vmem:[%s5914_s3 + $0xc0] sm:$0xff]  ;;  %v266_v21 = vld [vmem:[%s5914_s3 + $0xb0] sm:$0xff]  ;;  %v265_v22 = vld [vmem:[%s5914_s3 + $0xa8] sm:$0xff]  ;;  %s4706_s15 = smov 80   ;;  %s4707_s16 = smov 64   ;;  %vm1797_vm3 = vcmask 261120  }
  0x21   :  { %4109 = vmatpush3.msra.mxu0 %v59_v12  ;;  %322 = vmatpush1.msra.mxu1 %v271_v13  ;;  %v288_v24 = vld [vmem:[%s5914_s3 + $0x160] sm:$0xff]  ;;  %v263_v25 = vld [vmem:[%s5914_s3 + $0x98] sm:$0xff]  ;;  %v262_v26 = vld [vmem:[%s5914_s3 + $0x90] sm:$0xff]  ;;  %s4708_s17 = smov 48   ;;  %s4709_s18 = smov 16   ;;  %vm1799_vm4 = vcmask 392192  }
  0x22   :  { %4110 = vmatprep.subr.mxu0 %v74_v14  ;;  %323 = vmatprep.subr.mxu1 %v269_v16  ;;  %v285_v27 = vld [vmem:[%s5914_s3 + $0x148] sm:$0xff]  ;;  %v260_v28 = vld [vmem:[%s5914_s3 + $0x80] sm:$0xff]  ;;  %v259_v29 = vld [vmem:[%s5914_s3 + $0x78] sm:$0xff]  ;;  %s4710_s19 = smov 32   ;;  %vm1801_vm5 = vcmask 523264   ;;  %vm1803_vm6 = vcmask 654336  }
  0x23   :  { %4111 = vmatpush3.msra.mxu0 %v58_v17  ;;  %324 = vmatpush1.msra.mxu1 %v268_v19  ;;  %v282_v30 = vld [vmem:[%s5914_s3 + $0x130] sm:$0xff]  ;;  %v257_v31 = vld [vmem:[%s5914_s3 + $0x68] sm:$0xff]  ;;  %v279_v32 = vld [vmem:[%s5914_s3 + $0x118] sm:$0xff]  ;;  %vm1805_vm7 = vcmask 785408   ;;  %vm1807_vm8 = vcmask 916480   ;;  %vm2011_vm9 = vcmask 57344  }
  0x24   :  { %238 = vmatmul.mubr.f32.vlgmr.msra.gmra.mxu0 %v169_v18  ;;  %4286 = vmatprep.subr.mxu0 %v4701_v5  ;;  %v276_v33 = vld [vmem:[%s5914_s3 + $0x100] sm:$0xff]  ;;  %v273_v34 = vld [vmem:[%s5914_s3 + $0xe8] sm:$0xff]  ;;  %v270_v35 = vld [vmem:[%s5914_s3 + $0xd0] sm:$0xff]  ;;  %vm2018_vm10 = vcmask 0  }
  0x25   :  { %4287 = vmatpush3.msra.mxu0 %v291_v20  ;;  %325 = vmatprep.subr.mxu1 %v266_v21  ;;  %v267_v36 = vld [vmem:[%s5914_s3 + $0xb8] sm:$0xff]  ;;  %v264_v37 = vld [vmem:[%s5914_s3 + $0xa0] sm:$0xff]  ;;  %v261_v38 = vld [vmem:[%s5914_s3 + $0x88] sm:$0xff] }
  0x26   :  { %4288 = vmatprep.subr.mxu0 %v4701_v5  ;;  %326 = vmatpush1.msra.mxu1 %v265_v22  ;;  %v256_v39 = vld [vmem:[%s5914_s3 + $0x60] sm:$0xff]  ;;  %v258_v40 = vld [vmem:[%s5914_s3 + $0x70] sm:$0xff]  ;;  %v253_v42 = vld [vmem:[%s5914_s3 + $0x48] sm:$0xff] }
  0x27   :  { %4289 = vmatpush3.msra.mxu0 %v288_v24  ;;  %327 = vmatprep.subr.mxu1 %v263_v25  ;;  %v254_v41 = vld [vmem:[%s5914_s3 + $0x50] sm:$0xff]  ;;  %v255_v43 = vld [vmem:[%s5914_s3 + $0x58] sm:$0xff]  ;;  %v252_v46 = vld [vmem:[%s5914_s3 + $0x40] sm:$0xff] }
  0x28   :  { %4290 = vmatprep.subr.mxu0 %v4701_v5  ;;  %328 = vmatpush1.msra.mxu1 %v262_v26  ;;  %v251_v44 = vld [vmem:[%s5914_s3 + $0x38] sm:$0xff]  ;;  %v250_v45 = vld [vmem:[%s5914_s3 + $0x30] sm:$0xff]  ;;  %v248_v47 = vld [vmem:[%s5914_s3 + $0x20] sm:$0xff] }
  0x29   :  { %4291 = vmatpush3.msra.mxu0 %v285_v27  ;;  %329 = vmatprep.subr.mxu1 %v260_v28  ;;  %v247_v48 = vld [vmem:[%s5914_s3 + $0x18] sm:$0xff]  ;;  %v249_v49 = vld [vmem:[%s5914_s3 + $0x28] sm:$0xff]  ;;  %v244_v51 = vld [vmem:[%s5914_s3] sm:$0xff] }
  0x2a   :  { %4292 = vmatprep.subr.mxu0 %v4701_v5  ;;  %330 = vmatpush1.msra.mxu1 %v259_v29  ;;  %v245_v50 = vld [vmem:[%s5914_s3 + $0x8] sm:$0xff]  ;;  %v246_v52 = vld [vmem:[%s5914_s3 + $0x10] sm:$0xff]  ;;  %v4015_v54 = vld [vmem:[%s5913_s2] ss:$0 sm:$0xff] }
  0x2b   :  { %4293 = vmatpush3.msra.mxu0 %v282_v30  ;;  %331 = vmatprep.subr.mxu1 %v257_v31  ;;  %v292_v60 = vld [vmem:[%s5915_s4] sm:$0x7] }
  0x2c   :  { %4294 = vmatprep.subr.mxu0 %v4701_v5  ;;  %332 = vmatpush1.msra.mxu1 %v256_v39  ;;  %v301_v63 = vrot.slane %v292_v60, %v300_v59  ;;  %v297_v2 = vrot.slane %v292_v60, %v5092_v61  ;;  %v305_v6 = vrot.slane %v292_v60, %v304_v62 }
  0x2d   :  { %4295 = vmatpush3.msra.mxu0 %v279_v32  ;;  %333 = vmatprep.subr.mxu1 %v254_v41 }
  0x2e   :  { %4296 = vmatprep.subr.mxu0 %v4701_v5  ;;  %334 = vmatpush1.msra.mxu1 %v253_v42 }
  0x2f   :  { %4297 = vmatpush3.msra.mxu0 %v276_v33  ;;  %335 = vmatprep.subr.mxu1 %v251_v44 }
  0x30   :  { %4298 = vmatprep.subr.mxu0 %v4701_v5  ;;  %336 = vmatpush1.msra.mxu1 %v250_v45 }
  0x31   :  { %4299 = vmatpush3.msra.mxu0 %v273_v34  ;;  %337 = vmatprep.subr.mxu1 %v248_v47 }
  0x32   :  { %4300 = vmatprep.subr.mxu0 %v4701_v5  ;;  %338 = vmatpush1.msra.mxu1 %v247_v48 }
  0x33   :  { %4301 = vmatpush3.msra.mxu0 %v270_v35  ;;  %339 = vmatprep.subr.mxu1 %v245_v50 }
  0x34   :  { %4302 = vmatprep.subr.mxu0 %v4701_v5  ;;  %340 = vmatpush1.msra.mxu1 %v244_v51 }
  0x35   :  { %4303 = vmatpush3.msra.mxu0 %v267_v36  ;;  %4318 = vmatprep.mubr.msk.f32.mxu0 %vm4703_vm0, %v4701_v5 }
  0x36   :  { %4304 = vmatprep.subr.mxu0 %v4701_v5  ;;  %4336 = vmatprep.subr.mxu1 %v4701_v5 }
  0x37   :  { %4305 = vmatpush3.msra.mxu0 %v264_v37 }
  0x38   :  { %4306 = vmatprep.subr.mxu0 %v4701_v5 }
  0x39   :  { %4307 = vmatpush3.msra.mxu0 %v261_v38 }
  0x3a   :  { %4308 = vmatprep.subr.mxu0 %v4701_v5 }
  0x3b   :  { %4309 = vmatpush3.msra.mxu0 %v258_v40 }
  0x3c   :  { %4310 = vmatprep.subr.mxu0 %v4701_v5 }
  0x3d   :  { %4311 = vmatpush3.msra.mxu0 %v255_v43 }
  0x3e   :  { %4312 = vmatprep.subr.mxu0 %v4701_v5 }
  0x3f   :  { %4313 = vmatpush3.msra.mxu0 %v252_v46 }
  0x40   :  { %4314 = vmatprep.subr.mxu0 %v4701_v5 }
  0x41   :  { %4315 = vmatpush3.msra.mxu0 %v249_v49 }
  0x42   :  { %4316 = vmatprep.subr.mxu0 %v4701_v5 }
  0x43   :  { %4317 = vmatpush3.msra.mxu0 %v246_v52 }
  0x44   :  { %4321 = vmatprep.subr.mxu0 %v4701_v5 }
  0xe4   :  { %v4112_v53 = vpop.f32.mrf.mxu0 }
  0xe6   :  { %v4113_v55 = vpop.f32.mrf.mxu0 }
  0xe7   :  { %v4114_v56 = vadd.f32 %v4113_v55, %v4112_v53 }
  0xe9   :  { %v240_v57 = vadd.f32 %v4114_v56, %v4015_v54 }
  0xeb   :  { %v243_v58 = vmax.f32 %v240_v57, 0.0 }
  0xed   :  { %374 = vmatmul.mubr.f32.vlgmr.msra.gmra.mxu1 %v243_v58  ;;  %4319 = vmatmul.mubr.f32.vlgmr.msra.gmra.mxu0 %v243_v58 }
  0xee   :  { %4323 = vmatprep.mubr.msk.f32.mxu0 %vm4703_vm0, %v4701_v5  ;;  %4338 = vmatprep.mubr.msk.f32.mxu1 %vm4703_vm0, %v4701_v5 }
 0x1ad   :  { %v375_v0 = vpop.f32.mrf.mxu1  ;;  %v446_v1 = vpop.f32.mrf.mxu0 }
 0x1ae   :  { %v5106_v8 = vadd.f32 %v375_v0, %v297_v2  ;;  %v5109_v9 = vadd.f32 %v446_v1, %v305_v6 }
 0x1af   :  { %v377_v3 = vpop.f32.mrf.mxu1  ;;  %v4320_v4 = vpop.f32.mrf.mxu0 }
 0x1b0   :  { %v5100_v7 = vadd.f32 %v377_v3, %v301_v63 }
 0x1b2   :  { %614 = vrot.lane.b32.xlu1 %v5100_v7, %s4704_s13  ;;  %4322 = vmatpush3.xpose.msk.msra.mxu0 %vm450_vm1, %v5100_v7 }
 0x1b3   :  { %4326 = vmatprep.subr.mxu0 %v4701_v5 }
 0x1b5   :  { %4324 = vmatmul.mubr.msk.f32.vlgmr.msra.gmra.mxu0 %vm450_vm1, %v5106_v8 }
 0x1b6   :  { %612 = vrot.lane.b32.xlu1 %v5106_v8, %s4704_s13  ;;  %4327 = vmatpush3.msra.mxu0 %v5109_v9 }
 0x1b7   :  { %4328 = vmatprep.mubr.msk.f32.mxu0 %vm4703_vm0, %v4701_v5  ;;  %4331 = vmatprep.subr.mxu0 %v4701_v5 }
 0x224   :  { %v615_v21 = vpop.permute.xlu1 %614 }
 0x228   :  { %v613_v24 = vpop.permute.xlu1 %612 }
 0x275   :  { %v523_v10 = vpop.f32.mrf.mxu0 }
 0x276   :  { %v528_v11 = vsel %vm527_vm2, %v523_v10, -inf }
 0x277   :  { %529 = vmax.xlane.f32.xlu0 %v528_v11  ;;  %v4325_v12 = vpop.f32.mrf.mxu0 }
 0x300   :  { %v530_v13 = vpop.xlane.xlu0 %529 }
 0x301   :  { %v531_v14 = vsub.f32 %v523_v10, %v530_v13 }
 0x303   :  { %v532_v16 = vmul.f32 1.442695, %v531_v14 }
 0x305   :  { %4611 = vpow2.f32 %v532_v16 }
 0x312   :  { %v4612_v17 = vpop.eup %4611 }
 0x313   :  { %v534_v18 = vsel %vm527_vm2, %v4612_v17, 0.0 }
 0x314   :  { %535 = vadd.xlane.f32.xlu0 %v534_v18 }
 0x39d   :  { %v536_v19 = vpop.xlane.xlu0 %535 }
 0x39e   :  { %4613 = vrcp.f32 %v536_v19 }
 0x3ab   :  { %v4614_v20 = vpop.eup %4613 }
 0x3ac   :  { %v538_v22 = vmul.f32 %v4614_v20, %v4612_v17 }
 0x3ae   :  { %4329 = vmatmul.mubr.msk.f32.vlgmr.msra.gmra.mxu0 %vm527_vm2, %v538_v22 }
 0x3af   :  { %4332 = vmatpush3.xpose.msk.msra.mxu0 %vm450_vm1, %v615_v21  ;;  %4333 = vmatprep.mubr.msk.f32.mxu0 %vm4703_vm0, %v4701_v5 }
 0x3b0   :  { %4361 = vmatprep.subr.mxu0 %v4701_v5 }
 0x3b2   :  { %4334 = vmatmul.mubr.msk.f32.vlgmr.msra.gmra.mxu0 %vm450_vm1, %v613_v24 }
 0x3b3   :  { %4363 = vmatprep.mubr.msk.f32.mxu0 %vm4703_vm0, %v4701_v5 }
 0x46e   :  { %v5129_v25 = vpop.f32.mrf.mxu0 }
 0x470   :  { %v4330_v26 = vpop.f32.mrf.mxu0 }
 0x472   :  { %v686_v27 = vpop.f32.mrf.mxu0 }
 0x473   :  { %v690_v28 = vsel %vm527_vm2, %v686_v27, -inf }
 0x474   :  { %691 = vmax.xlane.f32.xlu0 %v690_v28  ;;  %v4335_v29 = vpop.f32.mrf.mxu0 }
 0x48a   :  { %702 = vrot.lane.b32.xlu0 %v5109_v9, %s4704_s13 }
 0x48e   :  { %780 = vrot.lane.b32.xlu0 %v5100_v7, %s4705_s14 }
 0x492   :  { %778 = vrot.lane.b32.xlu0 %v5106_v8, %s4705_s14 }
 0x4fd   :  { %v692_v30 = vpop.xlane.xlu0 %691 }
 0x4fe   :  { %v693_v31 = vsub.f32 %v686_v27, %v692_v30 }
 0x500   :  { %v694_v32 = vmul.f32 1.442695, %v693_v31 }
 0x501   :  { %v703_v33 = vpop.permute.xlu0 %702 }
 0x502   :  { %4615 = vpow2.f32 %v694_v32  ;;  %4337 = vmatpush3.msra.mxu1 %v703_v33 }
 0x503   :  { %4341 = vmatprep.subr.mxu1 %v4701_v5 }
 0x505   :  { %v781_v38 = vpop.permute.xlu0 %780 }
 0x509   :  { %v779_v40 = vpop.permute.xlu0 %778 }
 0x50f   :  { %v4616_v34 = vpop.eup %4615 }
 0x510   :  { %v696_v35 = vsel %vm527_vm2, %v4616_v34, 0.0 }
 0x511   :  { %697 = vadd.xlane.f32.xlu1 %v696_v35 }
 0x522   :  { %867 = vrot.lane.b32.xlu1 %v5109_v9, %s4705_s14 }
 0x526   :  { %945 = vrot.lane.b32.xlu1 %v5100_v7, %s4706_s15 }
 0x52a   :  { %943 = vrot.lane.b32.xlu1 %v5106_v8, %s4706_s15 }
 0x52e   :  { %1108 = vrot.lane.b32.xlu1 %v5106_v8, %s4707_s16 }
 0x532   :  { %1275 = vrot.lane.b32.xlu1 %v5100_v7, %s4708_s17 }
 0x59a   :  { %v698_v36 = vpop.xlane.xlu1 %697 }
 0x59b   :  { %4617 = vrcp.f32 %v698_v36 }
 0x59e   :  { %v868_v41 = vpop.permute.xlu1 %867 }
 0x5a2   :  { %v946_v47 = vpop.permute.xlu1 %945 }
 0x5a6   :  { %v944_v48 = vpop.permute.xlu1 %943 }
 0x5a8   :  { %v4618_v37 = vpop.eup %4617 }
 0x5a9   :  { %v700_v39 = vmul.f32 %v4618_v37, %v4616_v34 }
 0x5aa   :  { %v1109_v51 = vpop.permute.xlu1 %1108 }
 0x5ab   :  { %4339 = vmatmul.mubr.msk.f32.vlgmr.msra.gmra.mxu1 %vm527_vm2, %v700_v39 }
 0x5ac   :  { %4342 = vmatpush3.xpose.msk.msra.mxu1 %vm450_vm1, %v781_v38  ;;  %4343 = vmatprep.mubr.msk.f32.mxu1 %vm4703_vm0, %v4701_v5 }
 0x5ad   :  { %4346 = vmatprep.subr.mxu1 %v4701_v5 }
 0x5ae   :  { %v1276_v54 = vpop.permute.xlu1 %1275 }
 0x5af   :  { %4344 = vmatmul.mubr.msk.f32.vlgmr.msra.gmra.mxu1 %vm450_vm1, %v779_v40 }
 0x5b0   :  { %4347 = vmatpush3.msra.mxu1 %v868_v41  ;;  %4348 = vmatprep.mubr.msk.f32.mxu1 %vm4703_vm0, %v4701_v5 }
 0x5b1   :  { %4351 = vmatprep.subr.mxu1 %v4701_v5 }
 0x66b   :  { %v5159_v42 = vpop.f32.mrf.mxu1 }
 0x66d   :  { %v4340_v43 = vpop.f32.mrf.mxu1 }
 0x66f   :  { %v852_v44 = vpop.f32.mrf.mxu1 }
 0x670   :  { %v856_v45 = vsel %vm527_vm2, %v852_v44, -inf }
 0x671   :  { %857 = vmax.xlane.f32.xlu0 %v856_v45  ;;  %v4345_v46 = vpop.f32.mrf.mxu1 }
 0x687   :  { %1110 = vrot.lane.b32.xlu0 %v5100_v7, %s4707_s16 }
 0x68b   :  { %1603 = vrot.lane.b32.xlu0 %v5106_v8, %s4709_s18 }
 0x6fa   :  { %v858_v49 = vpop.xlane.xlu0 %857 }
 0x6fb   :  { %v859_v50 = vsub.f32 %v852_v44, %v858_v49 }
 0x6fd   :  { %v860_v52 = vmul.f32 1.442695, %v859_v50 }
 0x6fe   :  { %v1111_v53 = vpop.permute.xlu0 %1110 }
 0x6ff   :  { %4619 = vpow2.f32 %v860_v52  ;;  %4362 = vmatpush3.xpose.msk.msra.mxu0 %vm450_vm1, %v1111_v53 }
 0x700   :  { %4371 = vmatprep.subr.mxu0 %v4701_v5 }
 0x702   :  { %4364 = vmatmul.mubr.msk.f32.vlgmr.msra.gmra.mxu0 %vm450_vm1, %v1109_v51  ;;  %v1604_v3 = vpop.permute.xlu0 %1603 }
 0x703   :  { %4372 = vmatpush3.xpose.msk.msra.mxu0 %vm450_vm1, %v1276_v54  ;;  %4373 = vmatprep.mubr.msk.f32.mxu0 %vm4703_vm0, %v4701_v5 }
 0x704   :  { %4381 = vmatprep.subr.mxu0 %v4701_v5 }
 0x70c   :  { %v4620_v55 = vpop.eup %4619 }
 0x70d   :  { %v862_v56 = vsel %vm527_vm2, %v4620_v55, 0.0 }
 0x70e   :  { %863 = vadd.xlane.f32.xlu1 %v862_v56 }
 0x71f   :  { %1273 = vrot.lane.b32.xlu1 %v5106_v8, %s4708_s17 }
 0x723   :  { %1440 = vrot.lane.b32.xlu1 %v5100_v7, %s4710_s19 }
 0x727   :  { %1438 = vrot.lane.b32.xlu1 %v5106_v8, %s4710_s19 }
 0x72b   :  { %1605 = vrot.lane.b32.xlu1 %v5100_v7, %s4709_s18 }
 0x797   :  { %v864_v57 = vpop.xlane.xlu1 %863 }
 0x798   :  { %4621 = vrcp.f32 %v864_v57 }
 0x79b   :  { %v1274_v58 = vpop.permute.xlu1 %1273 }
 0x79c   :  { %4374 = vmatmul.mubr.msk.f32.vlgmr.msra.gmra.mxu0 %vm450_vm1, %v1274_v58 }
 0x79d   :  { %4383 = vmatprep.mubr.msk.f32.mxu0 %vm4703_vm0, %v4701_v5 }
 0x79f   :  { %v1441_v60 = vpop.permute.xlu1 %1440 }
 0x7a0   :  { %4382 = vmatpush3.xpose.msk.msra.mxu0 %vm450_vm1, %v1441_v60 }
 0x7a1   :  { %4391 = vmatprep.subr.mxu0 %v4701_v5 }
 0x7a3   :  { %v1439_v63 = vpop.permute.xlu1 %1438 }
 0x7a4   :  { %4384 = vmatmul.mubr.msk.f32.vlgmr.msra.gmra.mxu0 %vm450_vm1, %v1439_v63 }
 0x7a5   :  { %v4622_v0 = vpop.eup %4621  ;;  %4393 = vmatprep.mubr.msk.f32.mxu0 %vm4703_vm0, %v4701_v5 }
 0x7a6   :  { %v866_v1 = vmul.f32 %v4622_v0, %v4620_v55 }
 0x7a7   :  { %v1606_v2 = vpop.permute.xlu1 %1605 }
 0x7a8   :  { %4349 = vmatmul.mubr.msk.f32.vlgmr.msra.gmra.mxu1 %vm527_vm2, %v866_v1  ;;  %4392 = vmatpush3.xpose.msk.msra.mxu0 %vm450_vm1, %v1606_v2 }
 0x7a9   :  { %4352 = vmatpush3.xpose.msk.msra.mxu1 %vm450_vm1, %v946_v47  ;;  %4353 = vmatprep.mubr.msk.f32.mxu1 %vm4703_vm0, %v4701_v5 }
 0x7aa   :  { %4356 = vmatprep.subr.mxu1 %v4701_v5  ;;  %4401 = vmatprep.subr.mxu0 %v4701_v5 }
 0x7ab   :  { %4394 = vmatmul.mubr.msk.f32.vlgmr.msra.gmra.mxu0 %vm450_vm1, %v1604_v3 }
 0x7ac   :  { %4354 = vmatmul.mubr.msk.f32.vlgmr.msra.gmra.mxu1 %vm450_vm1, %v944_v48  ;;  %4433 = vmatprep.mubr.msk.f32.mxu0 %vm4703_vm0, %v4701_v5 }
 0x7ad   :  { %4358 = vmatprep.mubr.msk.f32.mxu1 %vm4703_vm0, %v4701_v5 }
 0x7c2   :  { %v1182_v4 = vpop.f32.mrf.mxu0 }
 0x7c3   :  { %v1186_v6 = vsel %vm527_vm2, %v1182_v4, -inf }
 0x7c4   :  { %1187 = vmax.xlane.f32.xlu0 %v1186_v6  ;;  %v4365_v7 = vpop.f32.mrf.mxu0 }
 0x84d   :  { %v1188_v8 = vpop.xlane.xlu0 %1187 }
 0x84e   :  { %v1189_v10 = vsub.f32 %v1182_v4, %v1188_v8 }
 0x850   :  { %v1190_v11 = vmul.f32 1.442695, %v1189_v10 }
 0x852   :  { %4623 = vpow2.f32 %v1190_v11  ;;  %v1824_v11 = vld [vmem:[%s5916_s5 + $0x78] sm:$0xff] }
 0x853   :  { %4402 = vmatpush3.msra.mxu0 %v1824_v11  ;;  %v4050_v11 = vld [vmem:[%s5911_s0 + $0x1d] ss:$2 sm:$0x3] }
 0x854   :  { %4403 = vmatprep.subr.mxu0 %v4701_v5 }
 0x85c   :  { %v1347_v12 = vpop.f32.mrf.mxu0 }
 0x85d   :  { %v1351_v13 = vsel %vm527_vm2, %v1347_v12, -inf }
 0x85e   :  { %1352 = vmax.xlane.f32.xlu0 %v1351_v13  ;;  %v4375_v14 = vpop.f32.mrf.mxu0  ;;  %v1822_v13 = vld [vmem:[%s5916_s5 + $0x68] sm:$0xff] }
 0x85f   :  { %v5206_v24 = vpop.eup %4623  ;;  %v1821_v14 = vld [vmem:[%s5916_s5 + $0x60] sm:$0xff] }
 0x860   :  { %v1192_v29 = vsel %vm527_vm2, %v5206_v24, 0.0 }
 0x864   :  { %v1512_v16 = vpop.f32.mrf.mxu0 }
 0x865   :  { %v1516_v30 = vsel %vm527_vm2, %v1512_v16, -inf }
 0x866   :  { %v4385_v17 = vpop.f32.mrf.mxu0 }
 0x867   :  { %v1819_v17 = vld [vmem:[%s5916_s5 + $0x50] sm:$0xff] }
 0x868   :  { %v939_v18 = vpop.f32.mrf.mxu1 }
 0x86a   :  { %v4350_v19 = vpop.f32.mrf.mxu1 }
 0x86b   :  { %v1677_v20 = vpop.f32.mrf.mxu0  ;;  %v1817_v19 = vld [vmem:[%s5916_s5 + $0x40] sm:$0xff] }
 0x86c   :  { %v1017_v21 = vpop.f32.mrf.mxu1  ;;  %v1681_v22 = vsel %vm527_vm2, %v1677_v20, -inf }
 0x86d   :  { %1682 = vmax.xlane.f32.xlu0 %v1681_v22  ;;  %v4395_v26 = vpop.f32.mrf.mxu0  ;;  %v1021_v27 = vsel %vm527_vm2, %v1017_v21, -inf  ;;  %v1814_v22 = vld [vmem:[%s5916_s5 + $0x28] sm:$0xff] }
 0x86e   :  { %1022 = vmax.xlane.f32.xlu1 %v1021_v27  ;;  %v4355_v28 = vpop.f32.mrf.mxu1  ;;  %v1812_v26 = vld [vmem:[%s5916_s5 + $0x18] sm:$0xff] }
 0x86f   :  { %v1811_v28 = vld [vmem:[%s5916_s5 + $0x10] sm:$0xff] }
 0x871   :  { %1193 = vadd.xlane.f32.xlu0 %v1192_v29  ;;  %v1810_v29 = vld [vmem:[%s5916_s5 + $0x8] sm:$0xff] }
 0x872   :  { %1517 = vmax.xlane.f32.xlu1 %v1516_v30 }
 0x8e7   :  { %v1353_v31 = vpop.xlane.xlu0 %1352 }
 0x8e8   :  { %v1354_v32 = vsub.f32 %v1347_v12, %v1353_v31  ;;  %v1823_v12 = vld [vmem:[%s5916_s5 + $0x70] sm:$0xff] }
 0x8e9   :  { %4404 = vmatpush3.msra.mxu0 %v1823_v12 }
 0x8ea   :  { %v1355_v33 = vmul.f32 1.442695, %v1354_v32  ;;  %4405 = vmatprep.subr.mxu0 %v4701_v5  ;;  %v1809_v32 = vld [vmem:[%s5916_s5] sm:$0xff] }
 0x8eb   :  { %4406 = vmatpush3.msra.mxu0 %v1822_v13 }
 0x8ec   :  { %4625 = vpow2.f32 %v1355_v33  ;;  %4407 = vmatprep.subr.mxu0 %v4701_v5 }
 0x8ed   :  { %4408 = vmatpush3.msra.mxu0 %v1821_v14 }
 0x8ee   :  { %4409 = vmatprep.subr.mxu0 %v4701_v5 }
 0x8f6   :  { %v1683_v34 = vpop.xlane.xlu0 %1682 }
 0x8f7   :  { %v1684_v35 = vsub.f32 %v1677_v20, %v1683_v34  ;;  %v1023_v36 = vpop.xlane.xlu1 %1022  ;;  %v1816_v20 = vld [vmem:[%s5916_s5 + $0x38] sm:$0xff] }
 0x8f8   :  { %v1024_v48 = vsub.f32 %v1017_v21, %v1023_v36  ;;  %v1815_v21 = vld [vmem:[%s5916_s5 + $0x30] sm:$0xff] }
 0x8f9   :  { %v4626_v37 = vpop.eup %4625  ;;  %v1685_v38 = vmul.f32 1.442695, %v1684_v35 }
 0x8fa   :  { %v1357_v39 = vsel %vm527_vm2, %v4626_v37, 0.0  ;;  %v1025_v49 = vmul.f32 1.442695, %v1024_v48  ;;  %v1194_v52 = vpop.xlane.xlu0 %1193 }
 0x8fb   :  { %4627 = vpow2.f32 %v1685_v38  ;;  %1358 = vadd.xlane.f32.xlu1 %v1357_v39  ;;  %v1518_v40 = vpop.xlane.xlu1 %1517 }
 0x8fc   :  { %v1519_v41 = vsub.f32 %v1512_v16, %v1518_v40  ;;  %v1820_v16 = vld [vmem:[%s5916_s5 + $0x58] sm:$0xff] }
 0x8fd   :  { %4410 = vmatpush3.msra.mxu0 %v1820_v16 }
 0x8fe   :  { %v1520_v43 = vmul.f32 1.442695, %v1519_v41  ;;  %4411 = vmatprep.subr.mxu0 %v4701_v5 }
 0x8ff   :  { %4412 = vmatpush3.msra.mxu0 %v1819_v17 }
 0x900   :  { %4629 = vpow2.f32 %v1520_v43  ;;  %4413 = vmatprep.subr.mxu0 %v4701_v5 }
 0x901   :  { %4631 = vpow2.f32 %v1025_v49 }
 0x908   :  { %v4628_v44 = vpop.eup %4627 }
 0x909   :  { %v1687_v45 = vsel %vm527_vm2, %v4628_v44, 0.0 }
 0x90a   :  { %1688 = vadd.xlane.f32.xlu1 %v1687_v45 }
 0x90d   :  { %v4630_v46 = vpop.eup %4629 }
 0x90e   :  { %v1522_v47 = vsel %vm527_vm2, %v4630_v46, 0.0  ;;  %v4632_v50 = vpop.eup %4631 }
 0x90f   :  { %1523 = vadd.xlane.f32.xlu0 %v1522_v47  ;;  %v1027_v51 = vsel %vm527_vm2, %v4632_v50, 0.0 }
 0x91b   :  { %1197 = vrot.lane.b32.xlu1 %v5109_v9, %s4707_s16 }
 0x925   :  { %1032 = vrot.lane.b32.xlu0 %v5109_v9, %s4706_s15 }
 0x929   :  { %1527 = vrot.lane.b32.xlu0 %v5109_v9, %s4710_s19 }
 0x92d   :  { %1769 = vrot.lane.b32.xlu0 %v5159_v42, %s4709_s18 }
 0x93f   :  { %1028 = vadd.xlane.f32.xlu1 %v1027_v51 }
 0x950   :  { %1362 = vrot.lane.b32.xlu1 %v5109_v9, %s4708_s17 }
 0x954   :  { %1692 = vrot.lane.b32.xlu1 %v5109_v9, %s4709_s18 }
 0x958   :  { %1773 = vrot.lane.b32.xlu1 %v939_v18, %s4710_s19  ;;  %v1818_v18 = vld [vmem:[%s5916_s5 + $0x48] sm:$0xff] }
 0x959   :  { %4414 = vmatpush3.msra.mxu0 %v1818_v18 }
 0x95a   :  { %4415 = vmatprep.subr.mxu0 %v4701_v5 }
 0x95b   :  { %4416 = vmatpush3.msra.mxu0 %v1817_v19 }
 0x95c   :  { %4417 = vmatprep.subr.mxu0 %v4701_v5 }
 0x95d   :  { %4418 = vmatpush3.msra.mxu0 %v1816_v20 }
 0x95e   :  { %4419 = vmatprep.subr.mxu0 %v4701_v5 }
 0x95f   :  { %4420 = vmatpush3.msra.mxu0 %v1815_v21 }
 0x960   :  { %4421 = vmatprep.subr.mxu0 %v4701_v5 }
 0x961   :  { %4422 = vmatpush3.msra.mxu0 %v1814_v22 }
 0x962   :  { %4423 = vmatprep.subr.mxu0 %v4701_v5 }
 0x984   :  { %v1359_v42 = vpop.xlane.xlu1 %1358 }
 0x993   :  { %v1689_v55 = vpop.xlane.xlu1 %1688 }
 0x997   :  { %v1198_v56 = vpop.permute.xlu1 %1197 }
 0x998   :  { %v1524_v53 = vpop.xlane.xlu0 %1523 }
 0x99c   :  { %v1033_v54 = vpop.permute.xlu0 %1032 }
 0x99d   :  { %4357 = vmatpush3.msra.mxu1 %v1033_v54 }
 0x99e   :  { %4366 = vmatprep.subr.mxu1 %v4701_v5 }
 0x9a0   :  { %v1528_v4 = vpop.permute.xlu0 %1527 }
 0x9a4   :  { %v1770_v40 = vpop.permute.xlu0 %1769 }
 0x9a5   :  { %v1796_v45 = vsel %vm450_vm1, %v5129_v25, %v1770_v40  ;;  %v4040_v25 = vld [vmem:[%s5917_s6] ss:$0 sm:$0xff]  ;;  %v2049_v40 = vld [vmem:[%s5912_s1 + $0x68] sm:$0xff] }
 0x9c8   :  { %v1029_v57 = vpop.xlane.xlu1 %1028 }
 0x9c9   :  { %4633 = vrcp.f32 %v1029_v57 }
 0x9ca   :  { %4635 = vrcp.f32 %v1194_v52 }
 0x9cb   :  { %4637 = vrcp.f32 %v1359_v42 }
 0x9cc   :  { %4639 = vrcp.f32 %v1524_v53  ;;  %v1363_v1 = vpop.permute.xlu1 %1362 }
 0x9cd   :  { %4641 = vrcp.f32 %v1689_v55 }
 0x9d0   :  { %v1693_v8 = vpop.permute.xlu1 %1692 }
 0x9d4   :  { %v1774_v41 = vpop.permute.xlu1 %1773 }
 0x9d6   :  { %v4634_v58 = vpop.eup %4633 }
 0x9d7   :  { %v1031_v60 = vmul.f32 %v4634_v58, %v4632_v50  ;;  %v4636_v9 = vpop.eup %4635 }
 0x9d8   :  { %v1196_v63 = vmul.f32 %v4636_v9, %v5206_v24  ;;  %v4638_v0 = vpop.eup %4637  ;;  %v1813_v24 = vld [vmem:[%s5916_s5 + $0x20] sm:$0xff] }
 0x9d9   :  { %4359 = vmatmul.mubr.msk.f32.vlgmr.msra.gmra.mxu1 %vm527_vm2, %v1031_v60  ;;  %v1361_v2 = vmul.f32 %v4638_v0, %v4626_v37  ;;  %v4640_v3 = vpop.eup %4639  ;;  %4424 = vmatpush3.msra.mxu0 %v1813_v24 }
 0x9da   :  { %4367 = vmatpush3.msra.mxu1 %v1198_v56  ;;  %4368 = vmatprep.mubr.msk.f32.mxu1 %vm4703_vm0, %v4701_v5  ;;  %v1526_v6 = vmul.f32 %v4640_v3, %v4630_v46  ;;  %v4642_v7 = vpop.eup %4641  ;;  %v1798_v46 = vsel %vm1797_vm3, %v1796_v45, %v1774_v41  ;;  %v4044_v3 = vld [vmem:[%s5911_s0 + $0x5] ss:$2 sm:$0x3]  ;;  %v2047_v45 = vld [vmem:[%s5912_s1 + $0x58] sm:$0xff] }
 0x9db   :  { %4376 = vmatprep.subr.mxu1 %v4701_v5  ;;  %v1691_v10 = vmul.f32 %v4642_v7, %v4628_v44  ;;  %4425 = vmatprep.subr.mxu0 %v4701_v5  ;;  %v4047_v7 = vld [vmem:[%s5911_s0 + $0x11] ss:$2 sm:$0x3]  ;;  %v2064_v41 = vld [vmem:[%s5912_s1 + $0xe0] sm:$0xff] }
 0x9dc   :  { %4426 = vmatpush3.msra.mxu0 %v1812_v26  ;;  %v4041_v26 = vld [vmem:[%s5918_s7] ss:$0 sm:$0xff] }
 0x9dd   :  { %4369 = vmatmul.mubr.msk.f32.vlgmr.msra.gmra.mxu1 %vm527_vm2, %v1196_v63  ;;  %4427 = vmatprep.subr.mxu0 %v4701_v5 }
 0x9de   :  { %4377 = vmatpush3.msra.mxu1 %v1363_v1  ;;  %4378 = vmatprep.mubr.msk.f32.mxu1 %vm4703_vm0, %v4701_v5 }
 0x9df   :  { %4386 = vmatprep.subr.mxu1 %v4701_v5  ;;  %4428 = vmatpush3.msra.mxu0 %v1811_v28  ;;  %v4042_v28 = vld [vmem:[%s5919_s8] ss:$0 sm:$0xff] }
 0x9e0   :  { %4429 = vmatprep.subr.mxu0 %v4701_v5 }
 0x9e1   :  { %4379 = vmatmul.mubr.msk.f32.vlgmr.msra.gmra.mxu1 %vm527_vm2, %v1361_v2  ;;  %4430 = vmatpush3.msra.mxu0 %v1810_v29  ;;  %v4043_v2 = vld [vmem:[%s5911_s0 + $0x1] ss:$2 sm:$0x3] }
 0x9e2   :  { %4387 = vmatpush3.msra.mxu1 %v1528_v4  ;;  %4388 = vmatprep.mubr.msk.f32.mxu1 %vm4703_vm0, %v4701_v5  ;;  %v4045_v4 = vld [vmem:[%s5911_s0 + $0x9] ss:$2 sm:$0x3]  ;;  %v2083_v12 = vcombine.low %v4043_v2, %v4044_v3 }
 0x9e3   :  { %4396 = vmatprep.subr.mxu1 %v4701_v5  ;;  %4431 = vmatprep.subr.mxu0 %v4701_v5 }
 0x9e4   :  { %4432 = vmatpush3.msra.mxu0 %v1809_v32  ;;  %v5355_v17 = vrot.slane %v2083_v12, %v4834_v23  ;;  %v2269_v12 = vld [vmem:[%s5914_s3 + $0x178] sm:$0xff] }
 0x9e5   :  { %4389 = vmatmul.mubr.msk.f32.vlgmr.msra.gmra.mxu1 %vm527_vm2, %v1526_v6  ;;  %v4046_v6 = vld [vmem:[%s5911_s0 + $0xd] ss:$2 sm:$0x3] }
 0x9e6   :  { %4397 = vmatpush3.msra.mxu1 %v1693_v8  ;;  %4398 = vmatprep.mubr.msk.f32.mxu1 %vm4703_vm0, %v4701_v5  ;;  %v4048_v8 = vld [vmem:[%s5911_s0 + $0x15] ss:$2 sm:$0x3]  ;;  %v2084_v13 = vcombine.low %v4045_v4, %v4046_v6  ;;  %v2053_v4 = vld [vmem:[%s5912_s1 + $0x88] sm:$0xff] }
 0x9e7   :  { %4436 = vmatprep.subr.mxu1 %v4701_v5  ;;  %v2085_v14 = vcombine.low %v4047_v7, %v4048_v8  ;;  %v2037_v6 = vld [vmem:[%s5912_s1 + $0x8] sm:$0xff]  ;;  %v2052_v7 = vld [vmem:[%s5912_s1 + $0x80] sm:$0xff] }
 0x9e8   :  { %v5358_v18 = vrot.slane %v2084_v13, %v4834_v23  ;;  %v2265_v13 = vld [vmem:[%s5914_s3 + $0x158] sm:$0xff] }
 0x9e9   :  { %4399 = vmatmul.mubr.msk.f32.vlgmr.msra.gmra.mxu1 %vm527_vm2, %v1691_v10  ;;  %v4049_v10 = vld [vmem:[%s5911_s0 + $0x19] ss:$2 sm:$0x3]  ;;  %v5361_v19 = vrot.slane %v2085_v14, %v4834_v23  ;;  %v2264_v14 = vld [vmem:[%s5914_s3 + $0x150] sm:$0xff] }
 0x9ea   :  { %4438 = vmatprep.mubr.msk.f32.mxu1 %vm4703_vm0, %v4701_v5  ;;  %v2086_v16 = vcombine.low %v4049_v10, %v4050_v11  ;;  %v2116_v21 = vcombine.high %v5355_v17, %v5358_v18  ;;  %v2268_v10 = vld [vmem:[%s5914_s3 + $0x170] sm:$0xff]  ;;  %v2267_v11 = vld [vmem:[%s5914_s3 + $0x168] sm:$0xff] }
 0x9eb   :  { %2287 = vmatprep.subr.mxu0 %v2268_v10 }
 0x9ec   :  { %v5364_v20 = vrot.slane %v2086_v16, %v4834_v23  ;;  %v2266_v16 = vld [vmem:[%s5914_s3 + $0x160] sm:$0xff] }
 0x9ee   :  { %v2118_v22 = vcombine.high %v5361_v19, %v5364_v20 }
 0xa99   :  { %v1104_v27 = vpop.f32.mrf.mxu1 }
 0xa9a   :  { %1777 = vrot.lane.b32.xlu0 %v1104_v27, %s4708_s17 }
 0xa9b   :  { %v4360_v30 = vpop.f32.mrf.mxu1 }
 0xa9c   :  { %v2132_v30 = vrot.slane %v2116_v21, %v4834_v23  ;;  %v2260_v21 = vld [vmem:[%s5914_s3 + $0x130] sm:$0xff] }
 0xa9d   :  { %v1269_v31 = vpop.f32.mrf.mxu1 }
 0xa9e   :  { %1781 = vrot.lane.b32.xlu1 %v1269_v31, %s4707_s16  ;;  %v2146_v31 = vrot.slane %v2118_v22, %v4834_v23  ;;  %v2258_v22 = vld [vmem:[%s5914_s3 + $0x120] sm:$0xff] }
 0xa9f   :  { %v4370_v33 = vpop.f32.mrf.mxu1 }
 0xaa0   :  { %v2067_v33 = vld [vmem:[%s5912_s1 + $0xf8] sm:$0xff] }
 0xaa1   :  { %v1434_v34 = vpop.f32.mrf.mxu1 }
 0xaa2   :  { %1785 = vrot.lane.b32.xlu0 %v1434_v34, %s4706_s15  ;;  %v1930_v34 = vld [vmem:[%s5920_s9] sm:$0x1] }
 0xaa3   :  { %v4380_v35 = vpop.f32.mrf.mxu1 }
 0xaa4   :  { %v2148_v35 = vcombine.low %v2132_v30, %v2146_v31  ;;  %v2252_v30 = vld [vmem:[%s5914_s3 + $0xf0] sm:$0xff]  ;;  %v2250_v31 = vld [vmem:[%s5914_s3 + $0xe0] sm:$0xff] }
 0xaa5   :  { %v1599_v36 = vpop.f32.mrf.mxu1 }
 0xaa6   :  { %1789 = vrot.lane.b32.xlu1 %v1599_v36, %s4705_s14  ;;  %v2051_v36 = vld [vmem:[%s5912_s1 + $0x78] sm:$0xff] }
 0xaa7   :  { %v4390_v37 = vpop.f32.mrf.mxu1 }
 0xaa8   :  { %v2066_v37 = vld [vmem:[%s5912_s1 + $0xf0] sm:$0xff] }
 0xaa9   :  { %v1764_v38 = vpop.f32.mrf.mxu1 }
 0xaaa   :  { %1793 = vrot.lane.b32.xlu0 %v1764_v38, %s4704_s13  ;;  %v2050_v38 = vld [vmem:[%s5912_s1 + $0x70] sm:$0xff] }
 0xaab   :  { %v4400_v39 = vpop.f32.mrf.mxu1 }
 0xaac   :  { %v2065_v39 = vld [vmem:[%s5912_s1 + $0xe8] sm:$0xff] }
 0xb0c   :  { %v1778_v43 = vpop.permute.xlu0 %1777 }
 0xb0d   :  { %v1800_v48 = vsel %vm1799_vm4, %v1798_v46, %v1778_v43  ;;  %v2048_v43 = vld [vmem:[%s5912_s1 + $0x60] sm:$0xff]  ;;  %v2062_v46 = vld [vmem:[%s5912_s1 + $0xd0] sm:$0xff] }
 0xb10   :  { %v1782_v44 = vpop.permute.xlu1 %1781 }
 0xb11   :  { %v1802_v50 = vsel %vm1801_vm5, %v1800_v48, %v1782_v44  ;;  %v2063_v44 = vld [vmem:[%s5912_s1 + $0xd8] sm:$0xff]  ;;  %v2061_v48 = vld [vmem:[%s5912_s1 + $0xc8] sm:$0xff] }
 0xb14   :  { %v1786_v47 = vpop.permute.xlu0 %1785 }
 0xb15   :  { %v1804_v51 = vsel %vm1803_vm6, %v1802_v50, %v1786_v47  ;;  %v2046_v47 = vld [vmem:[%s5912_s1 + $0x50] sm:$0xff]  ;;  %v2060_v50 = vld [vmem:[%s5912_s1 + $0xc0] sm:$0xff] }
 0xb18   :  { %v1790_v49 = vpop.permute.xlu1 %1789 }
 0xb19   :  { %v1806_v52 = vsel %vm1805_vm7, %v1804_v51, %v1790_v49  ;;  %v2045_v49 = vld [vmem:[%s5912_s1 + $0x48] sm:$0xff]  ;;  %v2044_v51 = vld [vmem:[%s5912_s1 + $0x40] sm:$0xff] }
 0xb1c   :  { %v1794_v53 = vpop.permute.xlu0 %1793 }
 0xb1d   :  { %v1808_v54 = vsel %vm1807_vm8, %v1806_v52, %v1794_v53  ;;  %v2059_v52 = vld [vmem:[%s5912_s1 + $0xb8] sm:$0xff] }
 0xb1e   :  { %4434 = vmatmul.mubr.f32.vlgmr.msra.gmra.mxu0 %v1808_v54  ;;  %v2043_v53 = vld [vmem:[%s5912_s1 + $0x38] sm:$0xff]  ;;  %v2058_v54 = vld [vmem:[%s5912_s1 + $0xb0] sm:$0xff] }
 0xb1f   :  { %2351 = vmatprep.mubr.f32.mxu0 %v4701_v5  ;;  %2288 = vmatpush1.msra.mxu0 %v2267_v11 }
 0xb20   :  { %2289 = vmatprep.subr.mxu0 %v2265_v13 }
 0xb21   :  { %2290 = vmatpush1.msra.mxu0 %v2264_v14 }
 0xbde   :  { %v1898_v42 = vpop.f32.mrf.mxu0 }
 0xbdf   :  { %v1899_v55 = vadd.f32 %v4040_v25, %v1898_v42  ;;  %v2042_v25 = vld [vmem:[%s5912_s1 + $0x30] sm:$0xff]  ;;  %v2057_v42 = vld [vmem:[%s5912_s1 + $0xa8] sm:$0xff] }
 0xbe0   :  { %v4435_v56 = vpop.f32.mrf.mxu0 }
 0xbe1   :  { %1902 = vadd.xlane.f32.xlu1 %v1899_v55  ;;  %v2056_v56 = vld [vmem:[%s5912_s1 + $0xa0] sm:$0xff] }
 0xc6a   :  { %v1903_v57 = vpop.xlane.xlu1 %1902 }
 0xc6b   :  { %v1905_v58 = vmul.f32 0.0078125, %v1903_v57  ;;  %v2040_v57 = vld [vmem:[%s5912_s1 + $0x20] sm:$0xff] }
 0xc6d   :  { %v1906_v60 = vsub.f32 %v1899_v55, %v1905_v58  ;;  %v2041_v55 = vld [vmem:[%s5912_s1 + $0x28] sm:$0xff]  ;;  %v2115_v58 = vcombine.low %v5355_v17, %v5358_v18  ;;  %v2262_v17 = vld [vmem:[%s5914_s3 + $0x140] sm:$0xff] }
 0xc6e   :  { %v2263_v18 = vld [vmem:[%s5914_s3 + $0x148] sm:$0xff]  ;;  %2291 = vmatprep.subr.mxu0 %v2262_v17 }
 0xc6f   :  { %v1907_v9 = vmul.f32 %v1906_v60, %v1906_v60  ;;  %v2125_v2 = vrot.slane %v2115_v58, %v4834_v23  ;;  %v2222_v58 = vld [vmem:[%s5914_s3] sm:$0xff] }
 0xc71   :  { %1908 = vadd.xlane.f32.xlu0 %v1907_v9  ;;  %v2055_v9 = vld [vmem:[%s5912_s1 + $0x98] sm:$0xff] }
 0xcfa   :  { %v1909_v63 = vpop.xlane.xlu0 %1908 }
 0xcfb   :  { %v1910_v0 = vmul.f32 0.0078125, %v1909_v63  ;;  %v2039_v63 = vld [vmem:[%s5912_s1 + $0x18] sm:$0xff] }
 0xcfd   :  { %v1911_v1 = vadd.f32 1e-05, %v1910_v0  ;;  %v2054_v0 = vld [vmem:[%s5912_s1 + $0x90] sm:$0xff] }
 0xcff   :  { %4643 = vrsqrt.f32 %v1911_v1  ;;  %v2038_v1 = vld [vmem:[%s5912_s1 + $0x10] sm:$0xff] }
 0xd0c   :  { %v4644_v24 = vpop.eup %4643 }
 0xd0d   :  { %v1913_v27 = vmul.f32 %v4644_v24, %v1906_v60  ;;  %v2117_v60 = vcombine.low %v5361_v19, %v5364_v20  ;;  %v2261_v19 = vld [vmem:[%s5914_s3 + $0x138] sm:$0xff]  ;;  %v2259_v20 = vld [vmem:[%s5914_s3 + $0x128] sm:$0xff]  ;;  %v2256_v24 = vld [vmem:[%s5914_s3 + $0x110] sm:$0xff] }
 0xd0e   :  { %2292 = vmatpush1.msra.mxu0 %v2261_v19 }
 0xd0f   :  { %v1921_v29 = vmul.f32 %v4041_v26, %v1913_v27  ;;  %v2139_v3 = vrot.slane %v2117_v60, %v4834_v23  ;;  %v2036_v23 = vld [vmem:[%s5912_s1] sm:$0xff]  ;;  %v2257_v26 = vld [vmem:[%s5914_s3 + $0x118] sm:$0xff]  ;;  %2293 = vmatprep.subr.mxu0 %v2259_v20  ;;  %v2255_v27 = vld [vmem:[%s5914_s3 + $0x108] sm:$0xff] }
 0xd10   :  { %2294 = vmatpush1.msra.mxu0 %v2258_v22  ;;  %v2224_v60 = vld [vmem:[%s5914_s3 + $0x10] sm:$0xff] }
 0xd11   :  { %v1929_v32 = vadd.f32 %v4042_v28, %v1921_v29  ;;  %v2147_v8 = vcombine.low %v2125_v2, %v2139_v3  ;;  %v2253_v28 = vld [vmem:[%s5914_s3 + $0xf8] sm:$0xff]  ;;  %v2254_v29 = vld [vmem:[%s5914_s3 + $0x100] sm:$0xff]  ;;  %2295 = vmatprep.subr.mxu0 %v2256_v24 }
 0xd12   :  { %2296 = vmatpush1.msra.mxu0 %v2255_v27 }
 0xd13   :  { %4437 = vmatpush3.xpose.msra.mxu1 %v1929_v32  ;;  %v2251_v32 = vld [vmem:[%s5914_s3 + $0xe8] sm:$0xff]  ;;  %2297 = vmatprep.subr.mxu0 %v2253_v28 }
 0xd14   :  { %4183 = vmatprep.subr.mxu1 %v2067_v33  ;;  %v2249_v33 = vld [vmem:[%s5914_s3 + $0xd8] sm:$0xff]  ;;  %2298 = vmatpush1.msra.mxu0 %v2252_v30 }
 0xd15   :  { %2299 = vmatprep.subr.mxu0 %v2250_v31 }
 0xd16   :  { %4439 = vmatmul.mubr.f32.vlgmr.msra.gmra.mxu1 %v1930_v34  ;;  %v2247_v34 = vld [vmem:[%s5914_s3 + $0xc8] sm:$0xff]  ;;  %2300 = vmatpush1.msra.mxu0 %v2249_v33 }
 0xd17   :  { %4184 = vmatpush3.msra.mxu1 %v2051_v36  ;;  %2215 = vmatprep.mubr.f32.mxu1 %v2148_v35  ;;  %v2248_v35 = vld [vmem:[%s5914_s3 + $0xd0] sm:$0xff]  ;;  %v2246_v36 = vld [vmem:[%s5914_s3 + $0xc0] sm:$0xff] }
 0xd18   :  { %4185 = vmatprep.subr.mxu1 %v2066_v37  ;;  %v2244_v37 = vld [vmem:[%s5914_s3 + $0xb0] sm:$0xff]  ;;  %2301 = vmatprep.subr.mxu0 %v2247_v34 }
 0xd19   :  { %4186 = vmatpush3.msra.mxu1 %v2050_v38  ;;  %v2245_v38 = vld [vmem:[%s5914_s3 + $0xb8] sm:$0xff]  ;;  %2302 = vmatpush1.msra.mxu0 %v2246_v36 }
 0xd1a   :  { %4187 = vmatprep.subr.mxu1 %v2065_v39  ;;  %v2243_v39 = vld [vmem:[%s5914_s3 + $0xa8] sm:$0xff]  ;;  %2303 = vmatprep.subr.mxu0 %v2244_v37 }
 0xd1b   :  { %4188 = vmatpush3.msra.mxu1 %v2049_v40  ;;  %v2241_v40 = vld [vmem:[%s5914_s3 + $0x98] sm:$0xff]  ;;  %2304 = vmatpush1.msra.mxu0 %v2243_v39 }
 0xd1c   :  { %4189 = vmatprep.subr.mxu1 %v2064_v41  ;;  %v2242_v41 = vld [vmem:[%s5914_s3 + $0xa0] sm:$0xff]  ;;  %2305 = vmatprep.subr.mxu0 %v2241_v40 }
 0xd1d   :  { %4190 = vmatpush3.msra.mxu1 %v2048_v43  ;;  %v2240_v43 = vld [vmem:[%s5914_s3 + $0x90] sm:$0xff] }
 0xd1e   :  { %4191 = vmatprep.subr.mxu1 %v2063_v44  ;;  %v2238_v44 = vld [vmem:[%s5914_s3 + $0x80] sm:$0xff]  ;;  %2306 = vmatpush1.msra.mxu0 %v2240_v43 }
 0xd1f   :  { %4192 = vmatpush3.msra.mxu1 %v2047_v45  ;;  %v2239_v45 = vld [vmem:[%s5914_s3 + $0x88] sm:$0xff]  ;;  %2307 = vmatprep.subr.mxu0 %v2238_v44 }
 0xd20   :  { %4193 = vmatprep.subr.mxu1 %v2062_v46  ;;  %v2237_v46 = vld [vmem:[%s5914_s3 + $0x78] sm:$0xff] }
 0xd21   :  { %4194 = vmatpush3.msra.mxu1 %v2046_v47  ;;  %v2235_v47 = vld [vmem:[%s5914_s3 + $0x68] sm:$0xff]  ;;  %2308 = vmatpush1.msra.mxu0 %v2237_v46 }
 0xd22   :  { %4195 = vmatprep.subr.mxu1 %v2061_v48  ;;  %2309 = vmatprep.subr.mxu0 %v2235_v47  ;;  %v2234_v48 = vld [vmem:[%s5914_s3 + $0x60] sm:$0xff] }
 0xd23   :  { %4196 = vmatpush3.msra.mxu1 %v2045_v49  ;;  %v2236_v49 = vld [vmem:[%s5914_s3 + $0x70] sm:$0xff]  ;;  %2310 = vmatpush1.msra.mxu0 %v2234_v48 }
 0xd24   :  { %4197 = vmatprep.subr.mxu1 %v2060_v50  ;;  %v2232_v50 = vld [vmem:[%s5914_s3 + $0x50] sm:$0xff] }
 0xd25   :  { %4198 = vmatpush3.msra.mxu1 %v2044_v51  ;;  %2311 = vmatprep.subr.mxu0 %v2232_v50  ;;  %v2231_v51 = vld [vmem:[%s5914_s3 + $0x48] sm:$0xff] }
 0xd26   :  { %4199 = vmatprep.subr.mxu1 %v2059_v52  ;;  %v2233_v52 = vld [vmem:[%s5914_s3 + $0x58] sm:$0xff]  ;;  %2312 = vmatpush1.msra.mxu0 %v2231_v51 }
 0xd27   :  { %4200 = vmatpush3.msra.mxu1 %v2043_v53  ;;  %v2229_v53 = vld [vmem:[%s5914_s3 + $0x38] sm:$0xff] }
 0xd28   :  { %4201 = vmatprep.subr.mxu1 %v2058_v54  ;;  %2313 = vmatprep.subr.mxu0 %v2229_v53  ;;  %v2228_v54 = vld [vmem:[%s5914_s3 + $0x30] sm:$0xff] }
 0xd29   :  { %4202 = vmatpush3.msra.mxu1 %v2042_v25  ;;  %v2230_v25 = vld [vmem:[%s5914_s3 + $0x40] sm:$0xff]  ;;  %2314 = vmatpush1.msra.mxu0 %v2228_v54 }
 0xd2a   :  { %4203 = vmatprep.subr.mxu1 %v2057_v42  ;;  %v2226_v42 = vld [vmem:[%s5914_s3 + $0x20] sm:$0xff] }
 0xd2b   :  { %4204 = vmatpush3.msra.mxu1 %v2041_v55  ;;  %2315 = vmatprep.subr.mxu0 %v2226_v42  ;;  %v2225_v55 = vld [vmem:[%s5914_s3 + $0x18] sm:$0xff] }
 0xd2c   :  { %4205 = vmatprep.subr.mxu1 %v2056_v56  ;;  %v2227_v56 = vld [vmem:[%s5914_s3 + $0x28] sm:$0xff]  ;;  %2316 = vmatpush1.msra.mxu0 %v2225_v55 }
 0xd2d   :  { %4206 = vmatpush3.msra.mxu1 %v2040_v57  ;;  %v2223_v57 = vld [vmem:[%s5914_s3 + $0x8] sm:$0xff] }
 0xd2e   :  { %4207 = vmatprep.subr.mxu1 %v2055_v9  ;;  %2317 = vmatprep.subr.mxu0 %v2223_v57 }
 0xd2f   :  { %4208 = vmatpush3.msra.mxu1 %v2039_v63  ;;  %2318 = vmatpush1.msra.mxu0 %v2222_v58 }
 0xd30   :  { %4209 = vmatprep.subr.mxu1 %v2054_v0  ;;  %4476 = vmatprep.subr.mxu0 %v4701_v5 }
 0xd31   :  { %4210 = vmatpush3.msra.mxu1 %v2038_v1  ;;  %v4051_v1 = vld [vmem:[%s5913_s2] ss:$0 sm:$0xff] }
 0xd32   :  { %4211 = vmatprep.subr.mxu1 %v2053_v4 }
 0xd33   :  { %4212 = vmatpush3.msra.mxu1 %v2037_v6 }
 0xd34   :  { %4213 = vmatprep.subr.mxu1 %v2052_v7  ;;  %v2270_v7 = vld [vmem:[%s5915_s4] sm:$0x7] }
 0xd35   :  { %4214 = vmatpush3.msra.mxu1 %v2036_v23  ;;  %v2275_v23 = vrot.slane %v2270_v7, %v5092_v61 }
 0xd36   :  { %2216 = vmatmul.mubr.f32.vlgmr.msra.gmra.mxu1 %v2147_v8  ;;  %4441 = vmatprep.subr.mxu1 %v4701_v5  ;;  %v2279_v8 = vrot.slane %v2270_v7, %v300_v59 }
 0xd37   :  { %4473 = vmatprep.mubr.msk.f32.mxu1 %vm4703_vm0, %v4701_v5  ;;  %4442 = vmatpush3.msra.mxu1 %v2269_v12 }
 0xd38   :  { %4443 = vmatprep.subr.mxu1 %v4701_v5 }
 0xd39   :  { %4444 = vmatpush3.msra.mxu1 %v2266_v16  ;;  %v2283_v16 = vrot.slane %v2270_v7, %v304_v62 }
 0xd3a   :  { %4445 = vmatprep.subr.mxu1 %v4701_v5 }
 0xd3b   :  { %4446 = vmatpush3.msra.mxu1 %v2263_v18 }
 0xd3c   :  { %4447 = vmatprep.subr.mxu1 %v4701_v5 }
 0xd3d   :  { %4448 = vmatpush3.msra.mxu1 %v2260_v21 }
 0xd3e   :  { %4449 = vmatprep.subr.mxu1 %v4701_v5 }
 0xd3f   :  { %4450 = vmatpush3.msra.mxu1 %v2257_v26 }
 0xd40   :  { %4451 = vmatprep.subr.mxu1 %v4701_v5 }
 0xd41   :  { %4452 = vmatpush3.msra.mxu1 %v2254_v29 }
 0xd42   :  { %4453 = vmatprep.subr.mxu1 %v4701_v5 }
 0xd43   :  { %4454 = vmatpush3.msra.mxu1 %v2251_v32 }
 0xd44   :  { %4455 = vmatprep.subr.mxu1 %v4701_v5 }
 0xd45   :  { %4456 = vmatpush3.msra.mxu1 %v2248_v35 }
 0xd46   :  { %4457 = vmatprep.subr.mxu1 %v4701_v5 }
 0xd47   :  { %4458 = vmatpush3.msra.mxu1 %v2245_v38 }
 0xd48   :  { %4459 = vmatprep.subr.mxu1 %v4701_v5 }
 0xd49   :  { %4460 = vmatpush3.msra.mxu1 %v2242_v41 }
 0xd4a   :  { %4461 = vmatprep.subr.mxu1 %v4701_v5 }
 0xd4b   :  { %4462 = vmatpush3.msra.mxu1 %v2239_v45 }
 0xd4c   :  { %4463 = vmatprep.subr.mxu1 %v4701_v5 }
 0xd4d   :  { %4464 = vmatpush3.msra.mxu1 %v2236_v49 }
 0xd4e   :  { %4465 = vmatprep.subr.mxu1 %v4701_v5 }
 0xd4f   :  { %4466 = vmatpush3.msra.mxu1 %v2233_v52 }
 0xd50   :  { %4467 = vmatprep.subr.mxu1 %v4701_v5 }
 0xd51   :  { %4468 = vmatpush3.msra.mxu1 %v2230_v25 }
 0xd52   :  { %4469 = vmatprep.subr.mxu1 %v4701_v5 }
 0xd53   :  { %4470 = vmatpush3.msra.mxu1 %v2227_v56 }
 0xd54   :  { %4471 = vmatprep.subr.mxu1 %v4701_v5 }
 0xd55   :  { %4472 = vmatpush3.msra.mxu1 %v2224_v60 }
 0xd56   :  { %4486 = vmatprep.subr.mxu1 %v4701_v5 }
 0xdd6   :  { %v5647_v9 = vpop.f32.mrf.mxu1 }
 0xdd8   :  { %v4440_v63 = vpop.f32.mrf.mxu1 }
 0xdf6   :  { %v4215_v0 = vpop.f32.mrf.mxu1 }
 0xdf8   :  { %v4216_v2 = vpop.f32.mrf.mxu1 }
 0xdf9   :  { %v4217_v3 = vadd.f32 %v4216_v2, %v4215_v0 }
 0xdfb   :  { %v2218_v4 = vadd.f32 %v4217_v3, %v4051_v1 }
 0xdfd   :  { %v2221_v6 = vmax.f32 %v2218_v4, 0.0 }
 0xdff   :  { %2352 = vmatmul.mubr.f32.vlgmr.msra.gmra.mxu0 %v2221_v6  ;;  %4474 = vmatmul.mubr.f32.vlgmr.msra.gmra.mxu1 %v2221_v6 }
 0xe00   :  { %4478 = vmatprep.mubr.msk.f32.mxu0 %vm4703_vm0, %v4701_v5  ;;  %4488 = vmatprep.mubr.msk.f32.mxu1 %vm4703_vm0, %v4701_v5 }
 0xebf   :  { %v2353_v10 = vpop.f32.mrf.mxu0  ;;  %v2424_v11 = vpop.f32.mrf.mxu1 }
 0xec0   :  { %v2354_v12 = vadd.f32 %v2353_v10, %v2275_v23  ;;  %v5668_v18 = vadd.f32 %v2424_v11, %v2283_v16 }
 0xec1   :  { %v2355_v13 = vpop.f32.mrf.mxu0  ;;  %v4475_v14 = vpop.f32.mrf.mxu1 }
 0xec2   :  { %v2356_v17 = vadd.f32 %v2355_v13, %v2279_v8  ;;  %2588 = vrot.lane.b32.xlu1 %v2354_v12, %s4704_s13 }
 0xec4   :  { %2590 = vrot.lane.b32.xlu0 %v2356_v17, %s4704_s13  ;;  %4477 = vmatpush3.xpose.msk.msra.mxu0 %vm450_vm1, %v2356_v17 }
 0xec5   :  { %4481 = vmatprep.subr.mxu0 %v4701_v5 }
 0xec6   :  { %2756 = vrot.lane.b32.xlu1 %v2356_v17, %s4705_s14 }
 0xec7   :  { %4479 = vmatmul.mubr.msk.f32.vlgmr.msra.gmra.mxu0 %vm450_vm1, %v2354_v12 }
 0xec8   :  { %2754 = vrot.lane.b32.xlu0 %v2354_v12, %s4705_s14  ;;  %4482 = vmatpush3.msra.mxu0 %v5668_v18 }
 0xec9   :  { %4483 = vmatprep.mubr.msk.f32.mxu0 %vm4703_vm0, %v4701_v5  ;;  %4491 = vmatprep.subr.mxu0 %v4701_v5 }
 0xeca   :  { %2921 = vrot.lane.b32.xlu1 %v2356_v17, %s4706_s15 }
 0xecc   :  { %2919 = vrot.lane.b32.xlu0 %v2354_v12, %s4706_s15 }
 0xece   :  { %3086 = vrot.lane.b32.xlu1 %v2356_v17, %s4707_s16 }
 0xed0   :  { %3084 = vrot.lane.b32.xlu0 %v2354_v12, %s4707_s16 }
 0xed2   :  { %3251 = vrot.lane.b32.xlu1 %v2356_v17, %s4708_s17 }
 0xed4   :  { %3249 = vrot.lane.b32.xlu0 %v2354_v12, %s4708_s17 }
 0xed6   :  { %3416 = vrot.lane.b32.xlu1 %v2356_v17, %s4710_s19 }
 0xed8   :  { %3414 = vrot.lane.b32.xlu0 %v2354_v12, %s4710_s19 }
 0xeda   :  { %3581 = vrot.lane.b32.xlu1 %v2356_v17, %s4709_s18 }
 0xedc   :  { %3579 = vrot.lane.b32.xlu0 %v2354_v12, %s4709_s18 }
 0xf34   :  { %v2589_v15 = vpop.permute.xlu1 %2588 }
 0xf36   :  { %v2591_v59 = vpop.permute.xlu0 %2590 }
 0xf37   :  { %4487 = vmatpush3.xpose.msk.msra.mxu1 %vm450_vm1, %v2591_v59 }
 0xf38   :  { %v2757_v62 = vpop.permute.xlu1 %2756  ;;  %4496 = vmatprep.subr.mxu1 %v4701_v5 }
 0xf3a   :  { %v2755_v19 = vpop.permute.xlu0 %2754  ;;  %4489 = vmatmul.mubr.msk.f32.vlgmr.msra.gmra.mxu1 %vm450_vm1, %v2589_v15 }
 0xf3b   :  { %4497 = vmatpush3.xpose.msk.msra.mxu1 %vm450_vm1, %v2757_v62  ;;  %4498 = vmatprep.mubr.msk.f32.mxu1 %vm4703_vm0, %v4701_v5 }
 0xf3c   :  { %v2922_v20 = vpop.permute.xlu1 %2921  ;;  %4506 = vmatprep.subr.mxu1 %v4701_v5 }
 0xf3e   :  { %v2920_v21 = vpop.permute.xlu0 %2919  ;;  %4499 = vmatmul.mubr.msk.f32.vlgmr.msra.gmra.mxu1 %vm450_vm1, %v2755_v19 }
 0xf3f   :  { %4507 = vmatpush3.xpose.msk.msra.mxu1 %vm450_vm1, %v2922_v20  ;;  %4508 = vmatprep.mubr.msk.f32.mxu1 %vm4703_vm0, %v4701_v5 }
 0xf40   :  { %v3087_v22 = vpop.permute.xlu1 %3086  ;;  %4516 = vmatprep.subr.mxu1 %v4701_v5 }
 0xf42   :  { %v3085_v24 = vpop.permute.xlu0 %3084  ;;  %4509 = vmatmul.mubr.msk.f32.vlgmr.msra.gmra.mxu1 %vm450_vm1, %v2920_v21 }
 0xf43   :  { %4517 = vmatpush3.xpose.msk.msra.mxu1 %vm450_vm1, %v3087_v22  ;;  %4518 = vmatprep.mubr.msk.f32.mxu1 %vm4703_vm0, %v4701_v5 }
 0xf44   :  { %v3252_v26 = vpop.permute.xlu1 %3251  ;;  %4526 = vmatprep.subr.mxu1 %v4701_v5 }
 0xf46   :  { %v3250_v27 = vpop.permute.xlu0 %3249  ;;  %4519 = vmatmul.mubr.msk.f32.vlgmr.msra.gmra.mxu1 %vm450_vm1, %v3085_v24 }
 0xf47   :  { %4527 = vmatpush3.xpose.msk.msra.mxu1 %vm450_vm1, %v3252_v26  ;;  %4528 = vmatprep.mubr.msk.f32.mxu1 %vm4703_vm0, %v4701_v5 }
 0xf48   :  { %v3417_v28 = vpop.permute.xlu1 %3416  ;;  %4536 = vmatprep.subr.mxu1 %v4701_v5 }
 0xf4a   :  { %4529 = vmatmul.mubr.msk.f32.vlgmr.msra.gmra.mxu1 %vm450_vm1, %v3250_v27  ;;  %v3415_v29 = vpop.permute.xlu0 %3414 }
 0xf4b   :  { %4537 = vmatpush3.xpose.msk.msra.mxu1 %vm450_vm1, %v3417_v28  ;;  %4538 = vmatprep.mubr.msk.f32.mxu1 %vm4703_vm0, %v4701_v5 }
 0xf4c   :  { %4546 = vmatprep.subr.mxu1 %v4701_v5  ;;  %v3582_v30 = vpop.permute.xlu1 %3581 }
 0xf4e   :  { %4539 = vmatmul.mubr.msk.f32.vlgmr.msra.gmra.mxu1 %vm450_vm1, %v3415_v29  ;;  %v3580_v31 = vpop.permute.xlu0 %3579 }
 0xf4f   :  { %4547 = vmatpush3.xpose.msk.msra.mxu1 %vm450_vm1, %v3582_v30  ;;  %4548 = vmatprep.mubr.msk.f32.mxu1 %vm4703_vm0, %v4701_v5 }
 0xf50   :  { %4556 = vmatprep.subr.mxu1 %v4701_v5 }
 0xf52   :  { %4549 = vmatmul.mubr.msk.f32.vlgmr.msra.gmra.mxu1 %vm450_vm1, %v3580_v31 }
 0xf53   :  { %4588 = vmatprep.mubr.msk.f32.mxu1 %vm4703_vm0, %v4701_v5 }
 0xf87   :  { %v2500_v32 = vpop.f32.mrf.mxu0 }
 0xf88   :  { %v2504_v33 = vsel %vm527_vm2, %v2500_v32, -inf }
 0xf89   :  { %2505 = vmax.xlane.f32.xlu1 %v2504_v33  ;;  %v4480_v34 = vpop.f32.mrf.mxu0 }
 0xffa   :  { %v2662_v35 = vpop.f32.mrf.mxu1 }
 0xffb   :  { %v2666_v36 = vsel %vm527_vm2, %v2662_v35, -inf }
 0xffc   :  { %2667 = vmax.xlane.f32.xlu0 %v2666_v36  ;;  %v4490_v37 = vpop.f32.mrf.mxu1 }
 0xffe   :  { %v2828_v38 = vpop.f32.mrf.mxu1 }
 0xfff   :  { %v2832_v39 = vsel %vm527_vm2, %v2828_v38, -inf }
0x1000   :  { %2833 = vmax.xlane.f32.xlu0 %v2832_v39  ;;  %v4500_v40 = vpop.f32.mrf.mxu1 }
0x1002   :  { %v2993_v41 = vpop.f32.mrf.mxu1 }
0x1003   :  { %v2997_v43 = vsel %vm527_vm2, %v2993_v41, -inf }
0x1004   :  { %v4510_v44 = vpop.f32.mrf.mxu1  ;;  %2998 = vmax.xlane.f32.xlu1 %v2997_v43 }
0x1006   :  { %v3158_v45 = vpop.f32.mrf.mxu1 }
0x1007   :  { %v3162_v46 = vsel %vm527_vm2, %v3158_v45, -inf }
0x1008   :  { %3163 = vmax.xlane.f32.xlu0 %v3162_v46  ;;  %v4520_v47 = vpop.f32.mrf.mxu1 }
0x100a   :  { %v3323_v48 = vpop.f32.mrf.mxu1 }
0x100b   :  { %v3327_v49 = vsel %vm527_vm2, %v3323_v48, -inf }
0x100c   :  { %v4530_v50 = vpop.f32.mrf.mxu1  ;;  %3328 = vmax.xlane.f32.xlu1 %v3327_v49 }
0x100e   :  { %v3488_v51 = vpop.f32.mrf.mxu1 }
0x100f   :  { %v3492_v52 = vsel %vm527_vm2, %v3488_v51, -inf }
0x1010   :  { %3493 = vmax.xlane.f32.xlu0 %v3492_v52  ;;  %v4540_v53 = vpop.f32.mrf.mxu1 }
0x1012   :  { %v3653_v54 = vpop.f32.mrf.mxu1  ;;  %v2506_v42 = vpop.xlane.xlu1 %2505 }
0x1013   :  { %v2507_v55 = vsub.f32 %v2500_v32, %v2506_v42  ;;  %v3657_v57 = vsel %vm527_vm2, %v3653_v54, -inf }
0x1014   :  { %v4550_v25 = vpop.f32.mrf.mxu1 }
0x1015   :  { %v2508_v56 = vmul.f32 1.442695, %v2507_v55 }
0x1017   :  { %4645 = vpow2.f32 %v2508_v56 }
0x101d   :  { %2843 = vrot.lane.b32.xlu1 %v5668_v18, %s4705_s14 }
0x1024   :  { %v4646_v58 = vpop.eup %4645 }
0x1025   :  { %v2510_v60 = vsel %vm527_vm2, %v4646_v58, 0.0 }
0x1026   :  { %2678 = vrot.lane.b32.xlu0 %v5668_v18, %s4704_s13 }
0x1041   :  { %3658 = vmax.xlane.f32.xlu1 %v3657_v57 }
0x1045   :  { %2511 = vadd.xlane.f32.xlu0 %v2510_v60 }
0x1052   :  { %3008 = vrot.lane.b32.xlu1 %v5668_v18, %s4706_s15 }
0x1085   :  { %v2668_v63 = vpop.xlane.xlu0 %2667 }
0x1086   :  { %v2669_v0 = vsub.f32 %v2662_v35, %v2668_v63 }
0x1088   :  { %v2670_v1 = vmul.f32 1.442695, %v2669_v0 }
0x1089   :  { %v2834_v2 = vpop.xlane.xlu0 %2833 }
0x108a   :  { %4647 = vpow2.f32 %v2670_v1  ;;  %v2835_v3 = vsub.f32 %v2828_v38, %v2834_v2 }
0x108c   :  { %v2836_v4 = vmul.f32 1.442695, %v2835_v3 }
0x108d   :  { %v2999_v10 = vpop.xlane.xlu1 %2998 }
0x108e   :  { %4649 = vpow2.f32 %v2836_v4  ;;  %v3000_v11 = vsub.f32 %v2993_v41, %v2999_v10  ;;  %v3791_v10 = vld [vmem:[%s5916_s5 + $0x60] sm:$0xff] }
0x1090   :  { %v3001_v16 = vmul.f32 1.442695, %v3000_v11  ;;  %v3790_v11 = vld [vmem:[%s5916_s5 + $0x58] sm:$0xff] }
0x1091   :  { %v3164_v12 = vpop.xlane.xlu0 %3163 }
0x1092   :  { %v3165_v14 = vsub.f32 %v3158_v45, %v3164_v12  ;;  %4651 = vpow2.f32 %v3001_v16  ;;  %v3788_v16 = vld [vmem:[%s5916_s5 + $0x48] sm:$0xff] }
0x1094   :  { %v3166_v59 = vmul.f32 1.442695, %v3165_v14 }
0x1095   :  { %v3329_v13 = vpop.xlane.xlu1 %3328 }
0x1096   :  { %v3330_v17 = vsub.f32 %v3323_v48, %v3329_v13  ;;  %4653 = vpow2.f32 %v3166_v59  ;;  %v3789_v13 = vld [vmem:[%s5916_s5 + $0x50] sm:$0xff]  ;;  %v3787_v59 = vld [vmem:[%s5916_s5 + $0x40] sm:$0xff] }
0x1097   :  { %v4648_v6 = vpop.eup %4647 }
0x1098   :  { %v2672_v7 = vsel %vm527_vm2, %v4648_v6, 0.0  ;;  %v3331_v62 = vmul.f32 1.442695, %v3330_v17 }
0x1099   :  { %2673 = vadd.xlane.f32.xlu1 %v2672_v7  ;;  %v3494_v15 = vpop.xlane.xlu0 %3493  ;;  %v2844_v21 = vpop.permute.xlu1 %2843  ;;  %v3794_v7 = vld [vmem:[%s5916_s5 + $0x78] sm:$0xff] }
0x109a   :  { %v3495_v19 = vsub.f32 %v3488_v51, %v3494_v15  ;;  %4655 = vpow2.f32 %v3331_v62  ;;  %4557 = vmatpush3.msra.mxu1 %v3794_v7  ;;  %v3786_v62 = vld [vmem:[%s5916_s5 + $0x38] sm:$0xff]  ;;  %v4077_v7 = vld [vmem:[%s5918_s7] ss:$0 sm:$0xff] }
0x109b   :  { %v5738_v23 = vpop.eup %4649  ;;  %4558 = vmatprep.subr.mxu1 %v4701_v5 }
0x109c   :  { %v2838_v8 = vsel %vm527_vm2, %v5738_v23, 0.0  ;;  %v3496_v20 = vmul.f32 1.442695, %v3495_v19  ;;  %v3785_v19 = vld [vmem:[%s5916_s5 + $0x30] sm:$0xff] }
0x109d   :  { %2839 = vadd.xlane.f32.xlu0 %v2838_v8  ;;  %v2679_v24 = vpop.permute.xlu0 %2678  ;;  %v3792_v8 = vld [vmem:[%s5916_s5 + $0x68] sm:$0xff] }
0x109e   :  { %4657 = vpow2.f32 %v3496_v20  ;;  %v3784_v20 = vld [vmem:[%s5916_s5 + $0x28] sm:$0xff] }
0x109f   :  { %v4652_v22 = vpop.eup %4651 }
0x10a0   :  { %v3003_v30 = vsel %vm527_vm2, %v4652_v22, 0.0 }
0x10a3   :  { %v4654_v28 = vpop.eup %4653 }
0x10a4   :  { %v3168_v33 = vsel %vm527_vm2, %v4654_v28, 0.0 }
0x10a7   :  { %v5747_v31 = vpop.eup %4655 }
0x10a8   :  { %v3333_v34 = vsel %vm527_vm2, %v5747_v31, 0.0 }
0x10aa   :  { %3338 = vrot.lane.b32.xlu1 %v5668_v18, %s4708_s17 }
0x10ab   :  { %v5752_v35 = vpop.eup %4657 }
0x10ac   :  { %v3498_v36 = vsel %vm527_vm2, %v5752_v35, 0.0 }
0x10b3   :  { %3173 = vrot.lane.b32.xlu0 %v5668_v18, %s4707_s16 }
0x10ca   :  { %v3659_v26 = vpop.xlane.xlu1 %3658 }
0x10cb   :  { %v3660_v27 = vsub.f32 %v3653_v54, %v3659_v26  ;;  %v3781_v26 = vld [vmem:[%s5916_s5 + $0x10] sm:$0xff] }
0x10cd   :  { %v3661_v29 = vmul.f32 1.442695, %v3660_v27  ;;  %v3780_v27 = vld [vmem:[%s5916_s5 + $0x8] sm:$0xff] }
0x10ce   :  { %v2512_v32 = vpop.xlane.xlu0 %2511  ;;  %3004 = vadd.xlane.f32.xlu1 %v3003_v30  ;;  %v3009_v41 = vpop.permute.xlu1 %3008  ;;  %v3779_v30 = vld [vmem:[%s5916_s5] sm:$0xff] }
0x10cf   :  { %4659 = vpow2.f32 %v3661_v29 }
0x10d0   :  { %4661 = vrcp.f32 %v2512_v32 }
0x10d2   :  { %3169 = vadd.xlane.f32.xlu0 %v3168_v33  ;;  %3334 = vadd.xlane.f32.xlu1 %v3333_v34 }
0x10d6   :  { %3499 = vadd.xlane.f32.xlu0 %v3498_v36 }
0x10dc   :  { %v5756_v37 = vpop.eup %4659 }
0x10dd   :  { %v4662_v38 = vpop.eup %4661  ;;  %v3663_v39 = vsel %vm527_vm2, %v5756_v37, 0.0 }
0x10de   :  { %3664 = vadd.xlane.f32.xlu1 %v3663_v39  ;;  %v2514_v40 = vmul.f32 %v4662_v38, %v4646_v58 }
0x10e0   :  { %4484 = vmatmul.mubr.msk.f32.vlgmr.msra.gmra.mxu0 %vm527_vm2, %v2514_v40 }
0x10e1   :  { %4492 = vmatpush3.msra.mxu0 %v2679_v24  ;;  %4493 = vmatprep.mubr.msk.f32.mxu0 %vm4703_vm0, %v4701_v5 }
0x10e2   :  { %4501 = vmatprep.subr.mxu0 %v4701_v5 }
0x10ec   :  { %3503 = vrot.lane.b32.xlu0 %v5668_v18, %s4710_s19 }
0x10ef   :  { %3668 = vrot.lane.b32.xlu1 %v5668_v18, %s4709_s18 }
0x1122   :  { %v2674_v43 = vpop.xlane.xlu1 %2673 }
0x1123   :  { %4663 = vrcp.f32 %v2674_v43 }
0x1126   :  { %v2840_v44 = vpop.xlane.xlu0 %2839  ;;  %v3339_v18 = vpop.permute.xlu1 %3338 }
0x1127   :  { %4665 = vrcp.f32 %v2840_v44 }
0x112a   :  { %v3174_v49 = vpop.permute.xlu0 %3173 }
0x1130   :  { %v4664_v45 = vpop.eup %4663 }
0x1131   :  { %v2676_v46 = vmul.f32 %v4664_v45, %v4648_v6 }
0x1133   :  { %4494 = vmatmul.mubr.msk.f32.vlgmr.msra.gmra.mxu0 %vm527_vm2, %v2676_v46 }
0x1134   :  { %v4666_v47 = vpop.eup %4665  ;;  %4502 = vmatpush3.msra.mxu0 %v2844_v21  ;;  %4503 = vmatprep.mubr.msk.f32.mxu0 %vm4703_vm0, %v4701_v5  ;;  %v3783_v21 = vld [vmem:[%s5916_s5 + $0x20] sm:$0xff] }
0x1135   :  { %4511 = vmatprep.subr.mxu0 %v4701_v5  ;;  %v2842_v48 = vmul.f32 %v4666_v47, %v5738_v23  ;;  %v3793_v23 = vld [vmem:[%s5916_s5 + $0x70] sm:$0xff] }
0x1136   :  { %4559 = vmatpush3.msra.mxu1 %v3793_v23 }
0x1137   :  { %4504 = vmatmul.mubr.msk.f32.vlgmr.msra.gmra.mxu0 %vm527_vm2, %v2842_v48  ;;  %4560 = vmatprep.subr.mxu1 %v4701_v5 }
0x1138   :  { %4512 = vmatpush3.msra.mxu0 %v3009_v41  ;;  %4513 = vmatprep.mubr.msk.f32.mxu0 %vm4703_vm0, %v4701_v5 }
0x1139   :  { %4521 = vmatprep.subr.mxu0 %v4701_v5  ;;  %4561 = vmatpush3.msra.mxu1 %v3792_v8  ;;  %v4078_v8 = vld [vmem:[%s5919_s8] ss:$0 sm:$0xff]  ;;  %s4712_s8 = smov [#allocation3]  }
0x113a   :  { %4562 = vmatprep.subr.mxu1 %v4701_v5 }
0x113b   :  { %4563 = vmatpush3.msra.mxu1 %v3791_v10 }
0x113c   :  { %4564 = vmatprep.subr.mxu1 %v4701_v5 }
0x113d   :  { %4565 = vmatpush3.msra.mxu1 %v3790_v11 }
0x113e   :  { %4566 = vmatprep.subr.mxu1 %v4701_v5 }
0x113f   :  { %4567 = vmatpush3.msra.mxu1 %v3789_v13 }
0x1140   :  { %4568 = vmatprep.subr.mxu1 %v4701_v5 }
0x1141   :  { %4569 = vmatpush3.msra.mxu1 %v3788_v16 }
0x1142   :  { %4570 = vmatprep.subr.mxu1 %v4701_v5 }
0x1143   :  { %4571 = vmatpush3.msra.mxu1 %v3787_v59 }
0x1144   :  { %4572 = vmatprep.subr.mxu1 %v4701_v5 }
0x1145   :  { %4573 = vmatpush3.msra.mxu1 %v3786_v62 }
0x1146   :  { %4574 = vmatprep.subr.mxu1 %v4701_v5 }
0x1147   :  { %4575 = vmatpush3.msra.mxu1 %v3785_v19 }
0x1148   :  { %4576 = vmatprep.subr.mxu1 %v4701_v5 }
0x1149   :  { %4577 = vmatpush3.msra.mxu1 %v3784_v20 }
0x114a   :  { %4578 = vmatprep.subr.mxu1 %v4701_v5 }
0x114b   :  { %4579 = vmatpush3.msra.mxu1 %v3783_v21 }
0x114c   :  { %4580 = vmatprep.subr.mxu1 %v4701_v5 }
0x1157   :  { %v3005_v50 = vpop.xlane.xlu1 %3004 }
0x1158   :  { %4667 = vrcp.f32 %v3005_v50 }
0x115b   :  { %v3170_v51 = vpop.xlane.xlu0 %3169  ;;  %v3335_v52 = vpop.xlane.xlu1 %3334 }
0x115c   :  { %4669 = vrcp.f32 %v3170_v51  ;;  %v4076_v51 = vld [vmem:[%s5917_s6] ss:$0 sm:$0xff] }
0x115d   :  { %4671 = vrcp.f32 %v3335_v52 }
0x115f   :  { %v3500_v53 = vpop.xlane.xlu0 %3499 }
0x1160   :  { %4673 = vrcp.f32 %v3500_v53 }
0x1163   :  { %v3504_v63 = vpop.permute.xlu0 %3503 }
0x1165   :  { %v4668_v54 = vpop.eup %4667 }
0x1166   :  { %v3007_v25 = vmul.f32 %v4668_v54, %v4652_v22  ;;  %v3782_v22 = vld [vmem:[%s5916_s5 + $0x18] sm:$0xff] }
0x1167   :  { %v3665_v42 = vpop.xlane.xlu1 %3664  ;;  %4581 = vmatpush3.msra.mxu1 %v3782_v22 }
0x1168   :  { %4675 = vrcp.f32 %v3665_v42  ;;  %4514 = vmatmul.mubr.msk.f32.vlgmr.msra.gmra.mxu0 %vm527_vm2, %v3007_v25  ;;  %4582 = vmatprep.subr.mxu1 %v4701_v5  ;;  %v4711_v25 = vmov 0  }
0x1169   :  { %v4670_v55 = vpop.eup %4669  ;;  %4522 = vmatpush3.msra.mxu0 %v3174_v49  ;;  %4523 = vmatprep.mubr.msk.f32.mxu0 %vm4703_vm0, %v4701_v5 }
0x116a   :  { %4531 = vmatprep.subr.mxu0 %v4701_v5  ;;  %v3172_v56 = vmul.f32 %v4670_v55, %v4654_v28  ;;  %v4672_v57 = vpop.eup %4671  ;;  %4583 = vmatpush3.msra.mxu1 %v3781_v26 }
0x116b   :  { %v3337_v58 = vmul.f32 %v4672_v57, %v5747_v31  ;;  %v3669_v1 = vpop.permute.xlu1 %3668  ;;  %4584 = vmatprep.subr.mxu1 %v4701_v5  ;;  %4609 = vset.pattern.permute.xlu0 %v4711_v25 }
0x116c   :  { %4524 = vmatmul.mubr.msk.f32.vlgmr.msra.gmra.mxu0 %vm527_vm2, %v3172_v56  ;;  %4585 = vmatpush3.msra.mxu1 %v3780_v27 }
0x116d   :  { %4532 = vmatpush3.msra.mxu0 %v3339_v18  ;;  %4533 = vmatprep.mubr.msk.f32.mxu0 %vm4703_vm0, %v4701_v5  ;;  %v4674_v60 = vpop.eup %4673 }
0x116e   :  { %4541 = vmatprep.subr.mxu0 %v4701_v5  ;;  %v3502_v0 = vmul.f32 %v4674_v60, %v5752_v35  ;;  %4586 = vmatprep.subr.mxu1 %v4701_v5 }
0x116f   :  { %4587 = vmatpush3.msra.mxu1 %v3779_v30  ;;  %4610 = vset.pattern.permute.xlu1 %v4711_v25 }
0x1170   :  { %4534 = vmatmul.mubr.msk.f32.vlgmr.msra.gmra.mxu0 %vm527_vm2, %v3337_v58  ;;  %v1931_v58 = vld [vmem:[#allocation2] sm:$0x1] }
0x1171   :  { %4542 = vmatpush3.msra.mxu0 %v3504_v63  ;;  %4543 = vmatprep.mubr.msk.f32.mxu0 %vm4703_vm0, %v4701_v5 }
0x1172   :  { %4551 = vmatprep.subr.mxu0 %v4701_v5 }
0x1174   :  { %4544 = vmatmul.mubr.msk.f32.vlgmr.msra.gmra.mxu0 %vm527_vm2, %v3502_v0 }
0x1175   :  { %v4676_v2 = vpop.eup %4675  ;;  %4552 = vmatpush3.msra.mxu0 %v3669_v1  ;;  %4553 = vmatprep.mubr.msk.f32.mxu0 %vm4703_vm0, %v4701_v5 }
0x1176   :  { %v3667_v3 = vmul.f32 %v4676_v2, %v5756_v37  ;;  %4591 = vmatprep.subr.mxu0 %v4701_v5 }
0x1178   :  { %4554 = vmatmul.mubr.msk.f32.vlgmr.msra.gmra.mxu0 %vm527_vm2, %v3667_v3 }
0x1179   :  { %4593 = vmatprep.mubr.msk.f32.mxu0 %vm4703_vm0, %v4701_v5 }
0x11a0   :  { %v5799_v4 = vpop.f32.mrf.mxu0 }
0x11a2   :  { %v4485_v6 = vpop.f32.mrf.mxu0 }
0x11f3   :  { %v2750_v12 = vpop.f32.mrf.mxu0 }
0x11f4   :  { %3745 = vrot.lane.b32.xlu0 %v2750_v12, %s4709_s18  ;;  %v3900_v12 = vld [vmem:[#allocation2] sm:$0x1] }
0x11f5   :  { %v4495_v14 = vpop.f32.mrf.mxu0 }
0x11f7   :  { %v2915_v17 = vpop.f32.mrf.mxu0 }
0x11f8   :  { %3749 = vrot.lane.b32.xlu1 %v2915_v17, %s4710_s19 }
0x11f9   :  { %v4505_v15 = vpop.f32.mrf.mxu0 }
0x1228   :  { %v3080_v24 = vpop.f32.mrf.mxu0 }
0x1229   :  { %3753 = vrot.lane.b32.xlu0 %v3080_v24, %s4708_s17 }
0x122a   :  { %v4515_v28 = vpop.f32.mrf.mxu0 }
0x122c   :  { %v3245_v29 = vpop.f32.mrf.mxu0 }
0x122d   :  { %3757 = vrot.lane.b32.xlu1 %v3245_v29, %s4707_s16 }
0x122e   :  { %v4525_v31 = vpop.f32.mrf.mxu0 }
0x1230   :  { %v3410_v32 = vpop.f32.mrf.mxu0 }
0x1231   :  { %3761 = vrot.lane.b32.xlu0 %v3410_v32, %s4706_s15 }
0x1232   :  { %v4535_v33 = vpop.f32.mrf.mxu0 }
0x1234   :  { %v3575_v34 = vpop.f32.mrf.mxu0 }
0x1235   :  { %3765 = vrot.lane.b32.xlu1 %v3575_v34, %s4705_s14 }
0x1236   :  { %v4545_v35 = vpop.f32.mrf.mxu0 }
0x1238   :  { %v3740_v36 = vpop.f32.mrf.mxu0 }
0x1239   :  { %3769 = vrot.lane.b32.xlu0 %v3740_v36, %s4704_s13 }
0x123a   :  { %v4555_v5 = vpop.f32.mrf.mxu0 }
0x1266   :  { %v3746_v37 = vpop.permute.xlu0 %3745 }
0x1267   :  { %v3772_v41 = vsel %vm450_vm1, %v5799_v4, %v3746_v37 }
0x126a   :  { %v3750_v38 = vpop.permute.xlu1 %3749 }
0x126b   :  { %v3773_v43 = vsel %vm1797_vm3, %v3772_v41, %v3750_v38 }
0x129b   :  { %v3754_v39 = vpop.permute.xlu0 %3753 }
0x129c   :  { %v3774_v45 = vsel %vm1799_vm4, %v3773_v43, %v3754_v39 }
0x129f   :  { %v3758_v40 = vpop.permute.xlu1 %3757 }
0x12a0   :  { %v3775_v47 = vsel %vm1801_vm5, %v3774_v45, %v3758_v40 }
0x12a3   :  { %v3762_v44 = vpop.permute.xlu0 %3761 }
0x12a4   :  { %v3776_v48 = vsel %vm1803_vm6, %v3775_v47, %v3762_v44 }
0x12a7   :  { %v3766_v46 = vpop.permute.xlu1 %3765 }
0x12a8   :  { %v3777_v18 = vsel %vm1805_vm7, %v3776_v48, %v3766_v46 }
0x12ab   :  { %v3770_v49 = vpop.permute.xlu0 %3769 }
0x12ac   :  { %v3778_v50 = vsel %vm1807_vm8, %v3777_v18, %v3770_v49 }
0x12ad   :  { %4589 = vmatmul.mubr.f32.vlgmr.msra.gmra.mxu1 %v3778_v50 }
0x136d   :  { %v3868_v52 = vpop.f32.mrf.mxu1 }
0x136e   :  { %v3869_v53 = vadd.f32 %v4076_v51, %v3868_v52 }
0x136f   :  { %v4590_v54 = vpop.f32.mrf.mxu1 }
0x1370   :  { %3872 = vadd.xlane.f32.xlu1 %v3869_v53 }
0x13f9   :  { %v3873_v42 = vpop.xlane.xlu1 %3872 }
0x13fa   :  { %v3874_v55 = vmul.f32 0.0078125, %v3873_v42 }
0x13fc   :  { %v3875_v56 = vsub.f32 %v3869_v53, %v3874_v55 }
0x13fe   :  { %v3876_v57 = vmul.f32 %v3875_v56, %v3875_v56 }
0x1400   :  { %3877 = vadd.xlane.f32.xlu0 %v3876_v57 }
0x1416   :  { %1934 = vperm.xlu0 %4609, %v1931_v58  }
0x1489   :  { %v3878_v60 = vpop.xlane.xlu0 %3877 }
0x148a   :  { %v3879_v63 = vmul.f32 0.0078125, %v3878_v60 }
0x148c   :  { %v3880_v0 = vadd.f32 1e-05, %v3879_v63 }
0x148e   :  { %4677 = vrsqrt.f32 %v3880_v0 }
0x1491   :  { %v1935_v1 = vpop.permute.xlu0 %1934 }
0x1492   :  { %v1940_v2 = vrot.slane %v1935_v1, %v5092_v61 }
0x1494   :  { %v2008_v3 = vadd.f32 %v5647_v9, %v1940_v2  ;;  %v3899_v9 = vld [vmem:[%s5920_s9] sm:$0x1]  ;;  %s3993_s9 = sshll.u32 %s4712_s8, 4  ;;  %s3994_s9 = int_to_ptr.vmem [resolvable:$true] %s3993_s9 }
0x1495   :  { %s4679_s26 = scalar_lea.vmem %s3994_s9, 32  ;;  %p4684_p1 = scmp.lt.s32.totalorder %s3994_s9, %s3994_s9 }
0x1496   :  { %v2013_v4 = vsel %vm2011_vm9, %v2008_v3, 0.0  ;;  %2012 = vst.msk [vmem:[#allocation3] sm:$0x1] %vm2011_vm9, %v2008_v3  ;;  %p4680_p0 = scmp.ne.s32.totalorder %s3994_s9, %s4679_s26  ;;  %p4685_p2 = scmp.lt.s32.totalorder %s4679_s26, %s4679_s26 }
0x1497   :  { %2014 = vadd.xlane.f32.xlu1 %v2013_v4 }
0x1498   :  { %p4686_p3 = por %p4685_p2, %p4684_p1 }
0x149a   :  { %p4687_p4 = pnand %p4686_p3, %p4680_p0 }
0x149b   :  { %v4678_v6 = vpop.eup %4677 }
0x149c   :  { %v3882_v23 = vmul.f32 %v4678_v6, %v3875_v56 }
0x149e   :  { %v3890_v10 = vmul.f32 %v4077_v7, %v3882_v23 }
0x14a0   :  { %v3898_v11 = vadd.f32 %v4078_v8, %v3890_v10 }
0x14a2   :  { %4592 = vmatpush3.xpose.msra.mxu0 %v3898_v11 }
0x14a5   :  { %4594 = vmatmul.mubr.f32.vlgmr.msra.gmra.mxu0 %v3899_v9 }
0x14a8   :  { %3903 = vperm.xlu1 %4610, %v3900_v12  }
0x1520   :  { %v2015_v13 = vpop.xlane.xlu1 %2014 }
0x1521   :  { %v2017_v14 = vmul.f32 0.125, %v2015_v13 }
0x1523   :  { %2019 = vst.msk [vmem:[%s5923_s12] sm:$0x1] %vm2018_vm10, %v2017_v14 }
0x1524   :  { %v3904_v16 = vpop.permute.xlu1 %3903 }
0x1525   :  { %v3909_v17 = vrot.slane %v3904_v16, %v5092_v61 }
0x1565   :  { %v3976_v15 = vpop.f32.mrf.mxu0 }
0x1566   :  { %v3977_v59 = vadd.f32 %v3976_v15, %v3909_v17 }
0x1567   :  { %v4595_v62 = vpop.f32.mrf.mxu0 }
0x1568   :  { %3981 = vst.msk [vmem:[#allocation3 + $0x1] sm:$0x1] %vm2011_vm9, %v3977_v59  ;;  %v3982_v19 = vsel %vm2011_vm9, %v3977_v59, 0.0 }
0x1569   :  { %3983 = vadd.xlane.f32.xlu1 %v3982_v19 }
0x156a   :  { %4690 = shalt.err (!%p4687_p4)
}
0x156b   :  { %s4713_s2 = smov 1  }
0x156c   :  { %3999 = dma.vmem_to_hbm [thread:$0]  %s3994_s9, 32, %s5922_s11, [#allocation4], %s4709_s18, %s4709_s18, %s4713_s2  }
0x15f2   :  { %v3984_v61 = vpop.xlane.xlu1 %3983 }
0x15f3   :  { %v3985_v20 = vmul.f32 0.125, %v3984_v61 }
0x15f5   :  { %4079 = vst.msk [vmem:[%s5923_s12 + $0x1] sm:$0x1] %vm2018_vm10, %v3985_v20 }
0x15f6   :  { %4699 = dma.done.wait [#allocation4], 32  }
0x15f7   :  { %4700 = vsyncadd [#allocation4], 4294967264 }
0x15f8   :  { %4007 = vsyncpa [#allocation4], 1 }

</bundles_post_ra>
